<compile_context>
chip_gen: v6e
topology: v6e:2x2x1
jax: 0.10.0
libtpu: 0.0.40
codegen_flags: <defaults>
</compile_context>

<pallas_src>
import functools
import math

import jax
import jax.numpy as jnp
from jax.experimental import pallas as pl
from jax.experimental.pallas import tpu as pltpu


def _round_up(x, m):
  return ((x + m - 1) // m) * m


def _vmem_limit_bytes():
  # v5e/v6e: 128 MiB physical VMEM, v7x: 64 MiB -> budget ~75% of whatever
  # this chip actually has (capped at 96 MiB) instead of one hard-coded value.
  try:
    info = pltpu.get_tpu_info()
    cap = int(getattr(info, "vmem_capacity_bytes", 64 * 1024 * 1024))
  except Exception:
    cap = 64 * 1024 * 1024
  return min(96 * 1024 * 1024, cap * 3 // 4)


# --------------------------------------------------------------------------
# Fused decoder-block-stack kernel (one grid step == a tile of the batch)
# --------------------------------------------------------------------------

_BLOCK_KEYS = (
    "sa_wq", "sa_wk", "sa_wv", "sa_wo", "sa_bo",
    "ln0_g", "ln0_b",
    "ca_wq", "ca_wk", "ca_wv", "ca_wo", "ca_bo",
    "ln1_g", "ln1_b", "ln2_g", "ln2_b",
    "ff_w1", "ff_b1", "ff_w2", "ff_b2",
)


def _decoder_stack_kernel(
    # per-grid-step activations (a tile of the batch)
    x_ref, enc_ref, bias_ref,
    # shared decoder-block weights (constant index_map -> VMEM resident)
    sa_wq_ref, sa_wk_ref, sa_wv_ref, sa_wo_ref, sa_bo_ref,
    ln0_g_ref, ln0_b_ref,
    ca_wq_ref, ca_wk_ref, ca_wv_ref, ca_wo_ref, ca_bo_ref,
    ln1_g_ref, ln1_b_ref, ln2_g_ref, ln2_b_ref,
    ff_w1_ref, ff_b1_ref, ff_w2_ref, ff_b2_ref,
    # output
    out_ref,
    *, heads, hidden, num_layers, eps):
  f32, bf16 = jnp.float32, jnp.bfloat16
  bt, l_q, hp = x_ref.shape
  l_kv = enc_ref.shape[1]
  hq = sa_wq_ref.shape[1]          # heads * dp, dp = head_dim padded to 128
  dp = hq // heads
  m = bt * l_q
  inv_h = 1.0 / float(hidden)

  def layernorm(x, g, b):
    # Statistics over the REAL hidden features only: padded lanes are zero, so
    # sum(x)/H and sum(x*x)/H are exact; gamma/beta are zero-padded so the
    # padded lanes come back out as exact zeros (keeps the padding invariant).
    mu = jnp.sum(x, axis=-1, keepdims=True) * inv_h
    var = jnp.sum(x * x, axis=-1, keepdims=True) * inv_h - mu * mu
    return (x - mu) * jax.lax.rsqrt(var + eps) * g + b

  def mha(q2d, k3d, v3d, bias, wo_ref, bo_ref):
    """q2d: (M, Hq) bf16; k3d/v3d: (bt, Lkv, Hq) bf16.

    Per-head slots are 128-lane aligned, so slicing and concatenation never
    need unaligned lane relayouts; scores/PV are batched dot_generals (no
    materialized transpose); the output projection is ONE (M,Hq)@(Hq,Hp)
    matmul with the row-expanded fc_out weight.
    """
    q3 = q2d.reshape(bt, l_q, hq)
    ctx = []
    for h_idx in range(heads):
      sl = slice(h_idx * dp, (h_idx + 1) * dp)
      s = jnp.einsum("bqd,bkd->bqk", q3[:, :, sl], k3d[:, :, sl],
                     preferred_element_type=f32)
      if bias is not None:
        s = s + bias                    # additive mask; 1/sqrt(H) pre-folded
      s = s - jnp.max(s, axis=-1, keepdims=True)      # fp32 softmax stats
      p = jnp.exp(s)
      p = p * pl.reciprocal(jnp.sum(p, axis=-1, keepdims=True), approx=True)
      ctx.append(jnp.einsum("bqk,bkd->bqd", p.astype(bf16), v3d[:, :, sl],
                            preferred_element_type=f32))
    o_all = jnp.concatenate(ctx, axis=-1).reshape(m, hq)  # 128-aligned concat
    return (jnp.dot(o_all.astype(bf16), wo_ref[...],
                    preferred_element_type=f32) + bo_ref[...])

  x = x_ref[...].reshape(m, hp)                         # (M, Hp) fp32
  bias = bias_ref[...]                                  # (bt, Lq, Lq) fp32

  # Cross-attention K/V depend only on enc_out and the SHARED block weights,
  # so they are identical for every layer -> computed once, reused in-loop.
  enc_bf = enc_ref[...].reshape(bt * l_kv, hp).astype(bf16)
  k_enc = jnp.dot(enc_bf, ca_wk_ref[...],
                  preferred_element_type=f32).reshape(bt, l_kv, hq).astype(bf16)
  v_enc = jnp.dot(enc_bf, ca_wv_ref[...],
                  preferred_element_type=f32).reshape(bt, l_kv, hq).astype(bf16)

  def layer(_, out):
    # Weight refs are read at point of use -> fori_loop bounds live ranges.
    ob = out.astype(bf16)
    # --- masked self-attention + residual + LayerNorm ---------------------
    q = jnp.dot(ob, sa_wq_ref[...], preferred_element_type=f32).astype(bf16)
    k = jnp.dot(ob, sa_wk_ref[...],
                preferred_element_type=f32).reshape(bt, l_q, hq).astype(bf16)
    v = jnp.dot(ob, sa_wv_ref[...],
                preferred_element_type=f32).reshape(bt, l_q, hq).astype(bf16)
    attn = mha(q, k, v, bias, sa_wo_ref, sa_bo_ref)
    queries = layernorm(attn + out, ln0_g_ref[...], ln0_b_ref[...])
    # --- cross-attention (reference passes no mask here) + LayerNorm ------
    q2 = jnp.dot(queries.astype(bf16), ca_wq_ref[...],
                 preferred_element_type=f32).astype(bf16)
    attn2 = mha(q2, k_enc, v_enc, None, ca_wo_ref, ca_bo_ref)
    h1 = layernorm(attn2 + queries, ln1_g_ref[...], ln1_b_ref[...])
    # --- feed-forward + residual + LayerNorm -------------------------------
    ff = jnp.dot(h1.astype(bf16), ff_w1_ref[...],
                 preferred_element_type=f32) + ff_b1_ref[...]
    ff = jnp.maximum(ff, 0.0)
    ff = jnp.dot(ff.astype(bf16), ff_w2_ref[...],
                 preferred_element_type=f32) + ff_b2_ref[...]
    return layernorm(ff + h1, ln2_g_ref[...], ln2_b_ref[...])

  out = jax.lax.fori_loop(0, num_layers, layer, x)
  out_ref[...] = out.reshape(bt, l_q, hp).astype(out_ref.dtype)


def decoder_stack(x, enc, bias, blk, *, heads, hidden, num_layers, eps=1e-5):
  """x: (N, Lq, Hp) fp32, enc: (N, Lk, Hp) fp32, bias: (N, Lq, Lq) fp32.
  Returns (N, Lq, Hp) bf16 (feeds straight into the bf16 vocab matmul)."""
  n, l_dec, hp = x.shape
  l_enc = enc.shape[1]

  # Merge batch elements per grid step so projection/FFN matmuls see
  # M = bt*Lq rows, but keep >=2 "parallel" steps when possible so both v7x
  # TensorCores stay busy (v5e/v6e have a single TC and are unaffected).
  bt = max(1, min(n, 128 // max(1, l_dec)))
  if n > 1 and n // bt < 2:
    bt = (n + 1) // 2
  n_pad = _round_up(n, bt)
  if n_pad != n:
    pad = ((0, n_pad - n), (0, 0), (0, 0))
    x, enc, bias = jnp.pad(x, pad), jnp.pad(enc, pad), jnp.pad(bias, pad)

  weights = [blk[kk] for kk in _BLOCK_KEYS]
  # Constant index_map -> the shared weights are DMA'd to VMEM once and reused
  # by every grid step.  (pl.Buffered(1) would halve their VMEM footprint
  # further; left at the default buffering for portability.)
  in_specs = [
      pl.BlockSpec((bt, l_dec, hp), lambda i: (i, 0, 0)),      # x
      pl.BlockSpec((bt, l_enc, hp), lambda i: (i, 0, 0)),      # enc_out
      pl.BlockSpec((bt, l_dec, l_dec), lambda i: (i, 0, 0)),   # mask bias
  ] + [pl.BlockSpec(w.shape, lambda i: (0, 0)) for w in weights]

  out = pl.pallas_call(
      functools.partial(_decoder_stack_kernel, heads=heads, hidden=hidden,
                        num_layers=num_layers, eps=eps),
      out_shape=jax.ShapeDtypeStruct((n_pad, l_dec, hp), jnp.bfloat16),
      grid=(n_pad // bt,),
      in_specs=in_specs,
      out_specs=pl.BlockSpec((bt, l_dec, hp), lambda i: (i, 0, 0)),
      compiler_params=pltpu.CompilerParams(
          dimension_semantics=("parallel",),
          vmem_limit_bytes=_vmem_limit_bytes()),
  )(x, enc, bias, *weights)
  return out[:n]


# --------------------------------------------------------------------------
# Tiled linear (final vocab projection): lane-dense, K-blocked accumulator
# --------------------------------------------------------------------------

def _matmul_bias_kernel(x_ref, w_ref, b_ref, o_ref, acc_ref):
  @pl.when(pl.program_id(2) == 0)
  def _():
    acc_ref[...] = jnp.zeros_like(acc_ref)
  acc_ref[...] += jnp.dot(x_ref[...], w_ref[...],
                          preferred_element_type=jnp.float32)
  @pl.when(pl.program_id(2) == pl.num_programs(2) - 1)
  def _():
    o_ref[...] = acc_ref[...] + b_ref[...]


def _pick_tile(dim, candidates):
  for c in candidates:
    if c <= dim and dim % c == 0:
      return c
  return dim


def tiled_linear(x, w, b):
  """y = x @ w + b.  x/w bf16 with K and N already padded to multiples of 128
  (done ONCE in prepare_params), b fp32 (1, N).  fp32 VMEM accumulator,
  K-blocked with pl.when init/finalize, lane-dense unmasked output stores."""
  m, k = x.shape
  n_out = w.shape[1]
  # Full-K tiles when K fits (it is the MXU contraction depth), tn up to 512
  # lanes, tm up to 512 rows -- well under the per-chip VMEM budget.
  tk = k if k <= 2048 else _pick_tile(k, (2048, 1536, 1024, 512, 256, 128))
  tn = _pick_tile(n_out, (512, 384, 256, 128))
  m8 = _round_up(m, 8)
  tm = min(512, m8)
  mp = _round_up(m8, tm)
  if mp != m:
    x = jnp.pad(x, ((0, mp - m), (0, 0)))

  out = pl.pallas_call(
      _matmul_bias_kernel,
      out_shape=jax.ShapeDtypeStruct((mp, n_out), jnp.float32),
      grid=(mp // tm, n_out // tn, k // tk),
      in_specs=[
          pl.BlockSpec((tm, tk), lambda i, j, kk: (i, kk)),
          pl.BlockSpec((tk, tn), lambda i, j, kk: (kk, j)),
          pl.BlockSpec((1, tn), lambda i, j, kk: (0, j)),
      ],
      out_specs=pl.BlockSpec((tm, tn), lambda i, j, kk: (i, j)),
      scratch_shapes=[pltpu.VMEM((tm, tn), jnp.float32)],
      compiler_params=pltpu.CompilerParams(
          dimension_semantics=("parallel", "parallel", "arbitrary"),
          vmem_limit_bytes=_vmem_limit_bytes()),
  )(x, w, b)
  return out[:m]


# --------------------------------------------------------------------------
# One-time parameter prep / model forward
# --------------------------------------------------------------------------

def prepare_params(params, heads):
  """One-time weight preparation (NOT per forward):
    * hidden / ffn / vocab lane axes zero-padded to multiples of 128,
    * shared per-head (D,D) Q/K/V projections placed into 128-lane-aligned
      per-head slots of one (Hp, heads*Dp) bf16 matrix (single lane-dense
      MXU matmul; exact because padding is zero),
    * fc_out rows expanded to the same slots -> one output-projection matmul,
    * 1/sqrt(hidden) softmax scale folded into Wq,
    * all matmul weights pre-cast to bf16; vocab head pre-padded/cast once.
  """
  f32, bf16 = jnp.float32, jnp.bfloat16
  h = params["word_emb"].shape[1]
  d = h // heads
  hp = _round_up(h, 128)
  dp = _round_up(d, 128)
  hq = heads * dp
  f = params["block"]["ff_w1"].shape[1]
  fp = _round_up(f, 128)
  vocab = params["fc_w"].shape[1]
  vp = _round_up(vocab, 128)
  scale = 1.0 / math.sqrt(float(h))

  def pad2(w, rows, cols):
    return jnp.pad(w.astype(f32),
                   ((0, rows - w.shape[0]), (0, cols - w.shape[1])))

  def vec(v, cols):
    return jnp.pad(v.astype(f32), (0, cols - v.shape[0])).reshape(1, cols)

  def qkv(w, s=1.0):
    full = jnp.zeros((hp, hq), f32)
    for i in range(heads):
      full = full.at[i * d:(i + 1) * d, i * dp:i * dp + d].set(w * s)
    return full.astype(bf16)

  def out_proj(w):
    full = jnp.zeros((hq, hp), f32)
    for i in range(heads):
      full = full.at[i * dp:i * dp + d, :h].set(w[i * d:(i + 1) * d, :])
    return full.astype(bf16)

  blk = params["block"]
  sa, ca = blk["self_attn"], blk["tb_attn"]
  block = {
      "sa_wq": qkv(sa["wq"], scale), "sa_wk": qkv(sa["wk"]), "sa_wv": qkv(sa["wv"]),
      "sa_wo": out_proj(sa["wo"]), "sa_bo": vec(sa["bo"], hp),
      "ln0_g": vec(blk["norm_g"], hp), "ln0_b": vec(blk["norm_b"], hp),
      "ca_wq": qkv(ca["wq"], scale), "ca_wk": qkv(ca["wk"]), "ca_wv": qkv(ca["wv"]),
      "ca_wo": out_proj(ca["wo"]), "ca_bo": vec(ca["bo"], hp),
      "ln1_g": vec(blk["tb_norm1_g"], hp), "ln1_b": vec(blk["tb_norm1_b"], hp),
      "ln2_g": vec(blk["tb_norm2_g"], hp), "ln2_b": vec(blk["tb_norm2_b"], hp),
      "ff_w1": pad2(blk["ff_w1"], hp, fp).astype(bf16), "ff_b1": vec(blk["ff_b1"], fp),
      "ff_w2": pad2(blk["ff_w2"], fp, hp).astype(bf16), "ff_b2": vec(blk["ff_b2"], hp),
  }
  return {
      "word_emb": pad2(params["word_emb"], params["word_emb"].shape[0], hp),
      "pos_emb": pad2(params["pos_emb"], params["pos_emb"].shape[0], hp),
      "block": block,
      # TODO(synk): on v7x the vocab weight could be stored fp8 to halve the
      # dominant HBM stream (needs a real quantization path).
      "fc_w": pad2(params["fc_w"], hp, vp).astype(bf16),
      "fc_b": vec(params["fc_b"], vp),
  }


def decoder_forward(prep, x_ids, enc_out, trg_mask, *, heads, num_layers,
                    hidden, vocab):
  n, l = x_ids.shape
  hp = prep["word_emb"].shape[1]
  scale = 1.0 / math.sqrt(float(hidden))

  # Embedding gathers are plain-JAX glue; dropout is identity (eval mode).
  positions = jnp.arange(l, dtype=jnp.int32)
  out = (jnp.take(prep["word_emb"], x_ids, axis=0)
         + jnp.take(prep["pos_emb"], positions, axis=0)[None])      # (N,L,Hp)

  enc_p = jnp.pad(enc_out.astype(jnp.float32),
                  ((0, 0), (0, 0), (0, hp - enc_out.shape[-1])))

  # masked_fill(mask==0, -1e20) followed by /sqrt(H)  ==  an additive bias of
  # -1e20/sqrt(H) on scores whose 1/sqrt(H) scale is folded into Wq.
  # The mask==0 compare is hoisted out of the head/layer loops.
  mask = jnp.broadcast_to(trg_mask, (n, 1, l, l)).reshape(n, l, l)
  bias = jnp.where(mask == 0, jnp.float32(-1e20 * scale), jnp.float32(0.0))

  out = decoder_stack(out, enc_p, bias, prep["block"], heads=heads,
                      hidden=hidden, num_layers=num_layers)          # bf16

  logits = tiled_linear(out.reshape(n * l, hp), prep["fc_w"], prep["fc_b"])
  return logits[:, :vocab].reshape(n, l, vocab)


# --------------------------------------------------------------------------
# Raw parameter init (structure mirrors the PyTorch module)
# --------------------------------------------------------------------------

def init_params(key, vocab, h, heads, forward_exp, max_len):
  d = h // heads
  keys = iter(jax.random.split(key, 32))

  def w(shape, s=0.02):
    return (s * jax.random.normal(next(keys), shape)).astype(jnp.float32)

  def attn():
    return {"wq": w((d, d)), "wk": w((d, d)), "wv": w((d, d)),
            "wo": w((h, h)), "bo": jnp.zeros((h,), jnp.float32)}

  word_emb = w((vocab, h)).at[0].set(0.0)   # padding_idx=0 -> zero row
  pos_emb = w((max_len, h))
  block = {
      "self_attn": attn(),
      "norm_g": jnp.ones((h,), jnp.float32),
      "norm_b": jnp.zeros((h,), jnp.float32),
      "tb_attn": attn(),
      "tb_norm1_g": jnp.ones((h,), jnp.float32),
      "tb_norm1_b": jnp.zeros((h,), jnp.float32),
      "tb_norm2_g": jnp.ones((h,), jnp.float32),
      "tb_norm2_b": jnp.zeros((h,), jnp.float32),
      "ff_w1": w((h, forward_exp * h)),
      "ff_b1": jnp.zeros((forward_exp * h,), jnp.float32),
      "ff_w2": w((forward_exp * h, h)),
      "ff_b2": jnp.zeros((h,), jnp.float32),
  }
  return {"word_emb": word_emb, "pos_emb": pos_emb, "block": block,
          "fc_w": w((h, vocab)), "fc_b": jnp.zeros((vocab,), jnp.float32)}


# --------------------------------------------------------------------------
# Pure-JAX fp32 reference (faithful transcription of the PyTorch module)
# --------------------------------------------------------------------------

def _ref_attention(p, q_in, k_in, v_in, mask, heads, hidden):
  n, lq, _ = q_in.shape
  lk = k_in.shape[1]
  d = hidden // heads
  q = q_in.reshape(n, lq, heads, d) @ p["wq"]
  k = k_in.reshape(n, lk, heads, d) @ p["wk"]
  v = v_in.reshape(n, lk, heads, d) @ p["wv"]
  s = jnp.einsum("nqhd,nkhd->nhqk", q, k)
  if mask is not None:
    s = jnp.where(mask == 0, jnp.float32(-1e20), s)
  s = jax.nn.softmax(s / math.sqrt(float(hidden)), axis=3)
  o = jnp.einsum("nhqk,nkhd->nqhd", s, v).reshape(n, lq, hidden)
  return o @ p["wo"] + p["bo"]


def _ref_ln(x, g, b, eps=1e-5):
  mu = jnp.mean(x, axis=-1, keepdims=True)
  var = jnp.mean((x - mu) ** 2, axis=-1, keepdims=True)
  return (x - mu) / jnp.sqrt(var + eps) * g + b


def reference_forward(params, x_ids, enc_out, trg_mask, *, heads, num_layers):
  blk = params["block"]
  h = params["word_emb"].shape[1]
  n, l = x_ids.shape
  out = params["word_emb"][x_ids] + params["pos_emb"][jnp.arange(l)][None]
  for _ in range(num_layers):
    a = _ref_attention(blk["self_attn"], out, out, out, trg_mask, heads, h)
    queries = _ref_ln(a + out, blk["norm_g"], blk["norm_b"])
    a2 = _ref_attention(blk["tb_attn"], queries, enc_out, enc_out, None,
                        heads, h)
    x1 = _ref_ln(a2 + queries, blk["tb_norm1_g"], blk["tb_norm1_b"])
    ff = jnp.maximum(x1 @ blk["ff_w1"] + blk["ff_b1"], 0.0)
    ff = ff @ blk["ff_w2"] + blk["ff_b2"]
    out = _ref_ln(ff + x1, blk["tb_norm2_g"], blk["tb_norm2_b"])
  return out @ params["fc_w"] + params["fc_b"]


# --------------------------------------------------------------------------
# main
# --------------------------------------------------------------------------

if __name__ == "__main__":
  vocab, H, heads, forward_exp, max_len = 50, 32, 4, 2, 16
  num_layers = 2
  N, L_dec, L_enc = 2, 8, 8

  key = jax.random.PRNGKey(0)
  kp, kx, ke = jax.random.split(key, 3)
  params = init_params(kp, vocab, H, heads, forward_exp, max_len)
  prep = prepare_params(params, heads)    # one-time pad-to-128 + bf16 cast

  x_ids = jax.random.randint(kx, (N, L_dec), 0, vocab, dtype=jnp.int32)
  enc_out = jax.random.normal(ke, (N, L_enc, H), dtype=jnp.float32)
  trg_mask = jnp.broadcast_to(
      jnp.tril(jnp.ones((L_dec, L_dec), jnp.int32)), (N, 1, L_dec, L_dec))

  fwd = jax.jit(functools.partial(decoder_forward, heads=heads,
                                  num_layers=num_layers, hidden=H,
                                  vocab=vocab))
  logits = fwd(prep, x_ids, enc_out, trg_mask)
  jax.block_until_ready(logits)

  assert logits.shape == (N, L_dec, vocab)
  assert bool(jnp.all(jnp.isfinite(logits)))

  # Loose-tolerance parity vs the fp32 reference (kernel uses bf16 matmuls
  # and an approximate softmax reciprocal, so no bit-match is expected).
  ref = reference_forward(params, x_ids, enc_out, trg_mask,
                          heads=heads, num_layers=num_layers)
  err = float(jnp.max(jnp.abs(logits - ref)))
  tol = 3e-2 + 3e-2 * float(jnp.max(jnp.abs(ref)))
  assert err <= tol, f"mismatch vs fp32 reference: {err} > {tol}"

  print("KERNEL_OK")
</pallas_src>

<mosaic_0001>
module attributes {stable_mosaic.version = 11 : i64} {
  func.func @_matmul_bias_kernel(%arg0: i32, %arg1: i32, %arg2: i32, %arg3: memref<16x128xbf16, #tpu.memory_space<vmem>>, %arg4: memref<128x128xbf16, #tpu.memory_space<vmem>>, %arg5: memref<1x128xf32, #tpu.memory_space<vmem>>, %arg6: memref<16x128xf32, #tpu.memory_space<vmem>>, %arg7: memref<16x128xf32, #tpu.memory_space<vmem>>) attributes {dimension_semantics = [#tpu.dimension_semantics<parallel>, #tpu.dimension_semantics<parallel>, #tpu.dimension_semantics<arbitrary>], iteration_bounds = array<i64: 1, 1, 1>, scalar_prefetch = 0 : i64, scratch_operands = 1 : i64, tpu.core_type = #tpu.core_type<tc>, window_params = [{transform_indices = @transform_0, window_bounds = array<i64: 16, 128>}, {transform_indices = @transform_1, window_bounds = array<i64: 128, 128>}, {transform_indices = @transform_2, window_bounds = array<i64: 1, 128>}, {transform_indices = @transform_3, window_bounds = array<i64: 16, 128>}]} {
    %c0_i32 = arith.constant 0 : i32
    %0 = arith.cmpi eq, %arg2, %c0_i32 : i32
    %1 = arith.extui %0 : i1 to i32
    %c0_i32_0 = arith.constant 0 : i32
    %2 = arith.cmpi ne, %1, %c0_i32_0 : i32
    scf.if %2 {
      %cst_10 = arith.constant 0.000000e+00 : f32
      %12 = vector.broadcast %cst_10 : f32 to vector<16x128xf32>
      %c0_11 = arith.constant 0 : index
      %c0_12 = arith.constant 0 : index
      %13 = vector.load %arg7[%c0_11, %c0_12] : memref<16x128xf32, #tpu.memory_space<vmem>>, vector<16x128xf32>
      tpu.vector_store %arg7[%c0_11, %c0_12], %12 {strides = array<i32>} : memref<16x128xf32, #tpu.memory_space<vmem>>, vector<16x128xf32>,
    } else {
    }
    %c0 = arith.constant 0 : index
    %c0_1 = arith.constant 0 : index
    %3 = vector.load %arg7[%c0, %c0_1] : memref<16x128xf32, #tpu.memory_space<vmem>>, vector<16x128xf32>
    %c0_2 = arith.constant 0 : index
    %c0_3 = arith.constant 0 : index
    %4 = vector.load %arg3[%c0_2, %c0_3] : memref<16x128xbf16, #tpu.memory_space<vmem>>, vector<16x128xbf16>
    %c0_4 = arith.constant 0 : index
    %c0_5 = arith.constant 0 : index
    %5 = vector.load %arg4[%c0_4, %c0_5] : memref<128x128xbf16, #tpu.memory_space<vmem>>, vector<128x128xbf16>
    %cst = arith.constant dense<0.000000e+00> : vector<16x128xf32>
    %6 = tpu.matmul %4, %5, %cst {dimension_numbers = #tpu.dot_dimension_numbers<[1], [0], [0], [1], [0, 0, 1, 1], [], []>} : vector<16x128xbf16>, vector<128x128xbf16>, vector<16x128xf32> -> vector<16x128xf32>
    %7 = arith.addf %3, %6 : vector<16x128xf32>
    %c0_6 = arith.constant 0 : index
    %c0_7 = arith.constant 0 : index
    %8 = vector.load %arg7[%c0_6, %c0_7] : memref<16x128xf32, #tpu.memory_space<vmem>>, vector<16x128xf32>
    tpu.vector_store %arg7[%c0_6, %c0_7], %7 {strides = array<i32>} : memref<16x128xf32, #tpu.memory_space<vmem>>, vector<16x128xf32>,
    %c0_i32_8 = arith.constant 0 : i32
    %9 = arith.cmpi eq, %arg2, %c0_i32_8 : i32
    %10 = arith.extui %9 : i1 to i32
    %c0_i32_9 = arith.constant 0 : i32
    %11 = arith.cmpi ne, %10, %c0_i32_9 : i32
    scf.if %11 {
      %c0_10 = arith.constant 0 : index
      %c0_11 = arith.constant 0 : index
      %12 = vector.load %arg7[%c0_10, %c0_11] : memref<16x128xf32, #tpu.memory_space<vmem>>, vector<16x128xf32>
      %c0_12 = arith.constant 0 : index
      %c0_13 = arith.constant 0 : index
      %13 = vector.load %arg5[%c0_12, %c0_13] : memref<1x128xf32, #tpu.memory_space<vmem>>, vector<1x128xf32>
      %14 = vector.broadcast %13 : vector<1x128xf32> to vector<16x128xf32>
      %15 = arith.addf %12, %14 : vector<16x128xf32>
      %c0_14 = arith.constant 0 : index
      %c0_15 = arith.constant 0 : index
      %16 = vector.load %arg6[%c0_14, %c0_15] : memref<16x128xf32, #tpu.memory_space<vmem>>, vector<16x128xf32>
      tpu.vector_store %arg6[%c0_14, %c0_15], %15 {strides = array<i32>} : memref<16x128xf32, #tpu.memory_space<vmem>>, vector<16x128xf32>,
    } else {
    }
    return
  }
  func.func @transform_0(%arg0: i32, %arg1: i32, %arg2: i32) -> (i32, i32) {
    %c0_i32 = arith.constant 0 : i32
    return %arg0, %arg2 : i32, i32
  }
  func.func @transform_1(%arg0: i32, %arg1: i32, %arg2: i32) -> (i32, i32) {
    %c0_i32 = arith.constant 0 : i32
    return %arg2, %arg1 : i32, i32
  }
  func.func @transform_2(%arg0: i32, %arg1: i32, %arg2: i32) -> (i32, i32) {
    %c0_i32 = arith.constant 0 : i32
    %c0_i32_0 = arith.constant 0 : i32
    return %c0_i32, %arg1 : i32, i32
  }
  func.func @transform_3(%arg0: i32, %arg1: i32, %arg2: i32) -> (i32, i32) {
    %c0_i32 = arith.constant 0 : i32
    return %arg0, %arg1 : i32, i32
  }
}

module attributes {stable_mosaic.version = 11 : i64} {
  func.func @_decoder_stack_kernel(%arg0: i32, %arg1: memref<1x8x128xf32, #tpu.memory_space<vmem>>, %arg2: memref<1x8x128xf32, #tpu.memory_space<vmem>>, %arg3: memref<1x8x8xf32, #tpu.memory_space<vmem>>, %arg4: memref<128x512xbf16, #tpu.memory_space<vmem>>, %arg5: memref<128x512xbf16, #tpu.memory_space<vmem>>, %arg6: memref<128x512xbf16, #tpu.memory_space<vmem>>, %arg7: memref<512x128xbf16, #tpu.memory_space<vmem>>, %arg8: memref<1x128xf32, #tpu.memory_space<vmem>>, %arg9: memref<1x128xf32, #tpu.memory_space<vmem>>, %arg10: memref<1x128xf32, #tpu.memory_space<vmem>>, %arg11: memref<128x512xbf16, #tpu.memory_space<vmem>>, %arg12: memref<128x512xbf16, #tpu.memory_space<vmem>>, %arg13: memref<128x512xbf16, #tpu.memory_space<vmem>>, %arg14: memref<512x128xbf16, #tpu.memory_space<vmem>>, %arg15: memref<1x128xf32, #tpu.memory_space<vmem>>, %arg16: memref<1x128xf32, #tpu.memory_space<vmem>>, %arg17: memref<1x128xf32, #tpu.memory_space<vmem>>, %arg18: memref<1x128xf32, #tpu.memory_space<vmem>>, %arg19: memref<1x128xf32, #tpu.memory_space<vmem>>, %arg20: memref<128x128xbf16, #tpu.memory_space<vmem>>, %arg21: memref<1x128xf32, #tpu.memory_space<vmem>>, %arg22: memref<128x128xbf16, #tpu.memory_space<vmem>>, %arg23: memref<1x128xf32, #tpu.memory_space<vmem>>, %arg24: memref<1x8x128xbf16, #tpu.memory_space<vmem>>) attributes {dimension_semantics = [#tpu.dimension_semantics<parallel>], iteration_bounds = array<i64: 2>, scalar_prefetch = 0 : i64, scratch_operands = 0 : i64, tpu.core_type = #tpu.core_type<tc>, window_params = [{transform_indices = @transform_0, window_bounds = array<i64: 1, 8, 128>}, {transform_indices = @transform_1, window_bounds = array<i64: 1, 8, 128>}, {transform_indices = @transform_2, window_bounds = array<i64: 1, 8, 8>}, {pipeline_mode = #tpu.pipeline_mode<synchronous>, transform_indices = @transform_3, window_bounds = array<i64: 128, 512>}, {pipeline_mode = #tpu.pipeline_mode<synchronous>, transform_indices = @transform_4, window_bounds = array<i64: 128, 512>}, {pipeline_mode = #tpu.pipeline_mode<synchronous>, transform_indices = @transform_5, window_bounds = array<i64: 128, 512>}, {pipeline_mode = #tpu.pipeline_mode<synchronous>, transform_indices = @transform_6, window_bounds = array<i64: 512, 128>}, {pipeline_mode = #tpu.pipeline_mode<synchronous>, transform_indices = @transform_7, window_bounds = array<i64: 1, 128>}, {pipeline_mode = #tpu.pipeline_mode<synchronous>, transform_indices = @transform_8, window_bounds = array<i64: 1, 128>}, {pipeline_mode = #tpu.pipeline_mode<synchronous>, transform_indices = @transform_9, window_bounds = array<i64: 1, 128>}, {pipeline_mode = #tpu.pipeline_mode<synchronous>, transform_indices = @transform_10, window_bounds = array<i64: 128, 512>}, {pipeline_mode = #tpu.pipeline_mode<synchronous>, transform_indices = @transform_11, window_bounds = array<i64: 128, 512>}, {pipeline_mode = #tpu.pipeline_mode<synchronous>, transform_indices = @transform_12, window_bounds = array<i64: 128, 512>}, {pipeline_mode = #tpu.pipeline_mode<synchronous>, transform_indices = @transform_13, window_bounds = array<i64: 512, 128>}, {pipeline_mode = #tpu.pipeline_mode<synchronous>, transform_indices = @transform_14, window_bounds = array<i64: 1, 128>}, {pipeline_mode = #tpu.pipeline_mode<synchronous>, transform_indices = @transform_15, window_bounds = array<i64: 1, 128>}, {pipeline_mode = #tpu.pipeline_mode<synchronous>, transform_indices = @transform_16, window_bounds = array<i64: 1, 128>}, {pipeline_mode = #tpu.pipeline_mode<synchronous>, transform_indices = @transform_17, window_bounds = array<i64: 1, 128>}, {pipeline_mode = #tpu.pipeline_mode<synchronous>, transform_indices = @transform_18, window_bounds = array<i64: 1, 128>}, {pipeline_mode = #tpu.pipeline_mode<synchronous>, transform_indices = @transform_19, window_bounds = array<i64: 128, 128>}, {pipeline_mode = #tpu.pipeline_mode<synchronous>, transform_indices = @transform_20, window_bounds = array<i64: 1, 128>}, {pipeline_mode = #tpu.pipeline_mode<synchronous>, transform_indices = @transform_21, window_bounds = array<i64: 128, 128>}, {pipeline_mode = #tpu.pipeline_mode<synchronous>, transform_indices = @transform_22, window_bounds = array<i64: 1, 128>}, {transform_indices = @transform_23, window_bounds = array<i64: 1, 8, 128>}]} {
    %c0 = arith.constant 0 : index
    %c0_0 = arith.constant 0 : index
    %c0_1 = arith.constant 0 : index
    %0 = vector.load %arg1[%c0, %c0_0, %c0_1] : memref<1x8x128xf32, #tpu.memory_space<vmem>>, vector<1x8x128xf32>
    %1 = vector.shape_cast %0 : vector<1x8x128xf32> to vector<8x128xf32>
    %c0_2 = arith.constant 0 : index
    %c0_3 = arith.constant 0 : index
    %c0_4 = arith.constant 0 : index
    %2 = vector.load %arg3[%c0_2, %c0_3, %c0_4] : memref<1x8x8xf32, #tpu.memory_space<vmem>>, vector<1x8x8xf32>
    %c0_5 = arith.constant 0 : index
    %c0_6 = arith.constant 0 : index
    %c0_7 = arith.constant 0 : index
    %3 = vector.load %arg2[%c0_5, %c0_6, %c0_7] : memref<1x8x128xf32, #tpu.memory_space<vmem>>, vector<1x8x128xf32>
    %4 = vector.shape_cast %3 : vector<1x8x128xf32> to vector<8x128xf32>
    %5 = arith.truncf %4 : vector<8x128xf32> to vector<8x128xbf16>
    %c0_8 = arith.constant 0 : index
    %c0_9 = arith.constant 0 : index
    %6 = vector.load %arg12[%c0_8, %c0_9] : memref<128x512xbf16, #tpu.memory_space<vmem>>, vector<128x512xbf16>
    %cst = arith.constant dense<0.000000e+00> : vector<8x512xf32>
    %7 = tpu.matmul %5, %6, %cst {dimension_numbers = #tpu.dot_dimension_numbers<[1], [0], [0], [1], [0, 0, 1, 1], [], []>} : vector<8x128xbf16>, vector<128x512xbf16>, vector<8x512xf32> -> vector<8x512xf32>
    %8 = vector.shape_cast %7 : vector<8x512xf32> to vector<1x8x512xf32>
    %9 = arith.truncf %8 : vector<1x8x512xf32> to vector<1x8x512xbf16>
    %c0_10 = arith.constant 0 : index
    %c0_11 = arith.constant 0 : index
    %10 = vector.load %arg13[%c0_10, %c0_11] : memref<128x512xbf16, #tpu.memory_space<vmem>>, vector<128x512xbf16>
    %cst_12 = arith.constant dense<0.000000e+00> : vector<8x512xf32>
    %11 = tpu.matmul %5, %10, %cst_12 {dimension_numbers = #tpu.dot_dimension_numbers<[1], [0], [0], [1], [0, 0, 1, 1], [], []>} : vector<8x128xbf16>, vector<128x512xbf16>, vector<8x512xf32> -> vector<8x512xf32>
    %12 = vector.shape_cast %11 : vector<8x512xf32> to vector<1x8x512xf32>
    %13 = arith.truncf %12 : vector<1x8x512xf32> to vector<1x8x512xbf16>
    %c0_i32 = arith.constant 0 : i32
    %c2_i32 = arith.constant 2 : i32
    %14 = arith.addi %c0_i32, %c2_i32 : i32
    %c1_i32 = arith.constant 1 : i32
    %15 = scf.for %arg25 = %c0_i32 to %14 step %c1_i32 iter_args(%arg26 = %1) -> (vector<8x128xf32>)  : i32 {
      %19 = arith.truncf %arg26 : vector<8x128xf32> to vector<8x128xbf16>
      %c0_16 = arith.constant 0 : index
      %c0_17 = arith.constant 0 : index
      %20 = vector.load %arg4[%c0_16, %c0_17] : memref<128x512xbf16, #tpu.memory_space<vmem>>, vector<128x512xbf16>
      %cst_18 = arith.constant dense<0.000000e+00> : vector<8x512xf32>
      %21 = tpu.matmul %19, %20, %cst_18 {dimension_numbers = #tpu.dot_dimension_numbers<[1], [0], [0], [1], [0, 0, 1, 1], [], []>} : vector<8x128xbf16>, vector<128x512xbf16>, vector<8x512xf32> -> vector<8x512xf32>
      %22 = arith.truncf %21 : vector<8x512xf32> to vector<8x512xbf16>
      %c0_19 = arith.constant 0 : index
      %c0_20 = arith.constant 0 : index
      %23 = vector.load %arg5[%c0_19, %c0_20] : memref<128x512xbf16, #tpu.memory_space<vmem>>, vector<128x512xbf16>
      %cst_21 = arith.constant dense<0.000000e+00> : vector<8x512xf32>
      %24 = tpu.matmul %19, %23, %cst_21 {dimension_numbers = #tpu.dot_dimension_numbers<[1], [0], [0], [1], [0, 0, 1, 1], [], []>} : vector<8x128xbf16>, vector<128x512xbf16>, vector<8x512xf32> -> vector<8x512xf32>
      %25 = vector.shape_cast %24 : vector<8x512xf32> to vector<1x8x512xf32>
      %26 = arith.truncf %25 : vector<1x8x512xf32> to vector<1x8x512xbf16>
      %c0_22 = arith.constant 0 : index
      %c0_23 = arith.constant 0 : index
      %27 = vector.load %arg6[%c0_22, %c0_23] : memref<128x512xbf16, #tpu.memory_space<vmem>>, vector<128x512xbf16>
      %cst_24 = arith.constant dense<0.000000e+00> : vector<8x512xf32>
      %28 = tpu.matmul %19, %27, %cst_24 {dimension_numbers = #tpu.dot_dimension_numbers<[1], [0], [0], [1], [0, 0, 1, 1], [], []>} : vector<8x128xbf16>, vector<128x512xbf16>, vector<8x512xf32> -> vector<8x512xf32>
      %29 = vector.shape_cast %28 : vector<8x512xf32> to vector<1x8x512xf32>
      %30 = arith.truncf %29 : vector<1x8x512xf32> to vector<1x8x512xbf16>
      %31 = vector.shape_cast %22 : vector<8x512xbf16> to vector<1x8x512xbf16>
      %32 = vector.extract_strided_slice %31 {offsets = [0, 0, 0], sizes = [1, 8, 128], strides = [1, 1, 1]} : vector<1x8x512xbf16> to vector<1x8x128xbf16>
      %33 = vector.extract_strided_slice %26 {offsets = [0, 0, 0], sizes = [1, 8, 128], strides = [1, 1, 1]} : vector<1x8x512xbf16> to vector<1x8x128xbf16>
      "tpu.trace_start"() <{level = 10 : i32, message = "bqd,bkd->bqk"}> : () -> ()
      %cst_25 = arith.constant dense<0.000000e+00> : vector<1x8x8xf32>
      %34 = tpu.matmul %32, %33, %cst_25 {dimension_numbers = #tpu.dot_dimension_numbers<[2], [2], [1], [1], [0, 0, 0, 1, 1, 1], [0], [0]>} : vector<1x8x128xbf16>, vector<1x8x128xbf16>, vector<1x8x8xf32> -> vector<1x8x8xf32>
      "tpu.trace_stop"() : () -> ()
      %35 = arith.addf %34, %2 : vector<1x8x8xf32>
      %cst_26 = arith.constant dense<0xFF800000> : vector<1x8xf32>
      %36 = vector.multi_reduction <maximumf>, %35, %cst_26 [2] : vector<1x8x8xf32> to vector<1x8xf32>
      %37 = vector.shape_cast %36 : vector<1x8xf32> to vector<1x8x1xf32>
      %38 = vector.broadcast %37 : vector<1x8x1xf32> to vector<1x8x8xf32>
      %39 = arith.subf %35, %38 : vector<1x8x8xf32>
      %40 = math.exp %39 : vector<1x8x8xf32>
      %cst_27 = arith.constant dense<0.000000e+00> : vector<1x8xf32>
      %41 = vector.multi_reduction <add>, %40, %cst_27 [2] : vector<1x8x8xf32> to vector<1x8xf32>
      %42 = vector.shape_cast %41 : vector<1x8xf32> to vector<1x8x1xf32>
      %43 = tpu.reciprocal %42 {approx = true} : vector<1x8x1xf32> -> vector<1x8x1xf32>
      %44 = vector.broadcast %43 : vector<1x8x1xf32> to vector<1x8x8xf32>
      %45 = arith.mulf %40, %44 : vector<1x8x8xf32>
      %46 = arith.truncf %45 : vector<1x8x8xf32> to vector<1x8x8xbf16>
      %47 = vector.extract_strided_slice %30 {offsets = [0, 0, 0], sizes = [1, 8, 128], strides = [1, 1, 1]} : vector<1x8x512xbf16> to vector<1x8x128xbf16>
      "tpu.trace_start"() <{level = 10 : i32, message = "bqk,bkd->bqd"}> : () -> ()
      %cst_28 = arith.constant dense<0.000000e+00> : vector<1x8x128xf32>
      %48 = tpu.matmul %46, %47, %cst_28 {dimension_numbers = #tpu.dot_dimension_numbers<[2], [1], [1], [2], [0, 0, 0, 1, 1, 2], [0], [0]>} : vector<1x8x8xbf16>, vector<1x8x128xbf16>, vector<1x8x128xf32> -> vector<1x8x128xf32>
      "tpu.trace_stop"() : () -> ()
      %49 = vector.extract_strided_slice %31 {offsets = [0, 0, 128], sizes = [1, 8, 128], strides = [1, 1, 1]} : vector<1x8x512xbf16> to vector<1x8x128xbf16>
      %50 = vector.extract_strided_slice %26 {offsets = [0, 0, 128], sizes = [1, 8, 128], strides = [1, 1, 1]} : vector<1x8x512xbf16> to vector<1x8x128xbf16>
      "tpu.trace_start"() <{level = 10 : i32, message = "bqd,bkd->bqk"}> : () -> ()
      %cst_29 = arith.constant dense<0.000000e+00> : vector<1x8x8xf32>
      %51 = tpu.matmul %49, %50, %cst_29 {dimension_numbers = #tpu.dot_dimension_numbers<[2], [2], [1], [1], [0, 0, 0, 1, 1, 1], [0], [0]>} : vector<1x8x128xbf16>, vector<1x8x128xbf16>, vector<1x8x8xf32> -> vector<1x8x8xf32>
      "tpu.trace_stop"() : () -> ()
      %52 = arith.addf %51, %2 : vector<1x8x8xf32>
      %cst_30 = arith.constant dense<0xFF800000> : vector<1x8xf32>
      %53 = vector.multi_reduction <maximumf>, %52, %cst_30 [2] : vector<1x8x8xf32> to vector<1x8xf32>
      %54 = vector.shape_cast %53 : vector<1x8xf32> to vector<1x8x1xf32>
      %55 = vector.broadcast %54 : vector<1x8x1xf32> to vector<1x8x8xf32>
      %56 = arith.subf %52, %55 : vector<1x8x8xf32>
      %57 = math.exp %56 : vector<1x8x8xf32>
      %cst_31 = arith.constant dense<0.000000e+00> : vector<1x8xf32>
      %58 = vector.multi_reduction <add>, %57, %cst_31 [2] : vector<1x8x8xf32> to vector<1x8xf32>
      %59 = vector.shape_cast %58 : vector<1x8xf32> to vector<1x8x1xf32>
      %60 = tpu.reciprocal %59 {approx = true} : vector<1x8x1xf32> -> vector<1x8x1xf32>
      %61 = vector.broadcast %60 : vector<1x8x1xf32> to vector<1x8x8xf32>
      %62 = arith.mulf %57, %61 : vector<1x8x8xf32>
      %63 = arith.truncf %62 : vector<1x8x8xf32> to vector<1x8x8xbf16>
      %64 = vector.extract_strided_slice %30 {offsets = [0, 0, 128], sizes = [1, 8, 128], strides = [1, 1, 1]} : vector<1x8x512xbf16> to vector<1x8x128xbf16>
      "tpu.trace_start"() <{level = 10 : i32, message = "bqk,bkd->bqd"}> : () -> ()
      %cst_32 = arith.constant dense<0.000000e+00> : vector<1x8x128xf32>
      %65 = tpu.matmul %63, %64, %cst_32 {dimension_numbers = #tpu.dot_dimension_numbers<[2], [1], [1], [2], [0, 0, 0, 1, 1, 2], [0], [0]>} : vector<1x8x8xbf16>, vector<1x8x128xbf16>, vector<1x8x128xf32> -> vector<1x8x128xf32>
      "tpu.trace_stop"() : () -> ()
      %66 = vector.extract_strided_slice %31 {offsets = [0, 0, 256], sizes = [1, 8, 128], strides = [1, 1, 1]} : vector<1x8x512xbf16> to vector<1x8x128xbf16>
      %67 = vector.extract_strided_slice %26 {offsets = [0, 0, 256], sizes = [1, 8, 128], strides = [1, 1, 1]} : vector<1x8x512xbf16> to vector<1x8x128xbf16>
      "tpu.trace_start"() <{level = 10 : i32, message = "bqd,bkd->bqk"}> : () -> ()
      %cst_33 = arith.constant dense<0.000000e+00> : vector<1x8x8xf32>
      %68 = tpu.matmul %66, %67, %cst_33 {dimension_numbers = #tpu.dot_dimension_numbers<[2], [2], [1], [1], [0, 0, 0, 1, 1, 1], [0], [0]>} : vector<1x8x128xbf16>, vector<1x8x128xbf16>, vector<1x8x8xf32> -> vector<1x8x8xf32>
      "tpu.trace_stop"() : () -> ()
      %69 = arith.addf %68, %2 : vector<1x8x8xf32>
      %cst_34 = arith.constant dense<0xFF800000> : vector<1x8xf32>
      %70 = vector.multi_reduction <maximumf>, %69, %cst_34 [2] : vector<1x8x8xf32> to vector<1x8xf32>
      %71 = vector.shape_cast %70 : vector<1x8xf32> to vector<1x8x1xf32>
      %72 = vector.broadcast %71 : vector<1x8x1xf32> to vector<1x8x8xf32>
      %73 = arith.subf %69, %72 : vector<1x8x8xf32>
      %74 = math.exp %73 : vector<1x8x8xf32>
      %cst_35 = arith.constant dense<0.000000e+00> : vector<1x8xf32>
      %75 = vector.multi_reduction <add>, %74, %cst_35 [2] : vector<1x8x8xf32> to vector<1x8xf32>
      %76 = vector.shape_cast %75 : vector<1x8xf32> to vector<1x8x1xf32>
      %77 = tpu.reciprocal %76 {approx = true} : vector<1x8x1xf32> -> vector<1x8x1xf32>
      %78 = vector.broadcast %77 : vector<1x8x1xf32> to vector<1x8x8xf32>
      %79 = arith.mulf %74, %78 : vector<1x8x8xf32>
      %80 = arith.truncf %79 : vector<1x8x8xf32> to vector<1x8x8xbf16>
      %81 = vector.extract_strided_slice %30 {offsets = [0, 0, 256], sizes = [1, 8, 128], strides = [1, 1, 1]} : vector<1x8x512xbf16> to vector<1x8x128xbf16>
      "tpu.trace_start"() <{level = 10 : i32, message = "bqk,bkd->bqd"}> : () -> ()
      %cst_36 = arith.constant dense<0.000000e+00> : vector<1x8x128xf32>
      %82 = tpu.matmul %80, %81, %cst_36 {dimension_numbers = #tpu.dot_dimension_numbers<[2], [1], [1], [2], [0, 0, 0, 1, 1, 2], [0], [0]>} : vector<1x8x8xbf16>, vector<1x8x128xbf16>, vector<1x8x128xf32> -> vector<1x8x128xf32>
      "tpu.trace_stop"() : () -> ()
      %83 = vector.extract_strided_slice %31 {offsets = [0, 0, 384], sizes = [1, 8, 128], strides = [1, 1, 1]} : vector<1x8x512xbf16> to vector<1x8x128xbf16>
      %84 = vector.extract_strided_slice %26 {offsets = [0, 0, 384], sizes = [1, 8, 128], strides = [1, 1, 1]} : vector<1x8x512xbf16> to vector<1x8x128xbf16>
      "tpu.trace_start"() <{level = 10 : i32, message = "bqd,bkd->bqk"}> : () -> ()
      %cst_37 = arith.constant dense<0.000000e+00> : vector<1x8x8xf32>
      %85 = tpu.matmul %83, %84, %cst_37 {dimension_numbers = #tpu.dot_dimension_numbers<[2], [2], [1], [1], [0, 0, 0, 1, 1, 1], [0], [0]>} : vector<1x8x128xbf16>, vector<1x8x128xbf16>, vector<1x8x8xf32> -> vector<1x8x8xf32>
      "tpu.trace_stop"() : () -> ()
      %86 = arith.addf %85, %2 : vector<1x8x8xf32>
      %cst_38 = arith.constant dense<0xFF800000> : vector<1x8xf32>
      %87 = vector.multi_reduction <maximumf>, %86, %cst_38 [2] : vector<1x8x8xf32> to vector<1x8xf32>
      %88 = vector.shape_cast %87 : vector<1x8xf32> to vector<1x8x1xf32>
      %89 = vector.broadcast %88 : vector<1x8x1xf32> to vector<1x8x8xf32>
      %90 = arith.subf %86, %89 : vector<1x8x8xf32>
      %91 = math.exp %90 : vector<1x8x8xf32>
      %cst_39 = arith.constant dense<0.000000e+00> : vector<1x8xf32>
      %92 = vector.multi_reduction <add>, %91, %cst_39 [2] : vector<1x8x8xf32> to vector<1x8xf32>
      %93 = vector.shape_cast %92 : vector<1x8xf32> to vector<1x8x1xf32>
      %94 = tpu.reciprocal %93 {approx = true} : vector<1x8x1xf32> -> vector<1x8x1xf32>
      %95 = vector.broadcast %94 : vector<1x8x1xf32> to vector<1x8x8xf32>
      %96 = arith.mulf %91, %95 : vector<1x8x8xf32>
      %97 = arith.truncf %96 : vector<1x8x8xf32> to vector<1x8x8xbf16>
      %98 = vector.extract_strided_slice %30 {offsets = [0, 0, 384], sizes = [1, 8, 128], strides = [1, 1, 1]} : vector<1x8x512xbf16> to vector<1x8x128xbf16>
      "tpu.trace_start"() <{level = 10 : i32, message = "bqk,bkd->bqd"}> : () -> ()
      %cst_40 = arith.constant dense<0.000000e+00> : vector<1x8x128xf32>
      %99 = tpu.matmul %97, %98, %cst_40 {dimension_numbers = #tpu.dot_dimension_numbers<[2], [1], [1], [2], [0, 0, 0, 1, 1, 2], [0], [0]>} : vector<1x8x8xbf16>, vector<1x8x128xbf16>, vector<1x8x128xf32> -> vector<1x8x128xf32>
      "tpu.trace_stop"() : () -> ()
      %100 = tpu.concatenate %48, %65, %82, %99 in 2 : vector<1x8x128xf32>, vector<1x8x128xf32>, vector<1x8x128xf32>, vector<1x8x128xf32> -> vector<1x8x512xf32>
      %101 = vector.shape_cast %100 : vector<1x8x512xf32> to vector<8x512xf32>
      %102 = arith.truncf %101 : vector<8x512xf32> to vector<8x512xbf16>
      %c0_41 = arith.constant 0 : index
      %c0_42 = arith.constant 0 : index
      %103 = vector.load %arg7[%c0_41, %c0_42] : memref<512x128xbf16, #tpu.memory_space<vmem>>, vector<512x128xbf16>
      %cst_43 = arith.constant dense<0.000000e+00> : vector<8x128xf32>
      %104 = tpu.matmul %102, %103, %cst_43 {dimension_numbers = #tpu.dot_dimension_numbers<[1], [0], [0], [1], [0, 0, 1, 1], [], []>} : vector<8x512xbf16>, vector<512x128xbf16>, vector<8x128xf32> -> vector<8x128xf32>
      %c0_44 = arith.constant 0 : index
      %c0_45 = arith.constant 0 : index
      %105 = vector.load %arg8[%c0_44, %c0_45] : memref<1x128xf32, #tpu.memory_space<vmem>>, vector<1x128xf32>
      %106 = vector.broadcast %105 : vector<1x128xf32> to vector<8x128xf32>
      %107 = arith.addf %104, %106 : vector<8x128xf32>
      %108 = arith.addf %107, %arg26 : vector<8x128xf32>
      %c0_46 = arith.constant 0 : index
      %c0_47 = arith.constant 0 : index
      %109 = vector.load %arg9[%c0_46, %c0_47] : memref<1x128xf32, #tpu.memory_space<vmem>>, vector<1x128xf32>
      %c0_48 = arith.constant 0 : index
      %c0_49 = arith.constant 0 : index
      %110 = vector.load %arg10[%c0_48, %c0_49] : memref<1x128xf32, #tpu.memory_space<vmem>>, vector<1x128xf32>
      %cst_50 = arith.constant dense<0.000000e+00> : vector<8xf32>
      %111 = vector.multi_reduction <add>, %108, %cst_50 [1] : vector<8x128xf32> to vector<8xf32>
      %112 = vector.shape_cast %111 : vector<8xf32> to vector<8x1xf32>
      %cst_51 = arith.constant 3.125000e-02 : f32
      %113 = vector.broadcast %cst_51 : f32 to vector<8x1xf32>
      %114 = arith.mulf %112, %113 : vector<8x1xf32>
      %115 = arith.mulf %108, %108 : vector<8x128xf32>
      %cst_52 = arith.constant dense<0.000000e+00> : vector<8xf32>
      %116 = vector.multi_reduction <add>, %115, %cst_52 [1] : vector<8x128xf32> to vector<8xf32>
      %117 = vector.shape_cast %116 : vector<8xf32> to vector<8x1xf32>
      %cst_53 = arith.constant 3.125000e-02 : f32
      %118 = vector.broadcast %cst_53 : f32 to vector<8x1xf32>
      %119 = arith.mulf %117, %118 : vector<8x1xf32>
      %120 = arith.mulf %114, %114 : vector<8x1xf32>
      %121 = arith.subf %119, %120 : vector<8x1xf32>
      %122 = vector.broadcast %114 : vector<8x1xf32> to vector<8x128xf32>
      %123 = arith.subf %108, %122 : vector<8x128xf32>
      %cst_54 = arith.constant 9.99999974E-6 : f32
      %124 = vector.broadcast %cst_54 : f32 to vector<8x1xf32>
      %125 = arith.addf %121, %124 : vector<8x1xf32>
      %126 = math.rsqrt %125 : vector<8x1xf32>
      %127 = vector.broadcast %126 : vector<8x1xf32> to vector<8x128xf32>
      %128 = arith.mulf %123, %127 : vector<8x128xf32>
      %129 = vector.broadcast %109 : vector<1x128xf32> to vector<8x128xf32>
      %130 = arith.mulf %128, %129 : vector<8x128xf32>
      %131 = vector.broadcast %110 : vector<1x128xf32> to vector<8x128xf32>
      %132 = arith.addf %130, %131 : vector<8x128xf32>
      %133 = arith.truncf %132 : vector<8x128xf32> to vector<8x128xbf16>
      %c0_55 = arith.constant 0 : index
      %c0_56 = arith.constant 0 : index
      %134 = vector.load %arg11[%c0_55, %c0_56] : memref<128x512xbf16, #tpu.memory_space<vmem>>, vector<128x512xbf16>
      %cst_57 = arith.constant dense<0.000000e+00> : vector<8x512xf32>
      %135 = tpu.matmul %133, %134, %cst_57 {dimension_numbers = #tpu.dot_dimension_numbers<[1], [0], [0], [1], [0, 0, 1, 1], [], []>} : vector<8x128xbf16>, vector<128x512xbf16>, vector<8x512xf32> -> vector<8x512xf32>
      %136 = arith.truncf %135 : vector<8x512xf32> to vector<8x512xbf16>
      %137 = vector.shape_cast %136 : vector<8x512xbf16> to vector<1x8x512xbf16>
      %138 = vector.extract_strided_slice %137 {offsets = [0, 0, 0], sizes = [1, 8, 128], strides = [1, 1, 1]} : vector<1x8x512xbf16> to vector<1x8x128xbf16>
      %139 = vector.extract_strided_slice %9 {offsets = [0, 0, 0], sizes = [1, 8, 128], strides = [1, 1, 1]} : vector<1x8x512xbf16> to vector<1x8x128xbf16>
      "tpu.trace_start"() <{level = 10 : i32, message = "bqd,bkd->bqk"}> : () -> ()
      %cst_58 = arith.constant dense<0.000000e+00> : vector<1x8x8xf32>
      %140 = tpu.matmul %138, %139, %cst_58 {dimension_numbers = #tpu.dot_dimension_numbers<[2], [2], [1], [1], [0, 0, 0, 1, 1, 1], [0], [0]>} : vector<1x8x128xbf16>, vector<1x8x128xbf16>, vector<1x8x8xf32> -> vector<1x8x8xf32>
      "tpu.trace_stop"() : () -> ()
      %cst_59 = arith.constant dense<0xFF800000> : vector<1x8xf32>
      %141 = vector.multi_reduction <maximumf>, %140, %cst_59 [2] : vector<1x8x8xf32> to vector<1x8xf32>
      %142 = vector.shape_cast %141 : vector<1x8xf32> to vector<1x8x1xf32>
      %143 = vector.broadcast %142 : vector<1x8x1xf32> to vector<1x8x8xf32>
      %144 = arith.subf %140, %143 : vector<1x8x8xf32>
      %145 = math.exp %144 : vector<1x8x8xf32>
      %cst_60 = arith.constant dense<0.000000e+00> : vector<1x8xf32>
      %146 = vector.multi_reduction <add>, %145, %cst_60 [2] : vector<1x8x8xf32> to vector<1x8xf32>
      %147 = vector.shape_cast %146 : vector<1x8xf32> to vector<1x8x1xf32>
      %148 = tpu.reciprocal %147 {approx = true} : vector<1x8x1xf32> -> vector<1x8x1xf32>
      %149 = vector.broadcast %148 : vector<1x8x1xf32> to vector<1x8x8xf32>
      %150 = arith.mulf %145, %149 : vector<1x8x8xf32>
      %151 = arith.truncf %150 : vector<1x8x8xf32> to vector<1x8x8xbf16>
      %152 = vector.extract_strided_slice %13 {offsets = [0, 0, 0], sizes = [1, 8, 128], strides = [1, 1, 1]} : vector<1x8x512xbf16> to vector<1x8x128xbf16>
      "tpu.trace_start"() <{level = 10 : i32, message = "bqk,bkd->bqd"}> : () -> ()
      %cst_61 = arith.constant dense<0.000000e+00> : vector<1x8x128xf32>
      %153 = tpu.matmul %151, %152, %cst_61 {dimension_numbers = #tpu.dot_dimension_numbers<[2], [1], [1], [2], [0, 0, 0, 1, 1, 2], [0], [0]>} : vector<1x8x8xbf16>, vector<1x8x128xbf16>, vector<1x8x128xf32> -> vector<1x8x128xf32>
      "tpu.trace_stop"() : () -> ()
      %154 = vector.extract_strided_slice %137 {offsets = [0, 0, 128], sizes = [1, 8, 128], strides = [1, 1, 1]} : vector<1x8x512xbf16> to vector<1x8x128xbf16>
      %155 = vector.extract_strided_slice %9 {offsets = [0, 0, 128], sizes = [1, 8, 128], strides = [1, 1, 1]} : vector<1x8x512xbf16> to vector<1x8x128xbf16>
      "tpu.trace_start"() <{level = 10 : i32, message = "bqd,bkd->bqk"}> : () -> ()
      %cst_62 = arith.constant dense<0.000000e+00> : vector<1x8x8xf32>
      %156 = tpu.matmul %154, %155, %cst_62 {dimension_numbers = #tpu.dot_dimension_numbers<[2], [2], [1], [1], [0, 0, 0, 1, 1, 1], [0], [0]>} : vector<1x8x128xbf16>, vector<1x8x128xbf16>, vector<1x8x8xf32> -> vector<1x8x8xf32>
      "tpu.trace_stop"() : () -> ()
      %cst_63 = arith.constant dense<0xFF800000> : vector<1x8xf32>
      %157 = vector.multi_reduction <maximumf>, %156, %cst_63 [2] : vector<1x8x8xf32> to vector<1x8xf32>
      %158 = vector.shape_cast %157 : vector<1x8xf32> to vector<1x8x1xf32>
      %159 = vector.broadcast %158 : vector<1x8x1xf32> to vector<1x8x8xf32>
      %160 = arith.subf %156, %159 : vector<1x8x8xf32>
      %161 = math.exp %160 : vector<1x8x8xf32>
      %cst_64 = arith.constant dense<0.000000e+00> : vector<1x8xf32>
      %162 = vector.multi_reduction <add>, %161, %cst_64 [2] : vector<1x8x8xf32> to vector<1x8xf32>
      %163 = vector.shape_cast %162 : vector<1x8xf32> to vector<1x8x1xf32>
      %164 = tpu.reciprocal %163 {approx = true} : vector<1x8x1xf32> -> vector<1x8x1xf32>
      %165 = vector.broadcast %164 : vector<1x8x1xf32> to vector<1x8x8xf32>
      %166 = arith.mulf %161, %165 : vector<1x8x8xf32>
      %167 = arith.truncf %166 : vector<1x8x8xf32> to vector<1x8x8xbf16>
      %168 = vector.extract_strided_slice %13 {offsets = [0, 0, 128], sizes = [1, 8, 128], strides = [1, 1, 1]} : vector<1x8x512xbf16> to vector<1x8x128xbf16>
      "tpu.trace_start"() <{level = 10 : i32, message = "bqk,bkd->bqd"}> : () -> ()
      %cst_65 = arith.constant dense<0.000000e+00> : vector<1x8x128xf32>
      %169 = tpu.matmul %167, %168, %cst_65 {dimension_numbers = #tpu.dot_dimension_numbers<[2], [1], [1], [2], [0, 0, 0, 1, 1, 2], [0], [0]>} : vector<1x8x8xbf16>, vector<1x8x128xbf16>, vector<1x8x128xf32> -> vector<1x8x128xf32>
      "tpu.trace_stop"() : () -> ()
      %170 = vector.extract_strided_slice %137 {offsets = [0, 0, 256], sizes = [1, 8, 128], strides = [1, 1, 1]} : vector<1x8x512xbf16> to vector<1x8x128xbf16>
      %171 = vector.extract_strided_slice %9 {offsets = [0, 0, 256], sizes = [1, 8, 128], strides = [1, 1, 1]} : vector<1x8x512xbf16> to vector<1x8x128xbf16>
      "tpu.trace_start"() <{level = 10 : i32, message = "bqd,bkd->bqk"}> : () -> ()
      %cst_66 = arith.constant dense<0.000000e+00> : vector<1x8x8xf32>
      %172 = tpu.matmul %170, %171, %cst_66 {dimension_numbers = #tpu.dot_dimension_numbers<[2], [2], [1], [1], [0, 0, 0, 1, 1, 1], [0], [0]>} : vector<1x8x128xbf16>, vector<1x8x128xbf16>, vector<1x8x8xf32> -> vector<1x8x8xf32>
      "tpu.trace_stop"() : () -> ()
      %cst_67 = arith.constant dense<0xFF800000> : vector<1x8xf32>
      %173 = vector.multi_reduction <maximumf>, %172, %cst_67 [2] : vector<1x8x8xf32> to vector<1x8xf32>
      %174 = vector.shape_cast %173 : vector<1x8xf32> to vector<1x8x1xf32>
      %175 = vector.broadcast %174 : vector<1x8x1xf32> to vector<1x8x8xf32>
      %176 = arith.subf %172, %175 : vector<1x8x8xf32>
      %177 = math.exp %176 : vector<1x8x8xf32>
      %cst_68 = arith.constant dense<0.000000e+00> : vector<1x8xf32>
      %178 = vector.multi_reduction <add>, %177, %cst_68 [2] : vector<1x8x8xf32> to vector<1x8xf32>
      %179 = vector.shape_cast %178 : vector<1x8xf32> to vector<1x8x1xf32>
      %180 = tpu.reciprocal %179 {approx = true} : vector<1x8x1xf32> -> vector<1x8x1xf32>
      %181 = vector.broadcast %180 : vector<1x8x1xf32> to vector<1x8x8xf32>
      %182 = arith.mulf %177, %181 : vector<1x8x8xf32>
      %183 = arith.truncf %182 : vector<1x8x8xf32> to vector<1x8x8xbf16>
      %184 = vector.extract_strided_slice %13 {offsets = [0, 0, 256], sizes = [1, 8, 128], strides = [1, 1, 1]} : vector<1x8x512xbf16> to vector<1x8x128xbf16>
      "tpu.trace_start"() <{level = 10 : i32, message = "bqk,bkd->bqd"}> : () -> ()
      %cst_69 = arith.constant dense<0.000000e+00> : vector<1x8x128xf32>
      %185 = tpu.matmul %183, %184, %cst_69 {dimension_numbers = #tpu.dot_dimension_numbers<[2], [1], [1], [2], [0, 0, 0, 1, 1, 2], [0], [0]>} : vector<1x8x8xbf16>, vector<1x8x128xbf16>, vector<1x8x128xf32> -> vector<1x8x128xf32>
      "tpu.trace_stop"() : () -> ()
      %186 = vector.extract_strided_slice %137 {offsets = [0, 0, 384], sizes = [1, 8, 128], strides = [1, 1, 1]} : vector<1x8x512xbf16> to vector<1x8x128xbf16>
      %187 = vector.extract_strided_slice %9 {offsets = [0, 0, 384], sizes = [1, 8, 128], strides = [1, 1, 1]} : vector<1x8x512xbf16> to vector<1x8x128xbf16>
      "tpu.trace_start"() <{level = 10 : i32, message = "bqd,bkd->bqk"}> : () -> ()
      %cst_70 = arith.constant dense<0.000000e+00> : vector<1x8x8xf32>
      %188 = tpu.matmul %186, %187, %cst_70 {dimension_numbers = #tpu.dot_dimension_numbers<[2], [2], [1], [1], [0, 0, 0, 1, 1, 1], [0], [0]>} : vector<1x8x128xbf16>, vector<1x8x128xbf16>, vector<1x8x8xf32> -> vector<1x8x8xf32>
      "tpu.trace_stop"() : () -> ()
      %cst_71 = arith.constant dense<0xFF800000> : vector<1x8xf32>
      %189 = vector.multi_reduction <maximumf>, %188, %cst_71 [2] : vector<1x8x8xf32> to vector<1x8xf32>
      %190 = vector.shape_cast %189 : vector<1x8xf32> to vector<1x8x1xf32>
      %191 = vector.broadcast %190 : vector<1x8x1xf32> to vector<1x8x8xf32>
      %192 = arith.subf %188, %191 : vector<1x8x8xf32>
      %193 = math.exp %192 : vector<1x8x8xf32>
      %cst_72 = arith.constant dense<0.000000e+00> : vector<1x8xf32>
      %194 = vector.multi_reduction <add>, %193, %cst_72 [2] : vector<1x8x8xf32> to vector<1x8xf32>
      %195 = vector.shape_cast %194 : vector<1x8xf32> to vector<1x8x1xf32>
      %196 = tpu.reciprocal %195 {approx = true} : vector<1x8x1xf32> -> vector<1x8x1xf32>
      %197 = vector.broadcast %196 : vector<1x8x1xf32> to vector<1x8x8xf32>
      %198 = arith.mulf %193, %197 : vector<1x8x8xf32>
      %199 = arith.truncf %198 : vector<1x8x8xf32> to vector<1x8x8xbf16>
      %200 = vector.extract_strided_slice %13 {offsets = [0, 0, 384], sizes = [1, 8, 128], strides = [1, 1, 1]} : vector<1x8x512xbf16> to vector<1x8x128xbf16>
      "tpu.trace_start"() <{level = 10 : i32, message = "bqk,bkd->bqd"}> : () -> ()
      %cst_73 = arith.constant dense<0.000000e+00> : vector<1x8x128xf32>
      %201 = tpu.matmul %199, %200, %cst_73 {dimension_numbers = #tpu.dot_dimension_numbers<[2], [1], [1], [2], [0, 0, 0, 1, 1, 2], [0], [0]>} : vector<1x8x8xbf16>, vector<1x8x128xbf16>, vector<1x8x128xf32> -> vector<1x8x128xf32>
      "tpu.trace_stop"() : () -> ()
      %202 = tpu.concatenate %153, %169, %185, %201 in 2 : vector<1x8x128xf32>, vector<1x8x128xf32>, vector<1x8x128xf32>, vector<1x8x128xf32> -> vector<1x8x512xf32>
      %203 = vector.shape_cast %202 : vector<1x8x512xf32> to vector<8x512xf32>
      %204 = arith.truncf %203 : vector<8x512xf32> to vector<8x512xbf16>
      %c0_74 = arith.constant 0 : index
      %c0_75 = arith.constant 0 : index
      %205 = vector.load %arg14[%c0_74, %c0_75] : memref<512x128xbf16, #tpu.memory_space<vmem>>, vector<512x128xbf16>
      %cst_76 = arith.constant dense<0.000000e+00> : vector<8x128xf32>
      %206 = tpu.matmul %204, %205, %cst_76 {dimension_numbers = #tpu.dot_dimension_numbers<[1], [0], [0], [1], [0, 0, 1, 1], [], []>} : vector<8x512xbf16>, vector<512x128xbf16>, vector<8x128xf32> -> vector<8x128xf32>
      %c0_77 = arith.constant 0 : index
      %c0_78 = arith.constant 0 : index
      %207 = vector.load %arg15[%c0_77, %c0_78] : memref<1x128xf32, #tpu.memory_space<vmem>>, vector<1x128xf32>
      %208 = vector.broadcast %207 : vector<1x128xf32> to vector<8x128xf32>
      %209 = arith.addf %206, %208 : vector<8x128xf32>
      %210 = arith.addf %209, %132 : vector<8x128xf32>
      %c0_79 = arith.constant 0 : index
      %c0_80 = arith.constant 0 : index
      %211 = vector.load %arg16[%c0_79, %c0_80] : memref<1x128xf32, #tpu.memory_space<vmem>>, vector<1x128xf32>
      %c0_81 = arith.constant 0 : index
      %c0_82 = arith.constant 0 : index
      %212 = vector.load %arg17[%c0_81, %c0_82] : memref<1x128xf32, #tpu.memory_space<vmem>>, vector<1x128xf32>
      %cst_83 = arith.constant dense<0.000000e+00> : vector<8xf32>
      %213 = vector.multi_reduction <add>, %210, %cst_83 [1] : vector<8x128xf32> to vector<8xf32>
      %214 = vector.shape_cast %213 : vector<8xf32> to vector<8x1xf32>
      %cst_84 = arith.constant 3.125000e-02 : f32
      %215 = vector.broadcast %cst_84 : f32 to vector<8x1xf32>
      %216 = arith.mulf %214, %215 : vector<8x1xf32>
      %217 = arith.mulf %210, %210 : vector<8x128xf32>
      %cst_85 = arith.constant dense<0.000000e+00> : vector<8xf32>
      %218 = vector.multi_reduction <add>, %217, %cst_85 [1] : vector<8x128xf32> to vector<8xf32>
      %219 = vector.shape_cast %218 : vector<8xf32> to vector<8x1xf32>
      %cst_86 = arith.constant 3.125000e-02 : f32
      %220 = vector.broadcast %cst_86 : f32 to vector<8x1xf32>
      %221 = arith.mulf %219, %220 : vector<8x1xf32>
      %222 = arith.mulf %216, %216 : vector<8x1xf32>
      %223 = arith.subf %221, %222 : vector<8x1xf32>
      %224 = vector.broadcast %216 : vector<8x1xf32> to vector<8x128xf32>
      %225 = arith.subf %210, %224 : vector<8x128xf32>
      %cst_87 = arith.constant 9.99999974E-6 : f32
      %226 = vector.broadcast %cst_87 : f32 to vector<8x1xf32>
      %227 = arith.addf %223, %226 : vector<8x1xf32>
      %228 = math.rsqrt %227 : vector<8x1xf32>
      %229 = vector.broadcast %228 : vector<8x1xf32> to vector<8x128xf32>
      %230 = arith.mulf %225, %229 : vector<8x128xf32>
      %231 = vector.broadcast %211 : vector<1x128xf32> to vector<8x128xf32>
      %232 = arith.mulf %230, %231 : vector<8x128xf32>
      %233 = vector.broadcast %212 : vector<1x128xf32> to vector<8x128xf32>
      %234 = arith.addf %232, %233 : vector<8x128xf32>
      %235 = arith.truncf %234 : vector<8x128xf32> to vector<8x128xbf16>
      %c0_88 = arith.constant 0 : index
      %c0_89 = arith.constant 0 : index
      %236 = vector.load %arg20[%c0_88, %c0_89] : memref<128x128xbf16, #tpu.memory_space<vmem>>, vector<128x128xbf16>
      %cst_90 = arith.constant dense<0.000000e+00> : vector<8x128xf32>
      %237 = tpu.matmul %235, %236, %cst_90 {dimension_numbers = #tpu.dot_dimension_numbers<[1], [0], [0], [1], [0, 0, 1, 1], [], []>} : vector<8x128xbf16>, vector<128x128xbf16>, vector<8x128xf32> -> vector<8x128xf32>
      %c0_91 = arith.constant 0 : index
      %c0_92 = arith.constant 0 : index
      %238 = vector.load %arg21[%c0_91, %c0_92] : memref<1x128xf32, #tpu.memory_space<vmem>>, vector<1x128xf32>
      %239 = vector.broadcast %238 : vector<1x128xf32> to vector<8x128xf32>
      %240 = arith.addf %237, %239 : vector<8x128xf32>
      %cst_93 = arith.constant 0.000000e+00 : f32
      %241 = vector.broadcast %cst_93 : f32 to vector<8x128xf32>
      %242 = arith.maximumf %240, %241 : vector<8x128xf32>
      %243 = arith.truncf %242 : vector<8x128xf32> to vector<8x128xbf16>
      %c0_94 = arith.constant 0 : index
      %c0_95 = arith.constant 0 : index
      %244 = vector.load %arg22[%c0_94, %c0_95] : memref<128x128xbf16, #tpu.memory_space<vmem>>, vector<128x128xbf16>
      %cst_96 = arith.constant dense<0.000000e+00> : vector<8x128xf32>
      %245 = tpu.matmul %243, %244, %cst_96 {dimension_numbers = #tpu.dot_dimension_numbers<[1], [0], [0], [1], [0, 0, 1, 1], [], []>} : vector<8x128xbf16>, vector<128x128xbf16>, vector<8x128xf32> -> vector<8x128xf32>
      %c0_97 = arith.constant 0 : index
      %c0_98 = arith.constant 0 : index
      %246 = vector.load %arg23[%c0_97, %c0_98] : memref<1x128xf32, #tpu.memory_space<vmem>>, vector<1x128xf32>
      %247 = vector.broadcast %246 : vector<1x128xf32> to vector<8x128xf32>
      %248 = arith.addf %245, %247 : vector<8x128xf32>
      %249 = arith.addf %248, %234 : vector<8x128xf32>
      %c0_99 = arith.constant 0 : index
      %c0_100 = arith.constant 0 : index
      %250 = vector.load %arg18[%c0_99, %c0_100] : memref<1x128xf32, #tpu.memory_space<vmem>>, vector<1x128xf32>
      %c0_101 = arith.constant 0 : index
      %c0_102 = arith.constant 0 : index
      %251 = vector.load %arg19[%c0_101, %c0_102] : memref<1x128xf32, #tpu.memory_space<vmem>>, vector<1x128xf32>
      %cst_103 = arith.constant dense<0.000000e+00> : vector<8xf32>
      %252 = vector.multi_reduction <add>, %249, %cst_103 [1] : vector<8x128xf32> to vector<8xf32>
      %253 = vector.shape_cast %252 : vector<8xf32> to vector<8x1xf32>
      %cst_104 = arith.constant 3.125000e-02 : f32
      %254 = vector.broadcast %cst_104 : f32 to vector<8x1xf32>
      %255 = arith.mulf %253, %254 : vector<8x1xf32>
      %256 = arith.mulf %249, %249 : vector<8x128xf32>
      %cst_105 = arith.constant dense<0.000000e+00> : vector<8xf32>
      %257 = vector.multi_reduction <add>, %256, %cst_105 [1] : vector<8x128xf32> to vector<8xf32>
      %258 = vector.shape_cast %257 : vector<8xf32> to vector<8x1xf32>
      %cst_106 = arith.constant 3.125000e-02 : f32
      %259 = vector.broadcast %cst_106 : f32 to vector<8x1xf32>
      %260 = arith.mulf %258, %259 : vector<8x1xf32>
      %261 = arith.mulf %255, %255 : vector<8x1xf32>
      %262 = arith.subf %260, %261 : vector<8x1xf32>
      %263 = vector.broadcast %255 : vector<8x1xf32> to vector<8x128xf32>
      %264 = arith.subf %249, %263 : vector<8x128xf32>
      %cst_107 = arith.constant 9.99999974E-6 : f32
      %265 = vector.broadcast %cst_107 : f32 to vector<8x1xf32>
      %266 = arith.addf %262, %265 : vector<8x1xf32>
      %267 = math.rsqrt %266 : vector<8x1xf32>
      %268 = vector.broadcast %267 : vector<8x1xf32> to vector<8x128xf32>
      %269 = arith.mulf %264, %268 : vector<8x128xf32>
      %270 = vector.broadcast %250 : vector<1x128xf32> to vector<8x128xf32>
      %271 = arith.mulf %269, %270 : vector<8x128xf32>
      %272 = vector.broadcast %251 : vector<1x128xf32> to vector<8x128xf32>
      %273 = arith.addf %271, %272 : vector<8x128xf32>
      scf.yield %273 : vector<8x128xf32>
    }
    %16 = vector.shape_cast %15 : vector<8x128xf32> to vector<1x8x128xf32>
    %17 = arith.truncf %16 : vector<1x8x128xf32> to vector<1x8x128xbf16>
    %c0_13 = arith.constant 0 : index
    %c0_14 = arith.constant 0 : index
    %c0_15 = arith.constant 0 : index
    %18 = vector.load %arg24[%c0_13, %c0_14, %c0_15] : memref<1x8x128xbf16, #tpu.memory_space<vmem>>, vector<1x8x128xbf16>
    tpu.vector_store %arg24[%c0_13, %c0_14, %c0_15], %17 {strides = array<i32>} : memref<1x8x128xbf16, #tpu.memory_space<vmem>>, vector<1x8x128xbf16>,
    return
  }
  func.func @transform_0(%arg0: i32) -> (i32, i32, i32) {
    %c0_i32 = arith.constant 0 : i32
    %c0_i32_0 = arith.constant 0 : i32
    %c0_i32_1 = arith.constant 0 : i32
    return %arg0, %c0_i32, %c0_i32_0 : i32, i32, i32
  }
  func.func @transform_1(%arg0: i32) -> (i32, i32, i32) {
    %c0_i32 = arith.constant 0 : i32
    %c0_i32_0 = arith.constant 0 : i32
    %c0_i32_1 = arith.constant 0 : i32
    return %arg0, %c0_i32, %c0_i32_0 : i32, i32, i32
  }
  func.func @transform_2(%arg0: i32) -> (i32, i32, i32) {
    %c0_i32 = arith.constant 0 : i32
    %c0_i32_0 = arith.constant 0 : i32
    %c0_i32_1 = arith.constant 0 : i32
    return %arg0, %c0_i32, %c0_i32_0 : i32, i32, i32
  }
  func.func @transform_3(%arg0: i32) -> (i32, i32) {
    %c0_i32 = arith.constant 0 : i32
    %c0_i32_0 = arith.constant 0 : i32
    %c0_i32_1 = arith.constant 0 : i32
    return %c0_i32, %c0_i32_0 : i32, i32
  }
  func.func @transform_4(%arg0: i32) -> (i32, i32) {
    %c0_i32 = arith.constant 0 : i32
    %c0_i32_0 = arith.constant 0 : i32
    %c0_i32_1 = arith.constant 0 : i32
    return %c0_i32, %c0_i32_0 : i32, i32
  }
  func.func @transform_5(%arg0: i32) -> (i32, i32) {
    %c0_i32 = arith.constant 0 : i32
    %c0_i32_0 = arith.constant 0 : i32
    %c0_i32_1 = arith.constant 0 : i32
    return %c0_i32, %c0_i32_0 : i32, i32
  }
  func.func @transform_6(%arg0: i32) -> (i32, i32) {
    %c0_i32 = arith.constant 0 : i32
    %c0_i32_0 = arith.constant 0 : i32
    %c0_i32_1 = arith.constant 0 : i32
    return %c0_i32, %c0_i32_0 : i32, i32
  }
  func.func @transform_7(%arg0: i32) -> (i32, i32) {
    %c0_i32 = arith.constant 0 : i32
    %c0_i32_0 = arith.constant 0 : i32
    %c0_i32_1 = arith.constant 0 : i32
    return %c0_i32, %c0_i32_0 : i32, i32
  }
  func.func @transform_8(%arg0: i32) -> (i32, i32) {
    %c0_i32 = arith.constant 0 : i32
    %c0_i32_0 = arith.constant 0 : i32
    %c0_i32_1 = arith.constant 0 : i32
    return %c0_i32, %c0_i32_0 : i32, i32
  }
  func.func @transform_9(%arg0: i32) -> (i32, i32) {
    %c0_i32 = arith.constant 0 : i32
    %c0_i32_0 = arith.constant 0 : i32
    %c0_i32_1 = arith.constant 0 : i32
    return %c0_i32, %c0_i32_0 : i32, i32
  }
  func.func @transform_10(%arg0: i32) -> (i32, i32) {
    %c0_i32 = arith.constant 0 : i32
    %c0_i32_0 = arith.constant 0 : i32
    %c0_i32_1 = arith.constant 0 : i32
    return %c0_i32, %c0_i32_0 : i32, i32
  }
  func.func @transform_11(%arg0: i32) -> (i32, i32) {
    %c0_i32 = arith.constant 0 : i32
    %c0_i32_0 = arith.constant 0 : i32
    %c0_i32_1 = arith.constant 0 : i32
    return %c0_i32, %c0_i32_0 : i32, i32
  }
  func.func @transform_12(%arg0: i32) -> (i32, i32) {
    %c0_i32 = arith.constant 0 : i32
    %c0_i32_0 = arith.constant 0 : i32
    %c0_i32_1 = arith.constant 0 : i32
    return %c0_i32, %c0_i32_0 : i32, i32
  }
  func.func @transform_13(%arg0: i32) -> (i32, i32) {
    %c0_i32 = arith.constant 0 : i32
    %c0_i32_0 = arith.constant 0 : i32
    %c0_i32_1 = arith.constant 0 : i32
    return %c0_i32, %c0_i32_0 : i32, i32
  }
  func.func @transform_14(%arg0: i32) -> (i32, i32) {
    %c0_i32 = arith.constant 0 : i32
    %c0_i32_0 = arith.constant 0 : i32
    %c0_i32_1 = arith.constant 0 : i32
    return %c0_i32, %c0_i32_0 : i32, i32
  }
  func.func @transform_15(%arg0: i32) -> (i32, i32) {
    %c0_i32 = arith.constant 0 : i32
    %c0_i32_0 = arith.constant 0 : i32
    %c0_i32_1 = arith.constant 0 : i32
    return %c0_i32, %c0_i32_0 : i32, i32
  }
  func.func @transform_16(%arg0: i32) -> (i32, i32) {
    %c0_i32 = arith.constant 0 : i32
    %c0_i32_0 = arith.constant 0 : i32
    %c0_i32_1 = arith.constant 0 : i32
    return %c0_i32, %c0_i32_0 : i32, i32
  }
  func.func @transform_17(%arg0: i32) -> (i32, i32) {
    %c0_i32 = arith.constant 0 : i32
    %c0_i32_0 = arith.constant 0 : i32
    %c0_i32_1 = arith.constant 0 : i32
    return %c0_i32, %c0_i32_0 : i32, i32
  }
  func.func @transform_18(%arg0: i32) -> (i32, i32) {
    %c0_i32 = arith.constant 0 : i32
    %c0_i32_0 = arith.constant 0 : i32
    %c0_i32_1 = arith.constant 0 : i32
    return %c0_i32, %c0_i32_0 : i32, i32
  }
  func.func @transform_19(%arg0: i32) -> (i32, i32) {
    %c0_i32 = arith.constant 0 : i32
    %c0_i32_0 = arith.constant 0 : i32
    %c0_i32_1 = arith.constant 0 : i32
    return %c0_i32, %c0_i32_0 : i32, i32
  }
  func.func @transform_20(%arg0: i32) -> (i32, i32) {
    %c0_i32 = arith.constant 0 : i32
    %c0_i32_0 = arith.constant 0 : i32
    %c0_i32_1 = arith.constant 0 : i32
    return %c0_i32, %c0_i32_0 : i32, i32
  }
  func.func @transform_21(%arg0: i32) -> (i32, i32) {
    %c0_i32 = arith.constant 0 : i32
    %c0_i32_0 = arith.constant 0 : i32
    %c0_i32_1 = arith.constant 0 : i32
    return %c0_i32, %c0_i32_0 : i32, i32
  }
  func.func @transform_22(%arg0: i32) -> (i32, i32) {
    %c0_i32 = arith.constant 0 : i32
    %c0_i32_0 = arith.constant 0 : i32
    %c0_i32_1 = arith.constant 0 : i32
    return %c0_i32, %c0_i32_0 : i32, i32
  }
  func.func @transform_23(%arg0: i32) -> (i32, i32, i32) {
    %c0_i32 = arith.constant 0 : i32
    %c0_i32_0 = arith.constant 0 : i32
    %c0_i32_1 = arith.constant 0 : i32
    return %arg0, %c0_i32, %c0_i32_0 : i32, i32, i32
  }
}

</mosaic_0001>

<bundles_post_ra>
// kernel: decoder_forward.3
= control target key start
LH: loop header
LB: loop body
LE: loop exit
PB: predicated region body
PF: predicated region fallthrough
CT: control target
= control target key end

     0   :  { %v210_v0 = vmov 0.0   ;;  %vm211_vm0 = vmmov 0   ;;  %s268_s1 = inlined_call_operand.vmem [shape: bf16[128,128], index: 1, kind: input, shape index: {}]   ;;  %s269_s0 = inlined_call_operand.vmem [shape: bf16[16,128], index: 0, kind: input, shape index: {}]   ;;  %s270_s2 = inlined_call_operand.vmem [shape: f32[1,128], index: 2, kind: input, shape index: {}]   ;;  %s271_s3 = inlined_call_operand.vmem [shape: f32[16,128], index: 3, kind: output, shape index: {}]  }
   0x1   :  { %179 = vmatprep.subr.bf16.mxu0 %v210_v0  ;;  %v201_v1 = vld [vmem:[%s268_s1 + $0x38] sm:$0xff]   ;;  %195 = vmatprep.mubr.msk.bf16.mxu0 %vm211_vm0, %v210_v0  ;;  %v202_v2 = vld [vmem:[%s268_s1 + $0x30] sm:$0xff]   ;;  %v203_v3 = vld [vmem:[%s268_s1 + $0x28] sm:$0xff]  }
   0x2   :  { %180 = vmatpush3.bf16.msra.mxu0 %v201_v1  ;;  %v204_v4 = vld [vmem:[%s268_s1 + $0x20] sm:$0xff]   ;;  %v205_v5 = vld [vmem:[%s268_s1 + $0x18] sm:$0xff]   ;;  %v206_v6 = vld [vmem:[%s268_s1 + $0x10] sm:$0xff]  }
   0x3   :  { %181 = vmatprep.subr.bf16.mxu0 %v210_v0  ;;  %v207_v7 = vld [vmem:[%s268_s1 + $0x8] sm:$0xff]   ;;  %v208_v8 = vld [vmem:[%s268_s1] sm:$0xff]  }
   0x4   :  { %v209_v9 = vld [vmem:[%s269_s0] sm:$0xff]  }
   0x5   :  { %v169_v10 = vld [vmem:[%s270_s2] ss:$0 sm:$0xff] }
   0x6   :  { %182 = vmatpush3.bf16.msra.mxu0 %v202_v2 }
   0x7   :  { %183 = vmatprep.subr.bf16.mxu0 %v210_v0 }
   0xa   :  { %184 = vmatpush3.bf16.msra.mxu0 %v203_v3 }
   0xb   :  { %185 = vmatprep.subr.bf16.mxu0 %v210_v0 }
   0xe   :  { %186 = vmatpush3.bf16.msra.mxu0 %v204_v4 }
   0xf   :  { %187 = vmatprep.subr.bf16.mxu0 %v210_v0 }
  0x12   :  { %188 = vmatpush3.bf16.msra.mxu0 %v205_v5 }
  0x13   :  { %189 = vmatprep.subr.bf16.mxu0 %v210_v0 }
  0x16   :  { %190 = vmatpush3.bf16.msra.mxu0 %v206_v6 }
  0x17   :  { %191 = vmatprep.subr.bf16.mxu0 %v210_v0 }
  0x1a   :  { %192 = vmatpush3.bf16.msra.mxu0 %v207_v7 }
  0x1b   :  { %193 = vmatprep.subr.bf16.mxu0 %v210_v0 }
  0x1e   :  { %194 = vmatpush3.bf16.msra.mxu0 %v208_v8 }
  0x21   :  { %196 = vmatmul.mubr.bf16.vlgmr.msra.gmra.mxu0 %v209_v9 }
  0xe1   :  { %v129_v11 = vpop.f32.mrf.mxu0 }
  0xe2   :  { %v152_v12 = vadd.f32 %v169_v10, %v129_v11 }
  0xe3   :  { %v197_v13 = vpop.f32.mrf.mxu0 }
  0xe4   :  { %154 = vst [vmem:[%s271_s3] sm:$0xff] %v152_v12 }
  0xe5   :  { %v132_v14 = vpop.f32.mrf.mxu0 }
  0xe6   :  { %v153_v15 = vadd.f32 %v169_v10, %v132_v14 }
  0xe7   :  { %v198_v16 = vpop.f32.mrf.mxu0 }
  0xe8   :  { %155 = vst [vmem:[%s271_s3 + $0x8] sm:$0xff] %v153_v15 }

// kernel: decoder_forward.2
= control target key start
LH: loop header
LB: loop body
LE: loop exit
PB: predicated region body
PF: predicated region fallthrough
CT: control target
= control target key end

     0   :  { %s6612_s0 = inlined_call_operand.vmem [shape: f32[2,8,128], index: 0, kind: input, shape index: {}]   ;;  %s6613_s1 = inlined_call_operand.vmem [shape: f32[2,8,128], index: 1, kind: input, shape index: {}]   ;;  %s6614_s2 = inlined_call_operand.vmem [shape: f32[2,8,8], index: 2, kind: input, shape index: {}]   ;;  %s6615_s3 = inlined_call_operand.vmem [shape: bf16[128,512], index: 3, kind: input, shape index: {}]   ;;  %s6616_s4 = inlined_call_operand.hbm [shape: bf16[128,512], index: 4, kind: input, shape index: {}]   ;;  %s6617_s5 = inlined_call_operand.hbm [shape: bf16[128,512], index: 5, kind: input, shape index: {}]   ;;  %s6618_s6 = inlined_call_operand.hbm [shape: bf16[512,128], index: 6, kind: input, shape index: {}]   ;;  %s6619_s7 = inlined_call_operand.vmem [shape: f32[1,128], index: 7, kind: input, shape index: {}]   ;;  %s6620_s8 = inlined_call_operand.vmem [shape: f32[1,128], index: 8, kind: input, shape index: {}]   ;;  %s6621_s9 = inlined_call_operand.vmem [shape: f32[1,128], index: 9, kind: input, shape index: {}]   ;;  %s6622_s10 = inlined_call_operand.hbm [shape: bf16[128,512], index: 10, kind: input, shape index: {}]   ;;  %s6623_s11 = inlined_call_operand.hbm [shape: bf16[128,512], index: 11, kind: input, shape index: {}]   ;;  %s6624_s12 = inlined_call_operand.hbm [shape: bf16[128,512], index: 12, kind: input, shape index: {}]   ;;  %s6625_s13 = inlined_call_operand.hbm [shape: bf16[512,128], index: 13, kind: input, shape index: {}]   ;;  %s6626_s14 = inlined_call_operand.vmem [shape: f32[1,128], index: 14, kind: input, shape index: {}]   ;;  %s6627_s15 = inlined_call_operand.vmem [shape: f32[1,128], index: 15, kind: input, shape index: {}]   ;;  %s6628_s16 = inlined_call_operand.vmem [shape: f32[1,128], index: 16, kind: input, shape index: {}]   ;;  %s6629_s17 = inlined_call_operand.vmem [shape: f32[1,128], index: 17, kind: input, shape index: {}]   ;;  %s6630_s18 = inlined_call_operand.vmem [shape: f32[1,128], index: 18, kind: input, shape index: {}]   ;;  %s6631_s19 = inlined_call_operand.vmem [shape: bf16[128,128], index: 19, kind: input, shape index: {}]   ;;  %s6632_s20 = inlined_call_operand.hbm [shape: f32[1,128], index: 20, kind: input, shape index: {}]   ;;  %s6633_s21 = inlined_call_operand.hbm [shape: bf16[128,128], index: 21, kind: input, shape index: {}]   ;;  %s6634_s22 = inlined_call_operand.vmem [shape: f32[1,128], index: 22, kind: input, shape index: {}]   ;;  %s6635_s23 = inlined_call_operand.vmem [shape: bf16[2,8,128], index: 23, kind: output, shape index: {}]  }
   0x1   :  { %6641 = sst [smem:[#allocation22_spill]] %s6612_s0 }
   0x2   :  { %6642 = sst [smem:[#allocation23_spill]] %s6613_s1 }
   0x3   :  { %6643 = sst [smem:[#allocation24_spill]] %s6614_s2 }
   0x4   :  { %6644 = sst [smem:[#allocation25_spill]] %s6615_s3 }
   0x5   :  { %6645 = sst [smem:[#allocation26_spill]] %s6616_s4 }
   0x6   :  { %6646 = sst [smem:[#allocation27_spill]] %s6617_s5 }
   0x7   :  { %6647 = sst [smem:[#allocation28_spill]] %s6618_s6 }
   0x8   :  { %6648 = sst [smem:[#allocation29_spill]] %s6619_s7 }
   0x9   :  { %6649 = sst [smem:[#allocation30_spill]] %s6622_s10 }
   0xa   :  { %6650 = sst [smem:[#allocation31_spill]] %s6624_s12 }
   0xb   :  { %28 = vsyncpa [#allocation3], 0 }
   0xc   :  { %29 = vsyncpa [#allocation5], 0 }
   0xd   :  { %30 = vsyncpa [#allocation8], 0 }
   0xe   :  { %31 = vsyncpa [#allocation11], 0 }
   0xf   :  { %32 = vsyncpa [#allocation14], 0  ;;  %s6058_s4 = smov 0  }
  0x10 LB: > { %6651 = sst [smem:[#allocation21_spill]] %s5911_s4  ;;  %s6064_s30 = sadd.s32 4294967295, %s5911_s4   ;;  %s5911_s4 = sphi %s6058_s4, %s38_s4  }
  0x11   : > { %p4523_p0 = scmp.ge.s32.totalorder %s5911_s4, 1  ;;  %p567_p1 = scmp.lt.s32.totalorder %s5911_s4, 3 }
  0x12   : > { %p5178_p2 = scmp.eq.s32.totalorder %s6064_s30, 0  ;;  %s5921_s25 = smov [#allocation4]  }
  0x13   : > { %p6069_p3 = pnand %p4523_p0, %p567_p1  ;;  %s595_s5 = sshll.u32 %s5921_s25, 4  ;;  %s596_s5 = int_to_ptr.vmem [resolvable:$true] %s595_s5 }
  0x14   : > { %s5922_s1 = smov [#allocation7]   ;;  %s5923_s6 = smov [#allocation10]  }
  0x15   : > { %p5150_p4 = pneg %p6069_p3  ;;  %s630_s26 = sshll.u32 %s5922_s1, 4  ;;  %s6075_s26 = int_to_ptr.vmem [resolvable:$true] %s630_s26 }
  0x16   : > { %s656_s27 = sshll.u32 %s5923_s6, 4  ;;  %s5924_s7 = smov [#allocation13]   ;;  %s6083_s27 = int_to_ptr.vmem [resolvable:$true] %s656_s27 }
  0x17   : > { %p6079_p5 = pnand %p5178_p2, %p5150_p4  ;;  %s6085_s28 = sshll.u32 %s5924_s7, 4  ;;  %s702_s28 = int_to_ptr.vmem [resolvable:$true] %s6085_s28 }
  0x18   : > { %s5654_s3 = scalar_lea.vmem %s596_s5, 4096  ;;  %p5662_p10 = scmp.lt.s32.totalorder %s596_s5, %s596_s5 }
  0x19   : > { %p6089_p6 = pneg %p6079_p5  ;;  %p5655_p7 = scmp.ne.s32.totalorder %s596_s5, %s5654_s3 }
  0x1a   : > { %p5663_p11 = scmp.lt.s32.totalorder %s5654_s3, %s5654_s3 }
  0x1b   : > { %p5657_p8 = pnand %p5655_p7, %p6089_p6 }
  0x1c   : > { %p5664_p12 = por %p5663_p11, %p5662_p10 }
  0x1d   : > { %p5658_p9 = pneg %p5657_p8 }
  0x1f   : > { %p5665_p13 = pnand %p5664_p12, %p5658_p9 }
  0x21   : > { %5668 = shalt.err (!%p5665_p13)
}
  0x22   : > { %s6638_s0 = smov 256   ;;  %s6640_s25 = smov 16  }
  0x23   : > { %s6655_s7 = sld [smem:[#allocation27_spill]]  ;;  %s5680_s4 = scalar_lea.vmem %s6075_s26, 4096 }
  0x24   : > { %p5681_p0 = scmp.ne.s32.totalorder %s6075_s26, %s5680_s4  ;;  %p5688_p7 = scmp.lt.s32.totalorder %s6075_s26, %s6075_s26 }
  0x25   : > { %p5689_p8 = scmp.lt.s32.totalorder %s5680_s4, %s5680_s4 }
  0x26   : > { %p5683_p1 = pnand %p5681_p0, %p6089_p6 }
  0x27   : > { %p5690_p9 = por %p5689_p8, %p5688_p7 }
  0x28   : > { %p5684_p4 = pneg %p5683_p1 }
  0x29   : > { %5156 = dma.hbm_to_vmem [thread:$0]  (!%p6079_p5), %s6655_s7, 4096, %s596_s5, [#allocation5], %s6638_s0, %s6638_s0, %s6640_s25  }
  0x2a   : > { %p5691_p10 = pnand %p5690_p9, %p5684_p4 }
  0x2c   : > { %5694 = shalt.err (!%p5691_p10)
}
  0x2d   : > { %s6656_s10 = sld [smem:[#allocation30_spill]]  ;;  %s5706_s5 = scalar_lea.vmem %s6083_s27, 4096 }
  0x2e   : > { %p5707_p11 = scmp.ne.s32.totalorder %s6083_s27, %s5706_s5  ;;  %p5714_p0 = scmp.lt.s32.totalorder %s6083_s27, %s6083_s27 }
  0x2f   : > { %p5715_p1 = scmp.lt.s32.totalorder %s5706_s5, %s5706_s5 }
  0x30   : > { %p5709_p12 = pnand %p5707_p11, %p6089_p6 }
  0x31   : > { %p5716_p4 = por %p5715_p1, %p5714_p0 }
  0x32   : > { %p5710_p13 = pneg %p5709_p12 }
  0x33   : > { %5162 = dma.hbm_to_vmem [thread:$0]  (!%p6079_p5), %s6656_s10, 4096, %s6075_s26, [#allocation8], %s6638_s0, %s6638_s0, %s6640_s25  }
  0x34   : > { %p5717_p7 = pnand %p5716_p4, %p5710_p13 }
  0x36   : > { %5720 = shalt.err (!%p5717_p7)
}
  0x37   : > { %s6657_s12 = sld [smem:[#allocation31_spill]]  ;;  %s5732_s26 = scalar_lea.vmem %s702_s28, 16 }
  0x38   : > { %p5733_p8 = scmp.ne.s32.totalorder %s702_s28, %s5732_s26  ;;  %s5739_s7 = scalar_lea.vmem %s702_s28, 32 }
  0x39   : > { %p5740_p11 = scmp.lt.s32.totalorder %s702_s28, %s702_s28  ;;  %p5741_p12 = scmp.lt.s32.totalorder %s5739_s7, %s5732_s26 }
  0x3a   : > { %p5735_p9 = pnand %p5733_p8, %p6089_p6 }
  0x3b   : > { %p5742_p13 = por %p5741_p12, %p5740_p11 }
  0x3c   : > { %p5736_p10 = pneg %p5735_p9 }
  0x3d   : > { %5168 = dma.hbm_to_vmem [thread:$0]  (!%p6079_p5), %s6657_s12, 4096, %s6083_s27, [#allocation11], %s6638_s0, %s6638_s0, %s6640_s25  }
  0x3e   : > { %p5743_p0 = pnand %p5742_p13, %p5736_p10 }
  0x40   : > { %5746 = shalt.err (!%p5743_p0)
}
  0x41   : > { %5174 = dma.hbm_to_vmem [thread:$0]  (!%p6079_p5), %s6632_s20, 16, %s702_s28, [#allocation14]  }
  0x42   : > { %s5927_s27 = smov [#allocation2]   ;;  %s5928_s4 = smov [#allocation6]  }
  0x43   : > { %s582_s5 = sshll.u32 %s5927_s27, 4  ;;  %s608_s6 = sshll.u32 %s5928_s4, 4  ;;  %s583_s5 = int_to_ptr.vmem [resolvable:$true] %s582_s5  ;;  %s609_s6 = int_to_ptr.vmem [resolvable:$true] %s608_s6 }
  0x44   : > { %s5758_s0 = scalar_lea.vmem %s583_s5, 4096  ;;  %p5766_p8 = scmp.lt.s32.totalorder %s583_s5, %s583_s5 }
  0x45   : > { %p5759_p1 = scmp.ne.s32.totalorder %s583_s5, %s5758_s0  ;;  %p5767_p9 = scmp.lt.s32.totalorder %s5758_s0, %s5758_s0 }
  0x47   : > { %p5761_p4 = pnand %p5759_p1, %p6089_p6  ;;  %p5768_p10 = por %p5767_p9, %p5766_p8 }
  0x49   : > { %p5762_p7 = pneg %p5761_p4 }
  0x4b   : > { %p5769_p11 = pnand %p5768_p10, %p5762_p7 }
  0x4d   : > { %5772 = shalt.err (!%p5769_p11)
}
  0x4e   : > { %s6658_s26 = smov 256   ;;  %s6659_s3 = sld [smem:[#allocation26_spill]] }
  0x4f   : > { %s5784_s1 = scalar_lea.vmem %s609_s6, 4096  ;;  %p5792_p1 = scmp.lt.s32.totalorder %s609_s6, %s609_s6 }
  0x50   : > { %p5785_p12 = scmp.ne.s32.totalorder %s609_s6, %s5784_s1  ;;  %p5793_p4 = scmp.lt.s32.totalorder %s5784_s1, %s5784_s1 }
  0x52   : > { %p5787_p13 = pnand %p5785_p12, %p6089_p6  ;;  %p5794_p7 = por %p5793_p4, %p5792_p1 }
  0x54   : > { %5153 = dma.hbm_to_vmem [thread:$0]  (!%p6079_p5), %s6659_s3, 4096, %s583_s5, [#allocation3], %s6658_s26, %s6658_s26, %s6640_s25  }
  0x55   : > { %p5788_p0 = pneg %p5787_p13 }
  0x57   : > { %p5795_p8 = pnand %p5794_p7, %p5788_p0 }
  0x59   : > { %5798 = shalt.err (!%p5795_p8)
}
  0x5a   : > { %s5929_s0 = smov 64   ;;  %s5930_s27 = smov 4  }
  0x5b   : > { %s6660_s28 = sld [smem:[#allocation28_spill]]  ;;  %s5931_s7 = smov [#allocation9]  }
  0x5c   : > { %s643_s3 = sshll.u32 %s5931_s7, 4  ;;  %s5932_s25 = smov [#allocation12]   ;;  %s644_s3 = int_to_ptr.vmem [resolvable:$true] %s643_s3 }
  0x5d   : > { %s669_s1 = sshll.u32 %s5932_s25, 4  ;;  %s5810_s10 = scalar_lea.vmem %s644_s3, 4096  ;;  %s670_s1 = int_to_ptr.vmem [resolvable:$true] %s669_s1 }
  0x5e   : > { %p5811_p9 = scmp.ne.s32.totalorder %s644_s3, %s5810_s10  ;;  %p5818_p12 = scmp.lt.s32.totalorder %s644_s3, %s644_s3 }
  0x5f   : > { %p5819_p13 = scmp.lt.s32.totalorder %s5810_s10, %s5810_s10 }
  0x60   : > { %p5813_p10 = pnand %p5811_p9, %p6089_p6 }
  0x61   : > { %5159 = dma.hbm_to_vmem [thread:$0]  (!%p6079_p5), %s6660_s28, 4096, %s609_s6, [#allocation5], %s5929_s0, %s5929_s0, %s5930_s27  }
  0x62   : > { %p5814_p11 = pneg %p5813_p10  ;;  %p5820_p0 = por %p5819_p13, %p5818_p12 }
  0x64   : > { %p5821_p1 = pnand %p5820_p0, %p5814_p11 }
  0x66   : > { %5824 = shalt.err (!%p5821_p1)
}
  0x67   : > { %s6661_s12 = smov 16   ;;  %s5836_s25 = scalar_lea.vmem %s670_s1, 4096 }
  0x68   : > { %5165 = dma.hbm_to_vmem [thread:$0]  (!%p6079_p5), %s6623_s11, 4096, %s644_s3, [#allocation8], %s6658_s26, %s6658_s26, %s6661_s12  }
  0x69   : > { %p5837_p4 = scmp.ne.s32.totalorder %s670_s1, %s5836_s25  ;;  %p5844_p9 = scmp.lt.s32.totalorder %s670_s1, %s670_s1 }
  0x6a   : > { %p5845_p10 = scmp.lt.s32.totalorder %s5836_s25, %s5836_s25 }
  0x6b   : > { %p5839_p7 = pnand %p5837_p4, %p6089_p6 }
  0x6c   : > { %p5846_p11 = por %p5845_p10, %p5844_p9 }
  0x6d   : > { %p5840_p8 = pneg %p5839_p7 }
  0x6f   : > { %p5847_p12 = pnand %p5846_p11, %p5840_p8 }
  0x71   : > { %5850 = shalt.err (!%p5847_p12)
}
  0x72   : > { %5171 = dma.hbm_to_vmem [thread:$0]  (!%p6079_p5), %s6625_s13, 4096, %s670_s1, [#allocation11], %s5929_s0, %s5929_s0, %s5930_s27  }
  0x73   : > { %s5933_s12 = smov [#allocation15]  }
  0x74   : > { %s711_s26 = sshll.u32 %s5933_s12, 4  ;;  %s712_s26 = int_to_ptr.vmem [resolvable:$true] %s711_s26 }
  0x75   : > { %s5862_s28 = scalar_lea.vmem %s712_s26, 1024  ;;  %p5870_p4 = scmp.lt.s32.totalorder %s712_s26, %s712_s26 }
  0x76   : > { %p5863_p13 = scmp.ne.s32.totalorder %s712_s26, %s5862_s28  ;;  %p5871_p7 = scmp.lt.s32.totalorder %s5862_s28, %s5862_s28 }
  0x78   : > { %p5865_p0 = pnand %p5863_p13, %p6089_p6  ;;  %p5872_p8 = por %p5871_p7, %p5870_p4 }
  0x7a   : > { %p5866_p1 = pneg %p5865_p0 }
  0x7c   : > { %p5873_p9 = pnand %p5872_p8, %p5866_p1 }
  0x7e   : > { %5876 = shalt.err (!%p5873_p9)
}
  0x7f   : > { %5177 = dma.hbm_to_vmem [thread:$0]  (!%p6079_p5), %s6633_s21, 1024, %s712_s26, [#allocation14], %s5929_s0, %s5929_s0, %s5930_s27  }
  0x80   : > { %751 = sbr.rel (%p6069_p3) target bundleno = 3634 (0xe32), region = 112 }
  0x85   : > { %5890 = dma.done.wait (%p5178_p2), [#allocation3], 4096  }
  0x86   : > { %5892 = vsyncadd (%p5178_p2), [#allocation3], 4294963200 }
  0x87   : > { %5894 = dma.done.wait (%p5178_p2), [#allocation5], 8192  }
  0x88   : > { %5896 = vsyncadd (%p5178_p2), [#allocation5], 4294959104 }
  0x89   : > { %5898 = dma.done.wait (%p5178_p2), [#allocation8], 8192  }
  0x8a   : > { %5900 = vsyncadd (%p5178_p2), [#allocation8], 4294959104 }
  0x8b   : > { %5902 = dma.done.wait (%p5178_p2), [#allocation11], 8192  }
  0x8c   : > { %5904 = vsyncadd (%p5178_p2), [#allocation11], 4294959104 }
  0x8d   : > { %5906 = dma.done.wait (%p5178_p2), [#allocation14], 1040  }
  0x8e   : > { %5908 = vsyncadd (%p5178_p2), [#allocation14], 4294966256  ;;  %p853_p3 = scmp.lt.s32.totalorder %s6064_s30, 1  ;;  %v5934_v0 = vmov 0   ;;  %v5237_v1 = vld [vmem:[#allocation9 + $0xe4] ss:$16 sps:$4 sm:$0xff]  }
  0x8f   : > { %1098 = vmatprep.mubr.bf16.mxu0 %v5934_v0  ;;  %1139 = vmatprep.mubr.bf16.mxu1 %v5934_v0  ;;  %v5239_v2 = vld [vmem:[#allocation9 + $0xec] ss:$16 sps:$4 sm:$0xff]   ;;  %v5241_v3 = vld [vmem:[#allocation9 + $0xe0] ss:$16 sps:$4 sm:$0xff]   ;;  %v5242_v4 = vld [vmem:[#allocation9 + $0xe8] ss:$16 sps:$4 sm:$0xff]  }
  0x90   : > { %s6670_s30 = smov (!%p853_p3, %s6064_s30), 1  ;;  %1066 = vmatprep.subr.bf16.mxu0 %v5237_v1  ;;  %1107 = vmatprep.subr.bf16.mxu1 %v5239_v2  ;;  %v5243_v5 = vld [vmem:[#allocation9 + $0xc4] ss:$16 sps:$4 sm:$0xff]   ;;  %v5245_v6 = vld [vmem:[#allocation9 + $0xcc] ss:$16 sps:$4 sm:$0xff]   ;;  %s6662_s5 = sld [smem:[#allocation22_spill]] }
  0x91   : > { %s4547_s24 = sshll.u32 %s6670_s30, 2  ;;  %1067 = vmatpush1.bf16.msra.mxu0 %v5241_v3  ;;  %1108 = vmatpush1.bf16.msra.mxu1 %v5242_v4  ;;  %v5247_v7 = vld [vmem:[#allocation9 + $0xc0] ss:$16 sps:$4 sm:$0xff]   ;;  %v5248_v8 = vld [vmem:[#allocation9 + $0xc8] ss:$16 sps:$4 sm:$0xff]   ;;  %s4544_s27 = sshll.u32 %s6670_s30, 3 }
  0x92   : > { %s6223_s0 = scalar_lea.vmem %s6635_s23, %s4547_s24  ;;  %1068 = vmatprep.subr.bf16.mxu0 %v5243_v5  ;;  %1109 = vmatprep.subr.bf16.mxu1 %v5245_v6  ;;  %v5249_v9 = vld [vmem:[#allocation9 + $0xa4] ss:$16 sps:$4 sm:$0xff]   ;;  %v5251_v10 = vld [vmem:[#allocation9 + $0xac] ss:$16 sps:$4 sm:$0xff]   ;;  %v5253_v11 = vld [vmem:[#allocation9 + $0xa0] ss:$16 sps:$4 sm:$0xff]  }
  0x93   : > { %v5254_v12 = vld [vmem:[#allocation9 + $0xa8] ss:$16 sps:$4 sm:$0xff]   ;;  %v5255_v13 = vld [vmem:[#allocation9 + $0x84] ss:$16 sps:$4 sm:$0xff]   ;;  %v5257_v14 = vld [vmem:[#allocation9 + $0x8c] ss:$16 sps:$4 sm:$0xff]  }
  0x94   : > { %v5259_v15 = vld [vmem:[#allocation9 + $0x80] ss:$16 sps:$4 sm:$0xff]   ;;  %v5260_v16 = vld [vmem:[#allocation9 + $0x88] ss:$16 sps:$4 sm:$0xff]   ;;  %v5261_v17 = vld [vmem:[#allocation9 + $0x64] ss:$16 sps:$4 sm:$0xff]  }
  0x95   : > { %1069 = vmatpush1.bf16.msra.mxu0 %v5247_v7  ;;  %1110 = vmatpush1.bf16.msra.mxu1 %v5248_v8  ;;  %v5263_v18 = vld [vmem:[#allocation9 + $0x6c] ss:$16 sps:$4 sm:$0xff]   ;;  %v5265_v19 = vld [vmem:[#allocation9 + $0x60] ss:$16 sps:$4 sm:$0xff]   ;;  %v5266_v20 = vld [vmem:[#allocation9 + $0x68] ss:$16 sps:$4 sm:$0xff]  }
  0x96   : > { %1070 = vmatprep.subr.bf16.mxu0 %v5249_v9  ;;  %1111 = vmatprep.subr.bf16.mxu1 %v5251_v10  ;;  %v5267_v21 = vld [vmem:[#allocation9 + $0x44] ss:$16 sps:$4 sm:$0xff]   ;;  %v5269_v22 = vld [vmem:[#allocation9 + $0x4c] ss:$16 sps:$4 sm:$0xff]   ;;  %s856_s25 = scalar_lea.vmem %s6662_s5, %s4544_s27  ;;  %s6663_s12 = sld [smem:[#allocation24_spill]] }
  0x97   : > { %v5271_v23 = vld [vmem:[#allocation9 + $0x40] ss:$16 sps:$4 sm:$0xff]   ;;  %v5272_v24 = vld [vmem:[#allocation9 + $0x48] ss:$16 sps:$4 sm:$0xff]   ;;  %v5273_v25 = vld [vmem:[#allocation9 + $0x24] ss:$16 sps:$4 sm:$0xff]  }
  0x98   : > { %v5275_v26 = vld [vmem:[#allocation9 + $0x2c] ss:$16 sps:$4 sm:$0xff]   ;;  %v6232_v27 = vld [vmem:[%s856_s25] sm:$0xff]   ;;  %v5278_v30 = vld [vmem:[#allocation9 + $0x28] ss:$16 sps:$4 sm:$0xff]   ;;  %s6664_s7 = sld [smem:[#allocation23_spill]] }
  0x99   : > { %1071 = vmatpush1.bf16.msra.mxu0 %v5253_v11  ;;  %1112 = vmatpush1.bf16.msra.mxu1 %v5254_v12  ;;  %v5277_v29 = vld [vmem:[#allocation9 + $0x20] ss:$16 sps:$4 sm:$0xff]   ;;  %v5279_v31 = vld [vmem:[#allocation9 + $0x4] ss:$16 sps:$4 sm:$0xff]   ;;  %v5281_v32 = vld [vmem:[#allocation9 + $0xc] ss:$16 sps:$4 sm:$0xff]  }
  0x9a   : > { %1072 = vmatprep.subr.bf16.mxu0 %v5255_v13  ;;  %1113 = vmatprep.subr.bf16.mxu1 %v5257_v14  ;;  %v5283_v33 = vld [vmem:[#allocation9] ss:$16 sps:$4 sm:$0xff]   ;;  %v5284_v34 = vld [vmem:[#allocation9 + $0x8] ss:$16 sps:$4 sm:$0xff]   ;;  %v5287_v36 = vld [vmem:[#allocation10 + $0xe4] ss:$16 sps:$4 sm:$0xff]  }
  0x9b   : > { %v5290_v37 = vld [vmem:[#allocation10 + $0xec] ss:$16 sps:$4 sm:$0xff]   ;;  %v5285_v39 = vld [vmem:[#allocation10 + $0xe0] ss:$16 sps:$4 sm:$0xff]   ;;  %v5288_v40 = vld [vmem:[#allocation10 + $0xe8] ss:$16 sps:$4 sm:$0xff]  }
  0x9c   : > { %s864_s26 = scalar_lea.vmem %s6663_s12, %s4544_s27  ;;  %v5293_v41 = vld [vmem:[#allocation10 + $0xc4] ss:$16 sps:$4 sm:$0xff]   ;;  %v5296_v42 = vld [vmem:[#allocation10 + $0xcc] ss:$16 sps:$4 sm:$0xff]   ;;  %v5291_v43 = vld [vmem:[#allocation10 + $0xc0] ss:$16 sps:$4 sm:$0xff]  }
  0x9d   : > { %1073 = vmatpush1.bf16.msra.mxu0 %v5259_v15  ;;  %1114 = vmatpush1.bf16.msra.mxu1 %v5260_v16  ;;  %v6234_v28 = vld [vmem:[%s864_s26] sm:$0xff]  ;;  %v5294_v44 = vld [vmem:[#allocation10 + $0xc8] ss:$16 sps:$4 sm:$0xff]   ;;  %v5302_v46 = vld [vmem:[#allocation10 + $0xac] ss:$16 sps:$4 sm:$0xff]   ;;  %s6282_s24 = smov 0  }
  0x9e   : > { %1074 = vmatprep.subr.bf16.mxu0 %v5261_v17  ;;  %1115 = vmatprep.subr.bf16.mxu1 %v5263_v18  ;;  %s860_s3 = scalar_lea.vmem %s6664_s7, %s4544_s27  ;;  %v5299_v45 = vld [vmem:[#allocation10 + $0xa4] ss:$16 sps:$4 sm:$0xff]   ;;  %v5297_v47 = vld [vmem:[#allocation10 + $0xa0] ss:$16 sps:$4 sm:$0xff]   ;;  %v5300_v48 = vld [vmem:[#allocation10 + $0xa8] ss:$16 sps:$4 sm:$0xff]  }
  0x9f   : > { %v872_v35 = vld [vmem:[%s860_s3] sm:$0xff]  ;;  %v5308_v50 = vld [vmem:[#allocation10 + $0x8c] ss:$16 sps:$4 sm:$0xff]   ;;  %v5306_v52 = vld [vmem:[#allocation10 + $0x88] ss:$16 sps:$4 sm:$0xff]  }
  0xa0   : > { %v6239_v38 = vpack.c.bf16 %v872_v35, %v872_v35  ;;  %v5305_v49 = vld [vmem:[#allocation10 + $0x84] ss:$16 sps:$4 sm:$0xff]   ;;  %v5303_v51 = vld [vmem:[#allocation10 + $0x80] ss:$16 sps:$4 sm:$0xff]   ;;  %v5314_v54 = vld [vmem:[#allocation10 + $0x6c] ss:$16 sps:$4 sm:$0xff]  }
  0xa1   : > { %1075 = vmatpush1.bf16.msra.mxu0 %v5265_v19  ;;  %1116 = vmatpush1.bf16.msra.mxu1 %v5266_v20  ;;  %v5311_v53 = vld [vmem:[#allocation10 + $0x64] ss:$16 sps:$4 sm:$0xff]   ;;  %v5309_v55 = vld [vmem:[#allocation10 + $0x60] ss:$16 sps:$4 sm:$0xff]   ;;  %v5312_v56 = vld [vmem:[#allocation10 + $0x68] ss:$16 sps:$4 sm:$0xff]  }
  0xa2   : > { %1076 = vmatprep.subr.bf16.mxu0 %v5267_v21  ;;  %1117 = vmatprep.subr.bf16.mxu1 %v5269_v22  ;;  %v5317_v57 = vld [vmem:[#allocation10 + $0x44] ss:$16 sps:$4 sm:$0xff]   ;;  %v5320_v58 = vld [vmem:[#allocation10 + $0x4c] ss:$16 sps:$4 sm:$0xff]   ;;  %v5315_v59 = vld [vmem:[#allocation10 + $0x40] ss:$16 sps:$4 sm:$0xff]  }
  0xa3   : > { %v5318_v60 = vld [vmem:[#allocation10 + $0x48] ss:$16 sps:$4 sm:$0xff]   ;;  %v5323_v61 = vld [vmem:[#allocation10 + $0x24] ss:$16 sps:$4 sm:$0xff]   ;;  %v5326_v62 = vld [vmem:[#allocation10 + $0x2c] ss:$16 sps:$4 sm:$0xff]  }
  0xa4   : > { %v5321_v63 = vld [vmem:[#allocation10 + $0x20] ss:$16 sps:$4 sm:$0xff]   ;;  %v5329_v1 = vld [vmem:[#allocation10 + $0x4] ss:$16 sps:$4 sm:$0xff]   ;;  %v5332_v2 = vld [vmem:[#allocation10 + $0xc] ss:$16 sps:$4 sm:$0xff]  }
  0xa5   : > { %1077 = vmatpush1.bf16.msra.mxu0 %v5271_v23  ;;  %1118 = vmatpush1.bf16.msra.mxu1 %v5272_v24  ;;  %v5327_v3 = vld [vmem:[#allocation10] ss:$16 sps:$4 sm:$0xff]   ;;  %v5330_v4 = vld [vmem:[#allocation10 + $0x8] ss:$16 sps:$4 sm:$0xff]  }
  0xa6   : > { %1078 = vmatprep.subr.bf16.mxu0 %v5273_v25  ;;  %1119 = vmatprep.subr.bf16.mxu1 %v5275_v26 }
  0xa9   : > { %1079 = vmatpush1.bf16.msra.mxu0 %v5277_v29  ;;  %1120 = vmatpush1.bf16.msra.mxu1 %v5278_v30 }
  0xaa   : > { %1080 = vmatprep.subr.bf16.mxu0 %v5279_v31  ;;  %1121 = vmatprep.subr.bf16.mxu1 %v5281_v32 }
  0xad   : > { %1081 = vmatpush1.bf16.msra.mxu0 %v5283_v33  ;;  %1122 = vmatpush1.bf16.msra.mxu1 %v5284_v34 }
  0xae   : > { %1344 = vmatprep.subr.bf16.mxu0 %v5287_v36  ;;  %1385 = vmatprep.subr.bf16.mxu1 %v5290_v37 }
  0xb0   : > { %1099 = vmatmul.mubr.bf16.vlgmr.msra.gmra.mxu0 %v6239_v38  ;;  %1140 = vmatmul.mubr.bf16.vlgmr.msra.gmra.mxu1 %v6239_v38 }
  0xb1   : > { %1345 = vmatpush1.bf16.msra.mxu0 %v5285_v39  ;;  %1386 = vmatpush1.bf16.msra.mxu1 %v5288_v40 }
  0xb2   : > { %1346 = vmatprep.subr.bf16.mxu0 %v5293_v41  ;;  %1387 = vmatprep.subr.bf16.mxu1 %v5296_v42 }
  0xb3   : > { %1376 = vmatprep.mubr.bf16.mxu0 %v5934_v0  ;;  %1417 = vmatprep.mubr.bf16.mxu1 %v5934_v0  ;;  %v5324_v0 = vld [vmem:[#allocation10 + $0x28] ss:$16 sps:$4 sm:$0xff]  }
  0xb5   : > { %1347 = vmatpush1.bf16.msra.mxu0 %v5291_v43  ;;  %1388 = vmatpush1.bf16.msra.mxu1 %v5294_v44 }
  0xb6   : > { %1348 = vmatprep.subr.bf16.mxu0 %v5299_v45  ;;  %1389 = vmatprep.subr.bf16.mxu1 %v5302_v46 }
  0xb9   : > { %1349 = vmatpush1.bf16.msra.mxu0 %v5297_v47  ;;  %1390 = vmatpush1.bf16.msra.mxu1 %v5300_v48 }
  0xba   : > { %1350 = vmatprep.subr.bf16.mxu0 %v5305_v49  ;;  %1391 = vmatprep.subr.bf16.mxu1 %v5308_v50 }
  0xbd   : > { %1351 = vmatpush1.bf16.msra.mxu0 %v5303_v51  ;;  %1392 = vmatpush1.bf16.msra.mxu1 %v5306_v52 }
  0xbe   : > { %1352 = vmatprep.subr.bf16.mxu0 %v5311_v53  ;;  %1393 = vmatprep.subr.bf16.mxu1 %v5314_v54 }
  0xc1   : > { %1353 = vmatpush1.bf16.msra.mxu0 %v5309_v55  ;;  %1394 = vmatpush1.bf16.msra.mxu1 %v5312_v56 }
  0xc2   : > { %1354 = vmatprep.subr.bf16.mxu0 %v5317_v57  ;;  %1395 = vmatprep.subr.bf16.mxu1 %v5320_v58 }
  0xc5   : > { %1355 = vmatpush1.bf16.msra.mxu0 %v5315_v59  ;;  %1396 = vmatpush1.bf16.msra.mxu1 %v5318_v60 }
  0xc6   : > { %1356 = vmatprep.subr.bf16.mxu0 %v5323_v61  ;;  %1397 = vmatprep.subr.bf16.mxu1 %v5326_v62 }
  0xc9   : > { %1357 = vmatpush1.bf16.msra.mxu0 %v5321_v63  ;;  %1398 = vmatpush1.bf16.msra.mxu1 %v5324_v0 }
  0xca   : > { %1358 = vmatprep.subr.bf16.mxu0 %v5329_v1  ;;  %1399 = vmatprep.subr.bf16.mxu1 %v5332_v2 }
  0xcd   : > { %1359 = vmatpush1.bf16.msra.mxu0 %v5327_v3  ;;  %1400 = vmatpush1.bf16.msra.mxu1 %v5330_v4 }
  0xd0   : > { %1377 = vmatmul.mubr.bf16.vlgmr.msra.gmra.mxu0 %v6239_v38  ;;  %1418 = vmatmul.mubr.bf16.vlgmr.msra.gmra.mxu1 %v6239_v38 }
 0x170   : > { %v6247_v5 = vpop.f32.mrf.mxu0  ;;  %v6249_v6 = vpop.f32.mrf.mxu1 }
 0x171   : > { %v1148_v7 = vpack.c.bf16 %v6247_v5, %v6247_v5  ;;  %v1150_v8 = vpack.c.bf16 %v6249_v6, %v6249_v6 }
 0x172   : > { %v6255_v9 = vpop.f32.mrf.mxu0  ;;  %v6257_v10 = vpop.f32.mrf.mxu1 }
 0x173   : > { %v1149_v11 = vpack.c.bf16 %v6255_v9, %v6255_v9  ;;  %v1151_v12 = vpack.c.bf16 %v6257_v10, %v6257_v10 }
 0x174   : > { %v1104_v13 = vpop.f32.mrf.mxu0  ;;  %v1145_v14 = vpop.f32.mrf.mxu1 }
 0x176   : > { %v1105_v15 = vpop.f32.mrf.mxu0  ;;  %v1146_v16 = vpop.f32.mrf.mxu1 }
 0x190   : > { %v6263_v17 = vpop.f32.mrf.mxu0  ;;  %v6265_v18 = vpop.f32.mrf.mxu1 }
 0x191   : > { %v1426_v19 = vpack.c.bf16 %v6263_v17, %v6263_v17  ;;  %v1428_v20 = vpack.c.bf16 %v6265_v18, %v6265_v18 }
 0x192   : > { %v6271_v21 = vpop.f32.mrf.mxu0  ;;  %v6273_v22 = vpop.f32.mrf.mxu1 }
 0x193   : > { %v1427_v23 = vpack.c.bf16 %v6271_v21, %v6271_v21  ;;  %v1429_v24 = vpack.c.bf16 %v6273_v22, %v6273_v22 }
 0x194   : > { %v1382_v25 = vpop.f32.mrf.mxu0  ;;  %v1423_v26 = vpop.f32.mrf.mxu1 }
 0x196   : > { %v1383_v29 = vpop.f32.mrf.mxu0  ;;  %v1424_v30 = vpop.f32.mrf.mxu1 }
 0x197 LB: >> { %s6665_s27 = sld [smem:[#allocation25_spill]]  ;;  %v5935_v33 = vmov 0   ;;  %v5377_v61 = vld [vmem:[#allocation2 + $0xe4] ss:$16 sps:$4 sm:$0xff]   ;;  %v6387_v0 = vpack.c.bf16 %v5915_v27, %v5915_v27  ;;  %v5375_v1 = vld [vmem:[#allocation2 + $0xe0] ss:$16 sps:$4 sm:$0xff]   ;;  %s5919_s24 = sphi %s6282_s24, %s1435_s24   ;;  %v5915_v27 = vphi %v6232_v27, %v6667_v27  }
 0x198   : >> { %1662 = vmatprep.mubr.bf16.mxu0 %v5935_v33  ;;  %1703 = vmatprep.mubr.bf16.mxu1 %v5935_v33  ;;  %v5383_v2 = vld [vmem:[#allocation2 + $0xc4] ss:$16 sps:$4 sm:$0xff]   ;;  %v5392_v4 = vld [vmem:[#allocation2 + $0xec] ss:$16 sps:$4 sm:$0xff]   ;;  %v5381_v13 = vld [vmem:[#allocation2 + $0xc0] ss:$16 sps:$4 sm:$0xff]  }
 0x199   : >> { %v5389_v14 = vld [vmem:[#allocation2 + $0xa4] ss:$16 sps:$4 sm:$0xff]   ;;  %v5390_v15 = vld [vmem:[#allocation2 + $0xe8] ss:$16 sps:$4 sm:$0xff]   ;;  %v5398_v16 = vld [vmem:[#allocation2 + $0xcc] ss:$16 sps:$4 sm:$0xff]  }
 0x19a   : >> { %v5387_v25 = vld [vmem:[#allocation2 + $0xa0] ss:$16 sps:$4 sm:$0xff]   ;;  %v5395_v26 = vld [vmem:[#allocation2 + $0x84] ss:$16 sps:$4 sm:$0xff]   ;;  %v5396_v29 = vld [vmem:[#allocation2 + $0xc8] ss:$16 sps:$4 sm:$0xff]  }
 0x19b   : >> { %v5404_v30 = vld [vmem:[#allocation2 + $0xac] ss:$16 sps:$4 sm:$0xff]   ;;  %vm5937_vm0 = vmmov 0   ;;  %vm2328_vm1 = vcmask 1043456   ;;  %vm2312_vm2 = vcmask 64512   ;;  %s6666_s30 = sld [smem:[#allocation29_spill]] }
 0x19c   : >> { %s1435_s24 = sadd.s32 1, %s5919_s24  }
 0x19d   : >> { %v5333_v31 = vld [vmem:[%s6665_s27 + $0xe4] ss:$16 sps:$4 sm:$0xff]   ;;  %v5335_v32 = vld [vmem:[%s6665_s27 + $0xe0] ss:$16 sps:$4 sm:$0xff]   ;;  %v5342_v37 = vld [vmem:[%s6665_s27 + $0xec] ss:$16 sps:$4 sm:$0xff]  }
 0x19e   : >> { %1630 = vmatprep.subr.bf16.mxu0 %v5333_v31  ;;  %v5336_v34 = vld [vmem:[%s6665_s27 + $0xc4] ss:$16 sps:$4 sm:$0xff]   ;;  %v5338_v35 = vld [vmem:[%s6665_s27 + $0xc0] ss:$16 sps:$4 sm:$0xff]   ;;  %v5344_v38 = vld [vmem:[%s6665_s27 + $0xe8] ss:$16 sps:$4 sm:$0xff]   ;;  %1671 = vmatprep.subr.bf16.mxu1 %v5342_v37 }
 0x19f   : >> { %1631 = vmatpush1.bf16.msra.mxu0 %v5335_v32  ;;  %v5339_v36 = vld [vmem:[%s6665_s27 + $0xa4] ss:$16 sps:$4 sm:$0xff]   ;;  %v5341_v39 = vld [vmem:[%s6665_s27 + $0xa0] ss:$16 sps:$4 sm:$0xff]   ;;  %1672 = vmatpush1.bf16.msra.mxu1 %v5344_v38  ;;  %v5348_v40 = vld [vmem:[%s6665_s27 + $0xcc] ss:$16 sps:$4 sm:$0xff]  }
 0x1a0   : >> { %1632 = vmatprep.subr.bf16.mxu0 %v5336_v34  ;;  %v5350_v41 = vld [vmem:[%s6665_s27 + $0xc8] ss:$16 sps:$4 sm:$0xff]   ;;  %v5345_v42 = vld [vmem:[%s6665_s27 + $0x84] ss:$16 sps:$4 sm:$0xff]   ;;  %1673 = vmatprep.subr.bf16.mxu1 %v5348_v40  ;;  %v5347_v43 = vld [vmem:[%s6665_s27 + $0x80] ss:$16 sps:$4 sm:$0xff]  }
 0x1a1   : >> { %v5354_v44 = vld [vmem:[%s6665_s27 + $0xac] ss:$16 sps:$4 sm:$0xff]   ;;  %v5351_v45 = vld [vmem:[%s6665_s27 + $0x64] ss:$16 sps:$4 sm:$0xff]   ;;  %v5356_v46 = vld [vmem:[%s6665_s27 + $0xa8] ss:$16 sps:$4 sm:$0xff]  }
 0x1a2   : >> { %v5360_v47 = vld [vmem:[%s6665_s27 + $0x8c] ss:$16 sps:$4 sm:$0xff]   ;;  %v5353_v48 = vld [vmem:[%s6665_s27 + $0x60] ss:$16 sps:$4 sm:$0xff]   ;;  %v5357_v49 = vld [vmem:[%s6665_s27 + $0x44] ss:$16 sps:$4 sm:$0xff]  }
 0x1a3   : >> { %1633 = vmatpush1.bf16.msra.mxu0 %v5338_v35  ;;  %1674 = vmatpush1.bf16.msra.mxu1 %v5350_v41  ;;  %v5362_v50 = vld [vmem:[%s6665_s27 + $0x88] ss:$16 sps:$4 sm:$0xff]   ;;  %v5366_v51 = vld [vmem:[%s6665_s27 + $0x6c] ss:$16 sps:$4 sm:$0xff]   ;;  %v5359_v52 = vld [vmem:[%s6665_s27 + $0x40] ss:$16 sps:$4 sm:$0xff]  }
 0x1a4   : >> { %1634 = vmatprep.subr.bf16.mxu0 %v5339_v36  ;;  %1675 = vmatprep.subr.bf16.mxu1 %v5354_v44  ;;  %v5363_v53 = vld [vmem:[%s6665_s27 + $0x24] ss:$16 sps:$4 sm:$0xff]   ;;  %v5368_v54 = vld [vmem:[%s6665_s27 + $0x68] ss:$16 sps:$4 sm:$0xff]   ;;  %v5372_v55 = vld [vmem:[%s6665_s27 + $0x4c] ss:$16 sps:$4 sm:$0xff]  }
 0x1a5   : >> { %v5365_v56 = vld [vmem:[%s6665_s27 + $0x20] ss:$16 sps:$4 sm:$0xff]   ;;  %v5369_v57 = vld [vmem:[%s6665_s27 + $0x4] ss:$16 sps:$4 sm:$0xff]   ;;  %v5374_v58 = vld [vmem:[%s6665_s27 + $0x48] ss:$16 sps:$4 sm:$0xff]  }
 0x1a6   : >> { %v5378_v59 = vld [vmem:[%s6665_s27 + $0x2c] ss:$16 sps:$4 sm:$0xff]   ;;  %v5371_v60 = vld [vmem:[%s6665_s27] ss:$16 sps:$4 sm:$0xff]   ;;  %v5380_v62 = vld [vmem:[%s6665_s27 + $0x28] ss:$16 sps:$4 sm:$0xff]  }
 0x1a7   : >> { %1635 = vmatpush1.bf16.msra.mxu0 %v5341_v39  ;;  %1676 = vmatpush1.bf16.msra.mxu1 %v5356_v46  ;;  %v5384_v63 = vld [vmem:[%s6665_s27 + $0xc] ss:$16 sps:$4 sm:$0xff]   ;;  %v5386_v3 = vld [vmem:[%s6665_s27 + $0x8] ss:$16 sps:$4 sm:$0xff]   ;;  %v5393_v31 = vld [vmem:[#allocation2 + $0x80] ss:$16 sps:$4 sm:$0xff]  }
 0x1a8   : >> { %1636 = vmatprep.subr.bf16.mxu0 %v5345_v42  ;;  %1677 = vmatprep.subr.bf16.mxu1 %v5360_v47  ;;  %v5401_v32 = vld [vmem:[#allocation2 + $0x64] ss:$16 sps:$4 sm:$0xff]   ;;  %v5402_v34 = vld [vmem:[#allocation2 + $0xa8] ss:$16 sps:$4 sm:$0xff]   ;;  %v5410_v35 = vld [vmem:[#allocation2 + $0x8c] ss:$16 sps:$4 sm:$0xff]  }
 0x1a9   : >> { %v5399_v36 = vld [vmem:[#allocation2 + $0x60] ss:$16 sps:$4 sm:$0xff]   ;;  %v5408_v37 = vld [vmem:[#allocation2 + $0x88] ss:$16 sps:$4 sm:$0xff]   ;;  %v5407_v38 = vld [vmem:[#allocation2 + $0x44] ss:$16 sps:$4 sm:$0xff]  }
 0x1aa   : >> { %v5416_v39 = vld [vmem:[#allocation2 + $0x6c] ss:$16 sps:$4 sm:$0xff]   ;;  %v5405_v40 = vld [vmem:[#allocation2 + $0x40] ss:$16 sps:$4 sm:$0xff]   ;;  %v5414_v41 = vld [vmem:[#allocation2 + $0x68] ss:$16 sps:$4 sm:$0xff]  }
 0x1ab   : >> { %1637 = vmatpush1.bf16.msra.mxu0 %v5347_v43  ;;  %1678 = vmatpush1.bf16.msra.mxu1 %v5362_v50  ;;  %v5413_v42 = vld [vmem:[#allocation2 + $0x24] ss:$16 sps:$4 sm:$0xff]   ;;  %v5422_v43 = vld [vmem:[#allocation2 + $0x4c] ss:$16 sps:$4 sm:$0xff]   ;;  %v5411_v44 = vld [vmem:[#allocation2 + $0x20] ss:$16 sps:$4 sm:$0xff]  }
 0x1ac   : >> { %1638 = vmatprep.subr.bf16.mxu0 %v5351_v45  ;;  %1679 = vmatprep.subr.bf16.mxu1 %v5366_v51  ;;  %v5420_v45 = vld [vmem:[#allocation2 + $0x48] ss:$16 sps:$4 sm:$0xff]   ;;  %v5419_v46 = vld [vmem:[#allocation2 + $0x4] ss:$16 sps:$4 sm:$0xff]   ;;  %v5425_v47 = vld [vmem:[#allocation2 + $0x2c] ss:$16 sps:$4 sm:$0xff]  }
 0x1ad   : >> { %v5428_v50 = vld [vmem:[#allocation2 + $0xc] ss:$16 sps:$4 sm:$0xff]   ;;  %v5431_v51 = vld [vmem:[#allocation4 + $0xe4] ss:$16 sps:$4 sm:$0xff]   ;;  %p1432_p2 = scmp.ge.s32.totalorder %s1435_s24, 2  }
 0x1af   : >> { %1639 = vmatpush1.bf16.msra.mxu0 %v5353_v48  ;;  %1680 = vmatpush1.bf16.msra.mxu1 %v5368_v54  ;;  %v5417_v48 = vld [vmem:[#allocation2] ss:$16 sps:$4 sm:$0xff]   ;;  %v5434_v54 = vld [vmem:[#allocation4 + $0xc4] ss:$16 sps:$4 sm:$0xff]  }
 0x1b0   : >> { %1640 = vmatprep.subr.bf16.mxu0 %v5357_v49  ;;  %1681 = vmatprep.subr.bf16.mxu1 %v5372_v55  ;;  %v5423_v49 = vld [vmem:[#allocation2 + $0x28] ss:$16 sps:$4 sm:$0xff]   ;;  %v5432_v55 = vld [vmem:[#allocation4 + $0xc0] ss:$16 sps:$4 sm:$0xff]  }
 0x1b3   : >> { %1641 = vmatpush1.bf16.msra.mxu0 %v5359_v52  ;;  %1682 = vmatpush1.bf16.msra.mxu1 %v5374_v58  ;;  %v5426_v52 = vld [vmem:[#allocation2 + $0x8] ss:$16 sps:$4 sm:$0xff]   ;;  %v5438_v58 = vld [vmem:[#allocation4 + $0x80] ss:$16 sps:$4 sm:$0xff]  }
 0x1b4   : >> { %1642 = vmatprep.subr.bf16.mxu0 %v5363_v53  ;;  %1683 = vmatprep.subr.bf16.mxu1 %v5378_v59  ;;  %v5429_v53 = vld [vmem:[#allocation4 + $0xe0] ss:$16 sps:$4 sm:$0xff]   ;;  %v5440_v59 = vld [vmem:[#allocation4 + $0x84] ss:$16 sps:$4 sm:$0xff]  }
 0x1b7   : >> { %1643 = vmatpush1.bf16.msra.mxu0 %v5365_v56  ;;  %1684 = vmatpush1.bf16.msra.mxu1 %v5380_v62  ;;  %v5437_v56 = vld [vmem:[#allocation4 + $0xa4] ss:$16 sps:$4 sm:$0xff]  }
 0x1b8   : >> { %1644 = vmatprep.subr.bf16.mxu0 %v5369_v57  ;;  %1685 = vmatprep.subr.bf16.mxu1 %v5384_v63  ;;  %v5435_v57 = vld [vmem:[#allocation4 + $0xa0] ss:$16 sps:$4 sm:$0xff]   ;;  %v5446_v62 = vld [vmem:[#allocation4 + $0x44] ss:$16 sps:$4 sm:$0xff]  }
 0x1b9   : >> { %v5444_v63 = vld [vmem:[#allocation4 + $0x40] ss:$16 sps:$4 sm:$0xff]  }
 0x1bb   : >> { %1645 = vmatpush1.bf16.msra.mxu0 %v5371_v60  ;;  %1686 = vmatpush1.bf16.msra.mxu1 %v5386_v3  ;;  %v5441_v60 = vld [vmem:[#allocation4 + $0x60] ss:$16 sps:$4 sm:$0xff]   ;;  %v5452_v3 = vld [vmem:[#allocation4 + $0x4] ss:$16 sps:$4 sm:$0xff]  }
 0x1bc   : >> { %1908 = vmatprep.subr.bf16.mxu0 %v5377_v61  ;;  %1949 = vmatprep.subr.bf16.mxu1 %v5392_v4  ;;  %v5443_v61 = vld [vmem:[#allocation4 + $0x64] ss:$16 sps:$4 sm:$0xff]   ;;  %v5450_v4 = vld [vmem:[#allocation4] ss:$16 sps:$4 sm:$0xff]  }
 0x1be   : >> { %1663 = vmatmul.mubr.bf16.vlgmr.msra.gmra.mxu0 %v6387_v0  ;;  %1704 = vmatmul.mubr.bf16.vlgmr.msra.gmra.mxu1 %v6387_v0 }
 0x1bf   : >> { %1909 = vmatpush1.bf16.msra.mxu0 %v5375_v1  ;;  %1940 = vmatprep.mubr.bf16.mxu0 %v5935_v33  ;;  %v5449_v1 = vld [vmem:[#allocation4 + $0x24] ss:$16 sps:$4 sm:$0xff]  }
 0x1c0   : >> { %1910 = vmatprep.subr.bf16.mxu0 %v5383_v2  ;;  %1950 = vmatpush1.bf16.msra.mxu1 %v5390_v15  ;;  %v5447_v2 = vld [vmem:[#allocation4 + $0x20] ss:$16 sps:$4 sm:$0xff]   ;;  %v5455_v15 = vld [vmem:[#allocation4 + $0xec] ss:$16 sps:$4 sm:$0xff]  }
 0x1c1   : >> { %1951 = vmatprep.subr.bf16.mxu1 %v5398_v16  ;;  %1981 = vmatprep.mubr.bf16.mxu1 %v5935_v33  ;;  %v5458_v16 = vld [vmem:[#allocation4 + $0xcc] ss:$16 sps:$4 sm:$0xff]  }
 0x1c3   : >> { %1911 = vmatpush1.bf16.msra.mxu0 %v5381_v13  ;;  %v5936_v13 = vmov 0.0  }
 0x1c4   : >> { %1912 = vmatprep.subr.bf16.mxu0 %v5389_v14  ;;  %1952 = vmatpush1.bf16.msra.mxu1 %v5396_v29  ;;  %v5453_v14 = vld [vmem:[#allocation4 + $0xe8] ss:$16 sps:$4 sm:$0xff]  }
 0x1c5   : >> { %1953 = vmatprep.subr.bf16.mxu1 %v5404_v30  ;;  %v5459_v29 = vld [vmem:[#allocation4 + $0xa8] ss:$16 sps:$4 sm:$0xff]   ;;  %v5464_v30 = vld [vmem:[#allocation4 + $0x8c] ss:$16 sps:$4 sm:$0xff]  }
 0x1c7   : >> { %1913 = vmatpush1.bf16.msra.mxu0 %v5387_v25  ;;  %v5456_v25 = vld [vmem:[#allocation4 + $0xc8] ss:$16 sps:$4 sm:$0xff]  }
 0x1c8   : >> { %1914 = vmatprep.subr.bf16.mxu0 %v5395_v26  ;;  %1954 = vmatpush1.bf16.msra.mxu1 %v5402_v34  ;;  %v5461_v26 = vld [vmem:[#allocation4 + $0xac] ss:$16 sps:$4 sm:$0xff]   ;;  %v5465_v34 = vld [vmem:[#allocation4 + $0x68] ss:$16 sps:$4 sm:$0xff]  }
 0x1c9   : >> { %1955 = vmatprep.subr.bf16.mxu1 %v5410_v35  ;;  %v5470_v35 = vld [vmem:[#allocation4 + $0x4c] ss:$16 sps:$4 sm:$0xff]  }
 0x1cb   : >> { %1915 = vmatpush1.bf16.msra.mxu0 %v5393_v31  ;;  %v5462_v31 = vld [vmem:[#allocation4 + $0x88] ss:$16 sps:$4 sm:$0xff]  }
 0x1cc   : >> { %1916 = vmatprep.subr.bf16.mxu0 %v5401_v32  ;;  %1956 = vmatpush1.bf16.msra.mxu1 %v5408_v37  ;;  %v5467_v32 = vld [vmem:[#allocation4 + $0x6c] ss:$16 sps:$4 sm:$0xff]   ;;  %v5471_v37 = vld [vmem:[#allocation4 + $0x28] ss:$16 sps:$4 sm:$0xff]  }
 0x1cd   : >> { %1957 = vmatprep.subr.bf16.mxu1 %v5416_v39  ;;  %v5476_v39 = vld [vmem:[#allocation4 + $0xc] ss:$16 sps:$4 sm:$0xff]  }
 0x1cf   : >> { %1917 = vmatpush1.bf16.msra.mxu0 %v5399_v36  ;;  %v5468_v36 = vld [vmem:[#allocation4 + $0x48] ss:$16 sps:$4 sm:$0xff]  }
 0x1d0   : >> { %1918 = vmatprep.subr.bf16.mxu0 %v5407_v38  ;;  %1958 = vmatpush1.bf16.msra.mxu1 %v5414_v41  ;;  %v5473_v38 = vld [vmem:[#allocation4 + $0x2c] ss:$16 sps:$4 sm:$0xff]  }
 0x1d1   : >> { %1959 = vmatprep.subr.bf16.mxu1 %v5422_v43 }
 0x1d3   : >> { %1919 = vmatpush1.bf16.msra.mxu0 %v5405_v40  ;;  %v5474_v40 = vld [vmem:[#allocation4 + $0x8] ss:$16 sps:$4 sm:$0xff]  }
 0x1d4   : >> { %1920 = vmatprep.subr.bf16.mxu0 %v5413_v42  ;;  %1960 = vmatpush1.bf16.msra.mxu1 %v5420_v45 }
 0x1d5   : >> { %1961 = vmatprep.subr.bf16.mxu1 %v5425_v47 }
 0x1d7   : >> { %1921 = vmatpush1.bf16.msra.mxu0 %v5411_v44 }
 0x1d8   : >> { %1922 = vmatprep.subr.bf16.mxu0 %v5419_v46  ;;  %1962 = vmatpush1.bf16.msra.mxu1 %v5423_v49 }
 0x1d9   : >> { %1963 = vmatprep.subr.bf16.mxu1 %v5428_v50 }
 0x1db   : >> { %1923 = vmatpush1.bf16.msra.mxu0 %v5417_v48 }
 0x1dc   : >> { %2186 = vmatprep.subr.bf16.mxu0 %v5431_v51  ;;  %1964 = vmatpush1.bf16.msra.mxu1 %v5426_v52 }
 0x1dd   : >> { %2227 = vmatprep.subr.bf16.mxu1 %v5455_v15 }
 0x1de   : >> { %1941 = vmatmul.mubr.bf16.vlgmr.msra.gmra.mxu0 %v6387_v0 }
 0x1df   : >> { %2187 = vmatpush1.bf16.msra.mxu0 %v5429_v53  ;;  %2218 = vmatprep.mubr.bf16.mxu0 %v5935_v33 }
 0x1e0   : >> { %1982 = vmatmul.mubr.bf16.vlgmr.msra.gmra.mxu1 %v6387_v0  ;;  %2188 = vmatprep.subr.bf16.mxu0 %v5434_v54 }
 0x1e1   : >> { %2259 = vmatprep.mubr.bf16.mxu1 %v5935_v33  ;;  %2228 = vmatpush1.bf16.msra.mxu1 %v5453_v14 }
 0x1e2   : >> { %2229 = vmatprep.subr.bf16.mxu1 %v5458_v16 }
 0x1e3   : >> { %2189 = vmatpush1.bf16.msra.mxu0 %v5432_v55 }
 0x1e4   : >> { %2190 = vmatprep.subr.bf16.mxu0 %v5437_v56 }
 0x1e5   : >> { %2230 = vmatpush1.bf16.msra.mxu1 %v5456_v25 }
 0x1e6   : >> { %2231 = vmatprep.subr.bf16.mxu1 %v5461_v26 }
 0x1e7   : >> { %2191 = vmatpush1.bf16.msra.mxu0 %v5435_v57 }
 0x1e8   : >> { %2192 = vmatprep.subr.bf16.mxu0 %v5440_v59 }
 0x1e9   : >> { %2232 = vmatpush1.bf16.msra.mxu1 %v5459_v29 }
 0x1ea   : >> { %2233 = vmatprep.subr.bf16.mxu1 %v5464_v30 }
 0x1eb   : >> { %2193 = vmatpush1.bf16.msra.mxu0 %v5438_v58 }
 0x1ec   : >> { %2194 = vmatprep.subr.bf16.mxu0 %v5443_v61 }
 0x1ed   : >> { %2234 = vmatpush1.bf16.msra.mxu1 %v5462_v31 }
 0x1ee   : >> { %2235 = vmatprep.subr.bf16.mxu1 %v5467_v32 }
 0x1ef   : >> { %2195 = vmatpush1.bf16.msra.mxu0 %v5441_v60 }
 0x1f0   : >> { %2196 = vmatprep.subr.bf16.mxu0 %v5446_v62 }
 0x1f1   : >> { %2236 = vmatpush1.bf16.msra.mxu1 %v5465_v34 }
 0x1f2   : >> { %2237 = vmatprep.subr.bf16.mxu1 %v5470_v35 }
 0x1f3   : >> { %2197 = vmatpush1.bf16.msra.mxu0 %v5444_v63 }
 0x1f4   : >> { %2198 = vmatprep.subr.bf16.mxu0 %v5449_v1 }
 0x1f5   : >> { %2238 = vmatpush1.bf16.msra.mxu1 %v5468_v36 }
 0x1f6   : >> { %2239 = vmatprep.subr.bf16.mxu1 %v5473_v38 }
 0x1f7   : >> { %2199 = vmatpush1.bf16.msra.mxu0 %v5447_v2 }
 0x1f8   : >> { %2200 = vmatprep.subr.bf16.mxu0 %v5452_v3 }
 0x1f9   : >> { %2240 = vmatpush1.bf16.msra.mxu1 %v5471_v37 }
 0x1fa   : >> { %2241 = vmatprep.subr.bf16.mxu1 %v5476_v39 }
 0x1fb   : >> { %2201 = vmatpush1.bf16.msra.mxu0 %v5450_v4 }
 0x1fc   : >> { %4978 = vmatprep.subr.bf16.mxu0 %v5936_v13 }
 0x1fd   : >> { %2242 = vmatpush1.bf16.msra.mxu1 %v5474_v40 }
 0x1fe   : >> { %2219 = vmatmul.mubr.bf16.vlgmr.msra.gmra.mxu0 %v6387_v0  ;;  %4984 = vmatprep.subr.bf16.mxu1 %v5936_v13 }
 0x1ff   : >> { %4980 = vmatprep.mubr.msk.bf16.mxu0 %vm5937_vm0, %v5936_v13 }
 0x200   : >> { %2260 = vmatmul.mubr.bf16.vlgmr.msra.gmra.mxu1 %v6387_v0 }
 0x201   : >> { %4986 = vmatprep.mubr.msk.bf16.mxu1 %vm5937_vm0, %v5936_v13 }
 0x27e   : >> { %v1664_v41 = vpop.f32.mrf.mxu0  ;;  %v1705_v44 = vpop.f32.mrf.mxu1 }
 0x27f   : >> { %v1712_v55 = vpack.c.bf16 %v1664_v41, %v1664_v41  ;;  %v1714_v61 = vpack.c.bf16 %v1705_v44, %v1705_v44 }
 0x280   : >> { %v1666_v42 = vpop.f32.mrf.mxu0  ;;  %v1707_v46 = vpop.f32.mrf.mxu1 }
 0x281   : >> { %v1713_v60 = vpack.c.bf16 %v1666_v42, %v1666_v42  ;;  %v1715_v63 = vpack.c.bf16 %v1707_v46, %v1707_v46 }
 0x282   : >> { %v1668_v43 = vpop.f32.mrf.mxu0  ;;  %v1709_v47 = vpop.f32.mrf.mxu1 }
 0x284   : >> { %v1669_v45 = vpop.f32.mrf.mxu0  ;;  %v1710_v48 = vpop.f32.mrf.mxu1 }
 0x29e   : >> { %v1942_v49 = vpop.f32.mrf.mxu0 }
 0x29f   : >> { %v1990_v50 = vpack.c.bf16 %v1942_v49, %v1942_v49 }
 0x2a0   : >> { %v1944_v51 = vpop.f32.mrf.mxu0  ;;  %v1983_v53 = vpop.f32.mrf.mxu1 }
 0x2a1   : >> { %4979 = vmatpush3.bf16.xpose.msra.mxu0 %v1990_v50  ;;  %v1991_v57 = vpack.c.bf16 %v1944_v51, %v1944_v51  ;;  %v1992_v59 = vpack.c.bf16 %v1983_v53, %v1983_v53 }
 0x2a2   : >> { %v1946_v52 = vpop.f32.mrf.mxu0  ;;  %4990 = vmatprep.subr.bf16.mxu0 %v5936_v13  ;;  %v1985_v54 = vpop.f32.mrf.mxu1 }
 0x2a3   : >> { %v1993_v62 = vpack.c.bf16 %v1985_v54, %v1985_v54 }
 0x2a4   : >> { %v1947_v0 = vpop.f32.mrf.mxu0  ;;  %v1987_v56 = vpop.f32.mrf.mxu1 }
 0x2a6   : >> { %v1988_v58 = vpop.f32.mrf.mxu1 }
 0x2a8   : >> { %4981 = vmatmul.mubr.bf16.vlgmr.msra.gmra.mxu0 %v1712_v55 }
 0x2a9   : >> { %4991 = vmatpush3.bf16.xpose.msra.mxu0 %v1991_v57  ;;  %4992 = vmatprep.mubr.msk.bf16.mxu0 %vm5937_vm0, %v5936_v13 }
 0x2aa   : >> { %5002 = vmatprep.subr.bf16.mxu0 %v5936_v13 }
 0x2b0   : >> { %4993 = vmatmul.mubr.bf16.vlgmr.msra.gmra.mxu0 %v1713_v60 }
 0x2b1   : >> { %5003 = vmatpush3.bf16.xpose.msra.mxu0 %v1992_v59  ;;  %5004 = vmatprep.mubr.msk.bf16.mxu0 %vm5937_vm0, %v5936_v13 }
 0x2b2   : >> { %5014 = vmatprep.subr.bf16.mxu0 %v5936_v13 }
 0x2b8   : >> { %5005 = vmatmul.mubr.bf16.vlgmr.msra.gmra.mxu0 %v1714_v61 }
 0x2b9   : >> { %5015 = vmatpush3.bf16.xpose.msra.mxu0 %v1993_v62  ;;  %5016 = vmatprep.mubr.msk.bf16.mxu0 %vm5937_vm0, %v5936_v13 }
 0x2be   : >> { %v2220_v1 = vpop.f32.mrf.mxu0 }
 0x2bf   : >> { %v2268_v2 = vpack.c.bf16 %v2220_v1, %v2220_v1 }
 0x2c0   : >> { %5017 = vmatmul.mubr.bf16.vlgmr.msra.gmra.mxu0 %v1715_v63  ;;  %v6417_v3 = vpop.f32.mrf.mxu0 }
 0x2c1   : >> { %v2330_v4 = vsel %vm2328_vm1, %v2268_v2, 0 }
 0x2c2   : >> { %v2224_v14 = vpop.f32.mrf.mxu0  ;;  %4985 = vmatpush3.bf16.msra.mxu1 %v2330_v4 }
 0x2c3   : >> { %4996 = vmatprep.subr.bf16.mxu1 %v5936_v13 }
 0x2c4   : >> { %v2225_v15 = vpop.f32.mrf.mxu0 }
 0x368   : >> { %v2306_v16 = vpop.f32.mrf.mxu0 }
 0x369   : >> { %v2307_v25 = vadd.f32 %v2306_v16, %v6234_v28 }
 0x36a   : >> { %v4982_v26 = vpop.f32.mrf.mxu0 }
 0x36b   : >> { %v2313_v29 = vsel %vm2312_vm2, %v2307_v25, -inf }
 0x36c   : >> { %2314 = vmax.xlane.f32.xlu0 %v2313_v29  ;;  %v2309_v30 = vpop.f32.mrf.mxu0 }
 0x36e   : >> { %v4983_v31 = vpop.f32.mrf.mxu0 }
 0x36f   : >> { %v5477_v31 = vld [vmem:[#allocation6 + $0x78] sm:$0xff]  }
 0x370   : >> { %v2406_v32 = vpop.f32.mrf.mxu0  ;;  %4856 = vmatprep.subr.bf16.mxu0 %v5477_v31  ;;  %v5499_v31 = vld [vmem:[#allocation6] sm:$0xff]  }
 0x371   : >> { %v2407_v34 = vadd.f32 %v2406_v32, %v6234_v28  ;;  %v5478_v32 = vld [vmem:[#allocation6 + $0x38] sm:$0xff]  }
 0x372   : >> { %v4994_v35 = vpop.f32.mrf.mxu0  ;;  %4857 = vmatpush3.bf16.msra.mxu0 %v5478_v32  ;;  %v5500_v32 = vld [vmem:[#allocation6 + $0xa0] sm:$0xff]  }
 0x373   : >> { %v2412_v36 = vsel %vm2312_vm2, %v2407_v34, -inf  ;;  %v5480_v35 = vld [vmem:[#allocation6 + $0x30] sm:$0xff]  }
 0x374   : >> { %2413 = vmax.xlane.f32.xlu0 %v2412_v36  ;;  %v2409_v37 = vpop.f32.mrf.mxu0  ;;  %v5481_v36 = vld [vmem:[#allocation6 + $0x68] sm:$0xff]  }
 0x375   : >> { %v5482_v37 = vld [vmem:[#allocation6 + $0x28] sm:$0xff]  }
 0x376   : >> { %v4995_v38 = vpop.f32.mrf.mxu0 }
 0x377   : >> { %v5483_v38 = vld [vmem:[#allocation6 + $0x60] sm:$0xff]  }
 0x378   : >> { %v2504_v39 = vpop.f32.mrf.mxu0 }
 0x379   : >> { %v2505_v40 = vadd.f32 %v2504_v39, %v6234_v28  ;;  %v5484_v39 = vld [vmem:[#allocation6 + $0x20] sm:$0xff]  }
 0x37a   : >> { %v5006_v41 = vpop.f32.mrf.mxu0 }
 0x37b   : >> { %v2510_v42 = vsel %vm2312_vm2, %v2505_v40, -inf  ;;  %v5487_v41 = vld [vmem:[#allocation6 + $0x18] sm:$0xff]  }
 0x37c   : >> { %2511 = vmax.xlane.f32.xlu1 %v2510_v42  ;;  %v2507_v43 = vpop.f32.mrf.mxu0 }
 0x37e   : >> { %v5007_v44 = vpop.f32.mrf.mxu0 }
 0x380   : >> { %v2602_v45 = vpop.f32.mrf.mxu0 }
 0x381   : >> { %v2603_v46 = vadd.f32 %v2602_v45, %v6234_v28  ;;  %v2269_v45 = vpack.c.bf16 %v6417_v3, %v6417_v3 }
 0x382   : >> { %v5018_v47 = vpop.f32.mrf.mxu0 }
 0x383   : >> { %v2608_v48 = vsel %vm2312_vm2, %v2603_v46, -inf }
 0x384   : >> { %2609 = vmax.xlane.f32.xlu1 %v2608_v48  ;;  %v2605_v49 = vpop.f32.mrf.mxu0 }
 0x385   : >> { %v2428_v49 = vsel %vm2328_vm1, %v2269_v45, 0 }
 0x386   : >> { %v5019_v50 = vpop.f32.mrf.mxu0 }
 0x3f5   : >> { %v2315_v51 = vpop.xlane.xlu0 %2314 }
 0x3f6   : >> { %v2316_v52 = vsub.f32 %v2307_v25, %v2315_v51  ;;  %v2261_v25 = vpop.f32.mrf.mxu1 }
 0x3f7   : >> { %v2270_v50 = vpack.c.bf16 %v2261_v25, %v2261_v25  ;;  %v5494_v25 = vld [vmem:[#allocation6 + $0xe8] sm:$0xff]  }
 0x3f8   : >> { %v2317_v53 = vmul.f32 1.442695, %v2316_v52  ;;  %v2263_v26 = vpop.f32.mrf.mxu1 }
 0x3f9   : >> { %v2526_v3 = vsel %vm2328_vm1, %v2270_v50, 0 }
 0x3fa   : >> { %5605 = vpow2.f32 %v2317_v53  ;;  %v2265_v29 = vpop.f32.mrf.mxu1 }
 0x3fb   : >> { %v5496_v29 = vld [vmem:[#allocation6 + $0xa8] sm:$0xff]  }
 0x3fc   : >> { %v2266_v30 = vpop.f32.mrf.mxu1 }
 0x3fd   : >> { %v2414_v0 = vpop.xlane.xlu0 %2413  ;;  %v5498_v30 = vld [vmem:[#allocation6 + $0xe0] sm:$0xff]  }
 0x3fe   : >> { %v2415_v54 = vsub.f32 %v2407_v34, %v2414_v0  ;;  %v5479_v34 = vld [vmem:[#allocation6 + $0x70] sm:$0xff]  }
 0x3ff   : >> { %4858 = vmatprep.subr.bf16.mxu0 %v5479_v34  ;;  %v5501_v34 = vld [vmem:[#allocation6 + $0xd8] sm:$0xff]  }
 0x400   : >> { %v2416_v55 = vmul.f32 1.442695, %v2415_v54  ;;  %4859 = vmatpush3.bf16.msra.mxu0 %v5480_v35  ;;  %v5502_v35 = vld [vmem:[#allocation6 + $0x98] sm:$0xff]  }
 0x401   : >> { %4860 = vmatprep.subr.bf16.mxu0 %v5481_v36  ;;  %v5503_v36 = vld [vmem:[#allocation6 + $0xd0] sm:$0xff]  }
 0x402   : >> { %5607 = vpow2.f32 %v2416_v55  ;;  %v2271_v55 = vpack.c.bf16 %v2263_v26, %v2263_v26  ;;  %v5495_v26 = vld [vmem:[#allocation6 + $0x8] sm:$0xff]  }
 0x404   : >> { %4861 = vmatpush3.bf16.msra.mxu0 %v5482_v37  ;;  %v5504_v37 = vld [vmem:[#allocation6 + $0x90] sm:$0xff]  }
 0x405   : >> { %v2512_v56 = vpop.xlane.xlu1 %2511  ;;  %4862 = vmatprep.subr.bf16.mxu0 %v5483_v38  ;;  %v5505_v38 = vld [vmem:[#allocation6 + $0xc8] sm:$0xff]  }
 0x406   : >> { %v2513_v57 = vsub.f32 %v2505_v40, %v2512_v56  ;;  %v5485_v40 = vld [vmem:[#allocation6 + $0x58] sm:$0xff]  }
 0x407   : >> { %v5606_v58 = vpop.eup %5605 }
 0x408   : >> { %v2514_v59 = vmul.f32 1.442695, %v2513_v57  ;;  %v2319_v60 = vsel %vm2312_vm2, %v5606_v58, 0.0  ;;  %4863 = vmatpush3.bf16.msra.mxu0 %v5484_v39  ;;  %v5506_v39 = vld [vmem:[#allocation6 + $0x88] sm:$0xff]  }
 0x409   : >> { %2320 = vadd.xlane.f32.xlu0 %v2319_v60  ;;  %4864 = vmatprep.subr.bf16.mxu0 %v5485_v40  ;;  %v5507_v40 = vld [vmem:[#allocation6 + $0xc0] sm:$0xff]  }
 0x40a   : >> { %5609 = vpow2.f32 %v2514_v59  ;;  %v2624_v59 = vsel %vm2328_vm1, %v2271_v55, 0 }
 0x40c   : >> { %4865 = vmatpush3.bf16.msra.mxu0 %v5487_v41  ;;  %v5508_v41 = vld [vmem:[#allocation6 + $0x80] sm:$0xff]  }
 0x40d   : >> { %v2610_v61 = vpop.xlane.xlu1 %2609 }
 0x40e   : >> { %v2611_v62 = vsub.f32 %v2603_v46, %v2610_v61 }
 0x40f   : >> { %v5608_v63 = vpop.eup %5607 }
 0x410   : >> { %v2612_v1 = vmul.f32 1.442695, %v2611_v62  ;;  %v2418_v2 = vsel %vm2312_vm2, %v5608_v63, 0.0  ;;  %v5488_v62 = vld [vmem:[#allocation6 + $0xb8] sm:$0xff]  }
 0x411   : >> { %2419 = vadd.xlane.f32.xlu1 %v2418_v2  ;;  %v5490_v2 = vld [vmem:[#allocation6 + $0xf0] sm:$0xff]  }
 0x412   : >> { %5611 = vpow2.f32 %v2612_v1  ;;  %v5489_v1 = vld [vmem:[#allocation6 + $0x50] sm:$0xff]  }
 0x413   : >> { %4866 = vmatprep.subr.bf16.mxu0 %v5489_v1 }
 0x417   : >> { %v5610_v4 = vpop.eup %5609 }
 0x418   : >> { %v2516_v14 = vsel %vm2312_vm2, %v5610_v4, 0.0 }
 0x419   : >> { %2517 = vadd.xlane.f32.xlu0 %v2516_v14  ;;  %v5492_v14 = vld [vmem:[#allocation6 + $0xb0] sm:$0xff]  }
 0x41f   : >> { %v6432_v15 = vpop.eup %5611 }
 0x420   : >> { %v2614_v16 = vsel %vm2312_vm2, %v6432_v15, 0.0 }
 0x421   : >> { %2615 = vadd.xlane.f32.xlu1 %v2614_v16  ;;  %v5493_v16 = vld [vmem:[#allocation6 + $0x48] sm:$0xff]  }
 0x492   : >> { %v2321_v42 = vpop.xlane.xlu0 %2320 }
 0x493   : >> { %5613 = vrcp.f32 %v2321_v42 }
 0x49a   : >> { %v2420_v43 = vpop.xlane.xlu1 %2419 }
 0x49b   : >> { %5615 = vrcp.f32 %v2420_v43 }
 0x4a0   : >> { %v5614_v44 = vpop.eup %5613 }
 0x4a1   : >> { %v2323_v46 = vmul.f32 %v5614_v44, %v5606_v58  ;;  %v5486_v58 = vld [vmem:[#allocation6 + $0xf8] sm:$0xff]  }
 0x4a2   : >> { %v2518_v47 = vpop.xlane.xlu0 %2517 }
 0x4a3   : >> { %5617 = vrcp.f32 %v2518_v47  ;;  %v2324_v48 = vpack.c.bf16 %v2323_v46, %v2323_v46 }
 0x4a5   : >> { %4987 = vmatmul.mubr.msk.bf16.vlgmr.msra.gmra.mxu1 %vm2312_vm2, %v2324_v48 }
 0x4a6   : >> { %4997 = vmatpush3.bf16.msra.mxu1 %v2428_v49  ;;  %4998 = vmatprep.mubr.msk.bf16.mxu1 %vm5937_vm0, %v5936_v13 }
 0x4a7   : >> { %5008 = vmatprep.subr.bf16.mxu1 %v5936_v13 }
 0x4a8   : >> { %v5616_v51 = vpop.eup %5615 }
 0x4a9   : >> { %v2422_v52 = vmul.f32 %v5616_v51, %v5608_v63 }
 0x4aa   : >> { %v2616_v53 = vpop.xlane.xlu1 %2615 }
 0x4ab   : >> { %5619 = vrcp.f32 %v2616_v53  ;;  %v2423_v0 = vpack.c.bf16 %v2422_v52, %v2422_v52 }
 0x4ad   : >> { %4999 = vmatmul.mubr.msk.bf16.vlgmr.msra.gmra.mxu1 %vm2312_vm2, %v2423_v0 }
 0x4ae   : >> { %5009 = vmatpush3.bf16.msra.mxu1 %v2526_v3  ;;  %5010 = vmatprep.mubr.msk.bf16.mxu1 %vm5937_vm0, %v5936_v13 }
 0x4af   : >> { %5020 = vmatprep.subr.bf16.mxu1 %v5936_v13 }
 0x4b0   : >> { %v5618_v54 = vpop.eup %5617 }
 0x4b1   : >> { %v2520_v56 = vmul.f32 %v5618_v54, %v5610_v4  ;;  %v5491_v4 = vld [vmem:[#allocation6 + $0x10] sm:$0xff]  }
 0x4b2   : >> { %4867 = vmatpush3.bf16.msra.mxu0 %v5491_v4 }
 0x4b3   : >> { %v2521_v57 = vpack.c.bf16 %v2520_v56, %v2520_v56  ;;  %4868 = vmatprep.subr.bf16.mxu0 %v5493_v16 }
 0x4b5   : >> { %5011 = vmatmul.mubr.msk.bf16.vlgmr.msra.gmra.mxu1 %vm2312_vm2, %v2521_v57 }
 0x4b6   : >> { %5021 = vmatpush3.bf16.msra.mxu1 %v2624_v59  ;;  %5022 = vmatprep.mubr.msk.bf16.mxu1 %vm5937_vm0, %v5936_v13 }
 0x4b7   : >> { %4878 = vmatprep.subr.bf16.mxu1 %v5486_v58  ;;  %4869 = vmatpush3.bf16.msra.mxu0 %v5495_v26 }
 0x4b8   : >> { %v5620_v60 = vpop.eup %5619 }
 0x4b9   : >> { %v2618_v61 = vmul.f32 %v5620_v60, %v6432_v15  ;;  %v5497_v15 = vld [vmem:[#allocation6 + $0x40] sm:$0xff]  }
 0x4ba   : >> { %4870 = vmatprep.subr.bf16.mxu0 %v5497_v15  ;;  %v5509_v60 = vld [vmem:[#allocation7 + $0xe0] ss:$16 sps:$4 sm:$0xff]  }
 0x4bb   : >> { %v2619_v63 = vpack.c.bf16 %v2618_v61, %v2618_v61  ;;  %4871 = vmatpush3.bf16.msra.mxu0 %v5499_v31  ;;  %v5511_v61 = vld [vmem:[#allocation7 + $0xe4] ss:$16 sps:$4 sm:$0xff]  }
 0x4bc   : >> { %3236 = vmatprep.subr.bf16.mxu0 %v5511_v61 }
 0x4bd   : >> { %5023 = vmatmul.mubr.msk.bf16.vlgmr.msra.gmra.mxu1 %vm2312_vm2, %v2619_v63  ;;  %v5514_v63 = vld [vmem:[#allocation7 + $0xec] ss:$16 sps:$4 sm:$0xff]  }
 0x4be   : >> { %4879 = vmatpush3.bf16.msra.mxu1 %v5488_v62  ;;  %v5512_v62 = vld [vmem:[#allocation7 + $0xe8] ss:$16 sps:$4 sm:$0xff]  }
 0x4bf   : >> { %4880 = vmatprep.subr.bf16.mxu1 %v5490_v2 }
 0x4c2   : >> { %4881 = vmatpush3.bf16.msra.mxu1 %v5492_v14 }
 0x4c3   : >> { %4882 = vmatprep.subr.bf16.mxu1 %v5494_v25  ;;  %v4712_v25 = vld [vmem:[%s6666_s30] ss:$0 sm:$0xff] }
 0x4c6   : >> { %4883 = vmatpush3.bf16.msra.mxu1 %v5496_v29 }
 0x4c7   : >> { %4884 = vmatprep.subr.bf16.mxu1 %v5498_v30 }
 0x4ca   : >> { %4885 = vmatpush3.bf16.msra.mxu1 %v5500_v32 }
 0x4cb   : >> { %4886 = vmatprep.subr.bf16.mxu1 %v5501_v34 }
 0x4ce   : >> { %4887 = vmatpush3.bf16.msra.mxu1 %v5502_v35 }
 0x4cf   : >> { %4888 = vmatprep.subr.bf16.mxu1 %v5503_v36  ;;  %v5517_v36 = vld [vmem:[#allocation7 + $0xc4] ss:$16 sps:$4 sm:$0xff]  }
 0x4d2   : >> { %4889 = vmatpush3.bf16.msra.mxu1 %v5504_v37  ;;  %v5520_v37 = vld [vmem:[#allocation7 + $0xcc] ss:$16 sps:$4 sm:$0xff]  }
 0x4d3   : >> { %4890 = vmatprep.subr.bf16.mxu1 %v5505_v38  ;;  %v5515_v38 = vld [vmem:[#allocation7 + $0xc0] ss:$16 sps:$4 sm:$0xff]  }
 0x4d6   : >> { %4891 = vmatpush3.bf16.msra.mxu1 %v5506_v39  ;;  %v5518_v39 = vld [vmem:[#allocation7 + $0xc8] ss:$16 sps:$4 sm:$0xff]  }
 0x4d7   : >> { %4892 = vmatprep.subr.bf16.mxu1 %v5507_v40  ;;  %v5523_v40 = vld [vmem:[#allocation7 + $0xa4] ss:$16 sps:$4 sm:$0xff]  }
 0x4da   : >> { %4893 = vmatpush3.bf16.msra.mxu1 %v5508_v41  ;;  %v5526_v41 = vld [vmem:[#allocation7 + $0xac] ss:$16 sps:$4 sm:$0xff]  }
 0x4db   : >> { %3277 = vmatprep.subr.bf16.mxu1 %v5514_v63 }
 0x565   : >> { %v2366_v42 = vpop.f32.mrf.mxu1 }
 0x566   : >> { %v2666_v48 = vpack.c.bf16 %v2366_v42, %v2366_v42  ;;  %v5521_v42 = vld [vmem:[#allocation7 + $0xa0] ss:$16 sps:$4 sm:$0xff]  }
 0x567   : >> { %v4988_v43 = vpop.f32.mrf.mxu1 }
 0x568   : >> { %v5524_v43 = vld [vmem:[#allocation7 + $0xa8] ss:$16 sps:$4 sm:$0xff]  }
 0x569   : >> { %v2369_v44 = vpop.f32.mrf.mxu1 }
 0x56a   : >> { %v5529_v44 = vld [vmem:[#allocation7 + $0x84] ss:$16 sps:$4 sm:$0xff]  }
 0x56b   : >> { %v4989_v45 = vpop.f32.mrf.mxu1 }
 0x56c   : >> { %v5530_v45 = vld [vmem:[#allocation7 + $0x88] ss:$16 sps:$4 sm:$0xff]  }
 0x56d   : >> { %v2464_v46 = vpop.f32.mrf.mxu1 }
 0x56e   : >> { %v2667_v47 = vpack.c.bf16 %v2464_v46, %v2464_v46  ;;  %v5532_v46 = vld [vmem:[#allocation7 + $0x8c] ss:$16 sps:$4 sm:$0xff]  }
 0x56f   : >> { %v5000_v49 = vpop.f32.mrf.mxu1 }
 0x570   : >> { %2965 = vmatprep.mubr.bf16.mxu0 %v2667_v47  ;;  %v5535_v47 = vld [vmem:[#allocation7 + $0x64] ss:$16 sps:$4 sm:$0xff]   ;;  %v5533_v49 = vld [vmem:[#allocation7 + $0x60] ss:$16 sps:$4 sm:$0xff]  }
 0x571   : >> { %v2467_v50 = vpop.f32.mrf.mxu1  ;;  %2966 = vmatmul.mubr.bf16.vlgmr.msra.gmra.mxu0 %v2666_v48  ;;  %v5538_v48 = vld [vmem:[#allocation7 + $0x6c] ss:$16 sps:$4 sm:$0xff]  }
 0x572   : >> { %3268 = vmatprep.mubr.bf16.mxu0 %v5935_v33  ;;  %3237 = vmatpush1.bf16.msra.mxu0 %v5509_v60  ;;  %v5536_v50 = vld [vmem:[#allocation7 + $0x68] ss:$16 sps:$4 sm:$0xff]  }
 0x573   : >> { %v5001_v51 = vpop.f32.mrf.mxu1  ;;  %3238 = vmatprep.subr.bf16.mxu0 %v5517_v36  ;;  %v5554_v60 = vld [vmem:[#allocation7 + $0x8] ss:$16 sps:$4 sm:$0xff]  }
 0x574   : >> { %v5541_v51 = vld [vmem:[#allocation7 + $0x44] ss:$16 sps:$4 sm:$0xff]  }
 0x575   : >> { %v2562_v52 = vpop.f32.mrf.mxu1 }
 0x576   : >> { %v2668_v56 = vpack.c.bf16 %v2562_v52, %v2562_v52  ;;  %3239 = vmatpush1.bf16.msra.mxu0 %v5515_v38  ;;  %v5544_v52 = vld [vmem:[#allocation7 + $0x4c] ss:$16 sps:$4 sm:$0xff]  }
 0x577   : >> { %v5012_v53 = vpop.f32.mrf.mxu1  ;;  %3240 = vmatprep.subr.bf16.mxu0 %v5523_v40 }
 0x578   : >> { %v5539_v53 = vld [vmem:[#allocation7 + $0x40] ss:$16 sps:$4 sm:$0xff]  }
 0x579   : >> { %v2565_v3 = vpop.f32.mrf.mxu1 }
 0x57a   : >> { %3241 = vmatpush1.bf16.msra.mxu0 %v5521_v42  ;;  %v5542_v3 = vld [vmem:[#allocation7 + $0x48] ss:$16 sps:$4 sm:$0xff]  }
 0x57b   : >> { %v5013_v0 = vpop.f32.mrf.mxu1  ;;  %3242 = vmatprep.subr.bf16.mxu0 %v5529_v44 }
 0x57c   : >> { %v5547_v0 = vld [vmem:[#allocation7 + $0x24] ss:$16 sps:$4 sm:$0xff]  }
 0x57d   : >> { %v2660_v54 = vpop.f32.mrf.mxu1 }
 0x57e   : >> { %v2669_v55 = vpack.c.bf16 %v2660_v54, %v2660_v54  ;;  %v5550_v54 = vld [vmem:[#allocation7 + $0x2c] ss:$16 sps:$4 sm:$0xff]  }
 0x57f   : >> { %v5024_v57 = vpop.f32.mrf.mxu1 }
 0x580   : >> { %3005 = vmatprep.mubr.bf16.mxu1 %v2669_v55  ;;  %v5545_v55 = vld [vmem:[#allocation7 + $0x20] ss:$16 sps:$4 sm:$0xff]   ;;  %v5553_v57 = vld [vmem:[#allocation7 + $0x4] ss:$16 sps:$4 sm:$0xff]  }
 0x581   : >> { %v2663_v58 = vpop.f32.mrf.mxu1  ;;  %3006 = vmatmul.mubr.bf16.vlgmr.msra.gmra.mxu1 %v2668_v56  ;;  %v5548_v56 = vld [vmem:[#allocation7 + $0x28] ss:$16 sps:$4 sm:$0xff]  }
 0x582   : >> { %3309 = vmatprep.mubr.bf16.mxu1 %v5935_v33  ;;  %3278 = vmatpush1.bf16.msra.mxu1 %v5512_v62  ;;  %v5556_v58 = vld [vmem:[#allocation7 + $0xc] ss:$16 sps:$4 sm:$0xff]  }
 0x583   : >> { %v5025_v59 = vpop.f32.mrf.mxu1  ;;  %3279 = vmatprep.subr.bf16.mxu1 %v5520_v37 }
 0x584   : >> { %v5551_v59 = vld [vmem:[#allocation7] ss:$16 sps:$4 sm:$0xff]  }
 0x586   : >> { %3280 = vmatpush1.bf16.msra.mxu1 %v5518_v39 }
 0x587   : >> { %3281 = vmatprep.subr.bf16.mxu1 %v5526_v41 }
 0x58a   : >> { %3282 = vmatpush1.bf16.msra.mxu1 %v5524_v43 }
 0x58b   : >> { %3283 = vmatprep.subr.bf16.mxu1 %v5532_v46 }
 0x58e   : >> { %3284 = vmatpush1.bf16.msra.mxu1 %v5530_v45 }
 0x58f   : >> { %3285 = vmatprep.subr.bf16.mxu1 %v5538_v48 }
 0x592   : >> { %3286 = vmatpush1.bf16.msra.mxu1 %v5536_v50 }
 0x593   : >> { %3287 = vmatprep.subr.bf16.mxu1 %v5544_v52 }
 0x596   : >> { %3288 = vmatpush1.bf16.msra.mxu1 %v5542_v3 }
 0x597   : >> { %3289 = vmatprep.subr.bf16.mxu1 %v5550_v54 }
 0x59a   : >> { %3290 = vmatpush1.bf16.msra.mxu1 %v5548_v56 }
 0x59b   : >> { %3291 = vmatprep.subr.bf16.mxu1 %v5556_v58 }
 0x59e   : >> { %3292 = vmatpush1.bf16.msra.mxu1 %v5554_v60 }
 0x59f   : >> { %5032 = vmatprep.subr.bf16.mxu1 %v5936_v13 }
 0x631   : >> { %v4872_v1 = vpop.f32.mrf.mxu0 }
 0x633   : >> { %v4873_v2 = vpop.f32.mrf.mxu0 }
 0x634   : >> { %v4874_v16 = vadd.f32 %v4873_v2, %v4872_v1 }
 0x635   : >> { %v4875_v4 = vpop.f32.mrf.mxu0 }
 0x636   : >> { %v2968_v29 = vadd.f32 %v4874_v16, %v4712_v25 }
 0x637   : >> { %v4876_v14 = vpop.f32.mrf.mxu0 }
 0x641   : >> { %v4894_v26 = vpop.f32.mrf.mxu1 }
 0x643   : >> { %v4895_v33 = vpop.f32.mrf.mxu1 }
 0x644   : >> { %v4896_v15 = vadd.f32 %v4895_v33, %v4894_v26  ;;  %v4745_v26 = vld [vmem:[%s6620_s8] ss:$0 sm:$0xff] }
 0x645   : >> { %v4897_v30 = vpop.f32.mrf.mxu1 }
 0x646   : >> { %v3008_v31 = vadd.f32 %v4896_v15, %v2968_v29  ;;  %v4746_v29 = vld [vmem:[%s6621_s9] ss:$0 sm:$0xff] }
 0x647   : >> { %v4898_v32 = vpop.f32.mrf.mxu1 }
 0x648   : >> { %v6460_v34 = vadd.f32 %v5915_v27, %v3008_v31  ;;  %v5527_v27 = vld [vmem:[#allocation7 + $0x80] ss:$16 sps:$4 sm:$0xff]  }
 0x649   : >> { %3243 = vmatpush1.bf16.msra.mxu0 %v5527_v27 }
 0x64a   : >> { %3016 = vadd.xlane.f32.xlu0 %v6460_v34  ;;  %v3019_v35 = vmul.f32 %v6460_v34, %v6460_v34  ;;  %3244 = vmatprep.subr.bf16.mxu0 %v5535_v47 }
 0x64c   : >> { %3020 = vadd.xlane.f32.xlu1 %v3019_v35 }
 0x64d   : >> { %3245 = vmatpush1.bf16.msra.mxu0 %v5533_v49 }
 0x64e   : >> { %3246 = vmatprep.subr.bf16.mxu0 %v5541_v51 }
 0x651   : >> { %3247 = vmatpush1.bf16.msra.mxu0 %v5539_v53 }
 0x652   : >> { %3248 = vmatprep.subr.bf16.mxu0 %v5547_v0 }
 0x655   : >> { %3249 = vmatpush1.bf16.msra.mxu0 %v5545_v55 }
 0x656   : >> { %3250 = vmatprep.subr.bf16.mxu0 %v5553_v57 }
 0x659   : >> { %3251 = vmatpush1.bf16.msra.mxu0 %v5551_v59 }
 0x65a   : >> { %5026 = vmatprep.subr.bf16.mxu0 %v5936_v13 }
 0x6d3   : >> { %v3017_v61 = vpop.xlane.xlu0 %3016 }
 0x6d4   : >> { %v3018_v62 = vmul.f32 0.03125, %v3017_v61 }
 0x6d5   : >> { %v3021_v63 = vpop.xlane.xlu1 %3020 }
 0x6d6   : >> { %v3023_v1 = vmul.f32 %v3018_v62, %v3018_v62  ;;  %v3022_v2 = vmul.f32 0.03125, %v3021_v63  ;;  %v3025_v16 = vsub.f32 %v6460_v34, %v3018_v62 }
 0x6d8   : >> { %v3024_v4 = vsub.f32 %v3022_v2, %v3023_v1 }
 0x6da   : >> { %v3026_v14 = vadd.f32 1e-05, %v3024_v4 }
 0x6dc   : >> { %5621 = vrsqrt.f32 %v3026_v14 }
 0x6e9   : >> { %v5622_v25 = vpop.eup %5621 }
 0x6ea   : >> { %v3028_v33 = vmul.f32 %v5622_v25, %v3025_v16 }
 0x6ec   : >> { %v3035_v15 = vmul.f32 %v4745_v26, %v3028_v33 }
 0x6ee   : >> { %v6474_v30 = vadd.f32 %v4746_v29, %v3035_v15 }
 0x6f0   : >> { %v3043_v31 = vpack.c.bf16 %v6474_v30, %v6474_v30 }
 0x6f2   : >> { %3269 = vmatmul.mubr.bf16.vlgmr.msra.gmra.mxu0 %v3043_v31  ;;  %3310 = vmatmul.mubr.bf16.vlgmr.msra.gmra.mxu1 %v3043_v31 }
 0x6f3   : >> { %5027 = vmatpush3.bf16.xpose.msra.mxu0 %v1148_v7  ;;  %5028 = vmatprep.mubr.msk.bf16.mxu0 %vm5937_vm0, %v5936_v13 }
 0x6f4   : >> { %5038 = vmatprep.subr.bf16.mxu0 %v5936_v13  ;;  %5034 = vmatprep.mubr.msk.bf16.mxu1 %vm5937_vm0, %v5936_v13 }
 0x7b2   : >> { %v3270_v32 = vpop.f32.mrf.mxu0  ;;  %v3311_v34 = vpop.f32.mrf.mxu1 }
 0x7b3   : >> { %v3318_v35 = vpack.c.bf16 %v3270_v32, %v3270_v32  ;;  %v3320_v43 = vpack.c.bf16 %v3311_v34, %v3311_v34 }
 0x7b4   : >> { %v3272_v36 = vpop.f32.mrf.mxu0  ;;  %v3313_v37 = vpop.f32.mrf.mxu1 }
 0x7b5   : >> { %5029 = vmatmul.mubr.bf16.vlgmr.msra.gmra.mxu0 %v3318_v35  ;;  %v3319_v42 = vpack.c.bf16 %v3272_v36, %v3272_v36  ;;  %v3321_v27 = vpack.c.bf16 %v3313_v37, %v3313_v37 }
 0x7b6   : >> { %v3274_v38 = vpop.f32.mrf.mxu0  ;;  %v3315_v39 = vpop.f32.mrf.mxu1  ;;  %5039 = vmatpush3.bf16.xpose.msra.mxu0 %v1149_v11  ;;  %5040 = vmatprep.mubr.msk.bf16.mxu0 %vm5937_vm0, %v5936_v13 }
 0x7b7   : >> { %5050 = vmatprep.subr.bf16.mxu0 %v5936_v13  ;;  %v3378_v38 = vsel %vm2328_vm1, %v1426_v19, 0 }
 0x7b8   : >> { %v3275_v40 = vpop.f32.mrf.mxu0  ;;  %v3316_v41 = vpop.f32.mrf.mxu1  ;;  %5033 = vmatpush3.bf16.msra.mxu1 %v3378_v38  ;;  %v5580_v38 = vld [vmem:[#allocation12 + $0xa0] sm:$0xff]  }
 0x7b9   : >> { %5044 = vmatprep.subr.bf16.mxu1 %v5936_v13  ;;  %v5557_v41 = vld [vmem:[#allocation12 + $0x78] sm:$0xff]  }
 0x7bd   : >> { %5041 = vmatmul.mubr.bf16.vlgmr.msra.gmra.mxu0 %v3319_v42  ;;  %v5558_v42 = vld [vmem:[#allocation12 + $0x38] sm:$0xff]  }
 0x7be   : >> { %5051 = vmatpush3.bf16.xpose.msra.mxu0 %v1150_v8  ;;  %5052 = vmatprep.mubr.msk.bf16.mxu0 %vm5937_vm0, %v5936_v13 }
 0x7bf   : >> { %5062 = vmatprep.subr.bf16.mxu0 %v5936_v13 }
 0x7c5   : >> { %5053 = vmatmul.mubr.bf16.vlgmr.msra.gmra.mxu0 %v3320_v43  ;;  %v5559_v43 = vld [vmem:[#allocation12 + $0x70] sm:$0xff]  }
 0x7c6   : >> { %5063 = vmatpush3.bf16.xpose.msra.mxu0 %v1151_v12  ;;  %5064 = vmatprep.mubr.msk.bf16.mxu0 %vm5937_vm0, %v5936_v13 }
 0x7c7   : >> { %4916 = vmatprep.subr.bf16.mxu0 %v5557_v41  ;;  %v5583_v41 = vld [vmem:[#allocation12 + $0xd0] sm:$0xff]  }
 0x7cd   : >> { %5065 = vmatmul.mubr.bf16.vlgmr.msra.gmra.mxu0 %v3321_v27  ;;  %v5560_v27 = vld [vmem:[#allocation12 + $0x30] sm:$0xff]  }
 0x7ce   : >> { %4917 = vmatpush3.bf16.msra.mxu0 %v5558_v42  ;;  %v5584_v42 = vld [vmem:[#allocation12 + $0x90] sm:$0xff]  }
 0x7cf   : >> { %4918 = vmatprep.subr.bf16.mxu0 %v5559_v43  ;;  %v5585_v43 = vld [vmem:[#allocation12 + $0xc8] sm:$0xff]  }
 0x7d2   : >> { %4919 = vmatpush3.bf16.msra.mxu0 %v5560_v27  ;;  %v5586_v27 = vld [vmem:[#allocation12 + $0x88] sm:$0xff]  }
 0x875   : >> { %v3356_v44 = vpop.f32.mrf.mxu0 }
 0x876   : >> { %v3362_v45 = vsel %vm2312_vm2, %v3356_v44, -inf }
 0x877   : >> { %3363 = vmax.xlane.f32.xlu0 %v3362_v45  ;;  %v5030_v46 = vpop.f32.mrf.mxu0  ;;  %v5562_v45 = vld [vmem:[#allocation12 + $0x28] sm:$0xff]  }
 0x878   : >> { %v5563_v46 = vld [vmem:[#allocation12 + $0x60] sm:$0xff]  }
 0x879   : >> { %v3359_v47 = vpop.f32.mrf.mxu0 }
 0x87a   : >> { %v5564_v47 = vld [vmem:[#allocation12 + $0x20] sm:$0xff]  }
 0x87b   : >> { %v5031_v48 = vpop.f32.mrf.mxu0 }
 0x87c   : >> { %v5565_v48 = vld [vmem:[#allocation12 + $0x58] sm:$0xff]  }
 0x87d   : >> { %v3454_v49 = vpop.f32.mrf.mxu0 }
 0x87e   : >> { %v3460_v50 = vsel %vm2312_vm2, %v3454_v49, -inf }
 0x87f   : >> { %3461 = vmax.xlane.f32.xlu1 %v3460_v50  ;;  %v5042_v51 = vpop.f32.mrf.mxu0 }
 0x881   : >> { %v3457_v52 = vpop.f32.mrf.mxu0 }
 0x883   : >> { %v5043_v53 = vpop.f32.mrf.mxu0 }
 0x885   : >> { %v3552_v3 = vpop.f32.mrf.mxu0 }
 0x886   : >> { %v3558_v0 = vsel %vm2312_vm2, %v3552_v3, -inf }
 0x887   : >> { %3559 = vmax.xlane.f32.xlu0 %v3558_v0  ;;  %v5054_v54 = vpop.f32.mrf.mxu0 }
 0x888   : >> { %v3476_v54 = vsel %vm2328_vm1, %v1427_v23, 0 }
 0x889   : >> { %v3555_v55 = vpop.f32.mrf.mxu0 }
 0x88b   : >> { %v5055_v56 = vpop.f32.mrf.mxu0 }
 0x88d   : >> { %v3650_v57 = vpop.f32.mrf.mxu0 }
 0x88e   : >> { %v3656_v58 = vsel %vm2312_vm2, %v3650_v57, -inf }
 0x88f   : >> { %3657 = vmax.xlane.f32.xlu1 %v3656_v58  ;;  %v5066_v59 = vpop.f32.mrf.mxu0 }
 0x890   : >> { %v3574_v59 = vsel %vm2328_vm1, %v1428_v20, 0 }
 0x891   : >> { %v3653_v60 = vpop.f32.mrf.mxu0 }
 0x893   : >> { %v5067_v61 = vpop.f32.mrf.mxu0 }
 0x900   : >> { %v3364_v62 = vpop.xlane.xlu0 %3363 }
 0x901   : >> { %v3365_v63 = vsub.f32 %v3356_v44, %v3364_v62  ;;  %v5561_v44 = vld [vmem:[#allocation12 + $0x68] sm:$0xff]  }
 0x902   : >> { %4920 = vmatprep.subr.bf16.mxu0 %v5561_v44  ;;  %v5587_v44 = vld [vmem:[#allocation12 + $0xc0] sm:$0xff]  }
 0x903   : >> { %v3366_v1 = vmul.f32 1.442695, %v3365_v63  ;;  %4921 = vmatpush3.bf16.msra.mxu0 %v5562_v45  ;;  %v3672_v63 = vsel %vm2328_vm1, %v1429_v24, 0  ;;  %v5588_v45 = vld [vmem:[#allocation12 + $0x80] sm:$0xff]  }
 0x904   : >> { %4922 = vmatprep.subr.bf16.mxu0 %v5563_v46 }
 0x905   : >> { %5623 = vpow2.f32 %v3366_v1  ;;  %v5566_v1 = vld [vmem:[#allocation12 + $0xf8] sm:$0xff]  }
 0x907   : >> { %4923 = vmatpush3.bf16.msra.mxu0 %v5564_v47 }
 0x908   : >> { %v3462_v2 = vpop.xlane.xlu1 %3461  ;;  %4924 = vmatprep.subr.bf16.mxu0 %v5565_v48 }
 0x909   : >> { %v3463_v4 = vsub.f32 %v3454_v49, %v3462_v2  ;;  %v5567_v49 = vld [vmem:[#allocation12 + $0x18] sm:$0xff]  }
 0x90b   : >> { %v3464_v14 = vmul.f32 1.442695, %v3463_v4  ;;  %4925 = vmatpush3.bf16.msra.mxu0 %v5567_v49 }
 0x90d   : >> { %5625 = vpow2.f32 %v3464_v14  ;;  %v5568_v14 = vld [vmem:[#allocation12 + $0xb8] sm:$0xff]  }
 0x910   : >> { %v3560_v16 = vpop.xlane.xlu0 %3559 }
 0x911   : >> { %v3561_v25 = vsub.f32 %v3552_v3, %v3560_v16 }
 0x912   : >> { %v5624_v26 = vpop.eup %5623 }
 0x913   : >> { %v3562_v33 = vmul.f32 1.442695, %v3561_v25  ;;  %v3368_v29 = vsel %vm2312_vm2, %v5624_v26, 0.0  ;;  %v5569_v25 = vld [vmem:[#allocation12 + $0x50] sm:$0xff]  }
 0x914   : >> { %3369 = vadd.xlane.f32.xlu0 %v3368_v29  ;;  %v5572_v29 = vld [vmem:[#allocation12 + $0xb0] sm:$0xff]   ;;  %4926 = vmatprep.subr.bf16.mxu0 %v5569_v25 }
 0x915   : >> { %5627 = vpow2.f32 %v3562_v33  ;;  %v5571_v33 = vld [vmem:[#allocation12 + $0x10] sm:$0xff]  }
 0x916   : >> { %4927 = vmatpush3.bf16.msra.mxu0 %v5571_v33 }
 0x918   : >> { %v3658_v15 = vpop.xlane.xlu1 %3657 }
 0x919   : >> { %v3659_v31 = vsub.f32 %v3650_v57, %v3658_v15  ;;  %v5573_v15 = vld [vmem:[#allocation12 + $0x48] sm:$0xff]  }
 0x91a   : >> { %v5626_v32 = vpop.eup %5625  ;;  %4928 = vmatprep.subr.bf16.mxu0 %v5573_v15 }
 0x91b   : >> { %v3660_v34 = vmul.f32 1.442695, %v3659_v31  ;;  %v3466_v35 = vsel %vm2312_vm2, %v5626_v32, 0.0  ;;  %v5574_v31 = vld [vmem:[#allocation12 + $0xe8] sm:$0xff]  }
 0x91c   : >> { %3467 = vadd.xlane.f32.xlu1 %v3466_v35  ;;  %v5577_v35 = vld [vmem:[#allocation12 + $0x40] sm:$0xff]  }
 0x91d   : >> { %5629 = vpow2.f32 %v3660_v34  ;;  %v5576_v34 = vld [vmem:[#allocation12 + $0xa8] sm:$0xff]  }
 0x922   : >> { %v5628_v36 = vpop.eup %5627 }
 0x923   : >> { %v3564_v37 = vsel %vm2312_vm2, %v5628_v36, 0.0 }
 0x924   : >> { %3565 = vadd.xlane.f32.xlu0 %v3564_v37  ;;  %v5579_v37 = vld [vmem:[#allocation12] sm:$0xff]  }
 0x92a   : >> { %v5630_v39 = vpop.eup %5629 }
 0x92b   : >> { %v3662_v40 = vsel %vm2312_vm2, %v5630_v39, 0.0 }
 0x92c   : >> { %3663 = vadd.xlane.f32.xlu1 %v3662_v40  ;;  %v5582_v40 = vld [vmem:[#allocation12 + $0x98] sm:$0xff]  }
 0x99d   : >> { %v3370_v50 = vpop.xlane.xlu0 %3369 }
 0x99e   : >> { %5631 = vrcp.f32 %v3370_v50 }
 0x9a5   : >> { %v3468_v51 = vpop.xlane.xlu1 %3467 }
 0x9a6   : >> { %5633 = vrcp.f32 %v3468_v51 }
 0x9ab   : >> { %v5632_v52 = vpop.eup %5631 }
 0x9ac   : >> { %v3372_v53 = vmul.f32 %v5632_v52, %v5624_v26  ;;  %v5570_v26 = vld [vmem:[#allocation12 + $0xf0] sm:$0xff]  }
 0x9ad   : >> { %v3566_v3 = vpop.xlane.xlu0 %3565 }
 0x9ae   : >> { %5635 = vrcp.f32 %v3566_v3  ;;  %v3373_v0 = vpack.c.bf16 %v3372_v53, %v3372_v53 }
 0x9b0   : >> { %5035 = vmatmul.mubr.msk.bf16.vlgmr.msra.gmra.mxu1 %vm2312_vm2, %v3373_v0 }
 0x9b1   : >> { %5045 = vmatpush3.bf16.msra.mxu1 %v3476_v54  ;;  %5046 = vmatprep.mubr.msk.bf16.mxu1 %vm5937_vm0, %v5936_v13 }
 0x9b2   : >> { %5056 = vmatprep.subr.bf16.mxu1 %v5936_v13 }
 0x9b3   : >> { %v5634_v55 = vpop.eup %5633 }
 0x9b4   : >> { %v3470_v56 = vmul.f32 %v5634_v55, %v5626_v32  ;;  %v5575_v32 = vld [vmem:[#allocation12 + $0x8] sm:$0xff]  }
 0x9b5   : >> { %v3664_v57 = vpop.xlane.xlu1 %3663  ;;  %4929 = vmatpush3.bf16.msra.mxu0 %v5575_v32 }
 0x9b6   : >> { %5637 = vrcp.f32 %v3664_v57  ;;  %v3471_v58 = vpack.c.bf16 %v3470_v56, %v3470_v56  ;;  %4930 = vmatprep.subr.bf16.mxu0 %v5577_v35 }
 0x9b8   : >> { %5047 = vmatmul.mubr.msk.bf16.vlgmr.msra.gmra.mxu1 %vm2312_vm2, %v3471_v58 }
 0x9b9   : >> { %5057 = vmatpush3.bf16.msra.mxu1 %v3574_v59  ;;  %5058 = vmatprep.mubr.msk.bf16.mxu1 %vm5937_vm0, %v5936_v13 }
 0x9ba   : >> { %5068 = vmatprep.subr.bf16.mxu1 %v5936_v13  ;;  %4931 = vmatpush3.bf16.msra.mxu0 %v5579_v37 }
 0x9bb   : >> { %v5636_v60 = vpop.eup %5635  ;;  %5074 = vmatprep.subr.bf16.mxu0 %v5936_v13 }
 0x9bc   : >> { %v3568_v61 = vmul.f32 %v5636_v60, %v5628_v36  ;;  %v5578_v36 = vld [vmem:[#allocation12 + $0xe0] sm:$0xff]  }
 0x9be   : >> { %v3569_v62 = vpack.c.bf16 %v3568_v61, %v3568_v61 }
 0x9c0   : >> { %5059 = vmatmul.mubr.msk.bf16.vlgmr.msra.gmra.mxu1 %vm2312_vm2, %v3569_v62 }
 0x9c1   : >> { %5069 = vmatpush3.bf16.msra.mxu1 %v3672_v63  ;;  %5070 = vmatprep.mubr.msk.bf16.mxu1 %vm5937_vm0, %v5936_v13 }
 0x9c2   : >> { %4938 = vmatprep.subr.bf16.mxu1 %v5566_v1  ;;  %v5589_v1 = vld [vmem:[%s6631_s19 + $0x38] sm:$0xff]  }
 0x9c3   : >> { %v5638_v2 = vpop.eup %5637 }
 0x9c4   : >> { %v3666_v4 = vmul.f32 %v5638_v2, %v5630_v39  ;;  %v5581_v39 = vld [vmem:[#allocation12 + $0xd8] sm:$0xff]  }
 0x9c6   : >> { %v3667_v16 = vpack.c.bf16 %v3666_v4, %v3666_v4 }
 0x9c8   : >> { %5071 = vmatmul.mubr.msk.bf16.vlgmr.msra.gmra.mxu1 %vm2312_vm2, %v3667_v16 }
 0x9c9   : >> { %4939 = vmatpush3.bf16.msra.mxu1 %v5568_v14 }
 0x9ca   : >> { %4940 = vmatprep.subr.bf16.mxu1 %v5570_v26  ;;  %v4783_v26 = vld [vmem:[%s6626_s14] ss:$0 sm:$0xff] }
 0x9cd   : >> { %4941 = vmatpush3.bf16.msra.mxu1 %v5572_v29 }
 0x9ce   : >> { %4942 = vmatprep.subr.bf16.mxu1 %v5574_v31 }
 0x9d1   : >> { %4943 = vmatpush3.bf16.msra.mxu1 %v5576_v34 }
 0x9d2   : >> { %4944 = vmatprep.subr.bf16.mxu1 %v5578_v36 }
 0x9d5   : >> { %4945 = vmatpush3.bf16.msra.mxu1 %v5580_v38  ;;  %v5590_v38 = vld [vmem:[%s6631_s19 + $0x30] sm:$0xff]  }
 0x9d6   : >> { %4946 = vmatprep.subr.bf16.mxu1 %v5581_v39  ;;  %v5591_v39 = vld [vmem:[%s6631_s19 + $0x28] sm:$0xff]  }
 0x9d9   : >> { %4947 = vmatpush3.bf16.msra.mxu1 %v5582_v40  ;;  %v5592_v40 = vld [vmem:[%s6631_s19 + $0x20] sm:$0xff]  }
 0x9da   : >> { %4948 = vmatprep.subr.bf16.mxu1 %v5583_v41  ;;  %v5594_v41 = vld [vmem:[%s6631_s19 + $0x10] sm:$0xff]  }
 0x9dd   : >> { %4949 = vmatpush3.bf16.msra.mxu1 %v5584_v42  ;;  %v5595_v42 = vld [vmem:[%s6631_s19 + $0x8] sm:$0xff]  }
 0x9de   : >> { %4950 = vmatprep.subr.bf16.mxu1 %v5585_v43  ;;  %v5596_v43 = vld [vmem:[%s6631_s19] sm:$0xff]  }
 0x9e1   : >> { %4951 = vmatpush3.bf16.msra.mxu1 %v5586_v27  ;;  %v5597_v27 = vld [vmem:[#allocation15 + $0x38] sm:$0xff]  }
 0x9e2   : >> { %4952 = vmatprep.subr.bf16.mxu1 %v5587_v44  ;;  %v5598_v44 = vld [vmem:[#allocation15 + $0x30] sm:$0xff]  }
 0x9e5   : >> { %4953 = vmatpush3.bf16.msra.mxu1 %v5588_v45  ;;  %v5599_v45 = vld [vmem:[#allocation15 + $0x28] sm:$0xff]  }
 0x9e6   : >> { %5094 = vmatprep.subr.bf16.mxu1 %v5936_v13 }
 0xa70   : >> { %v3414_v46 = vpop.f32.mrf.mxu1 }
 0xa71   : >> { %v3714_v52 = vpack.c.bf16 %v3414_v46, %v3414_v46  ;;  %v5600_v46 = vld [vmem:[#allocation15 + $0x20] sm:$0xff]  }
 0xa72   : >> { %v5036_v47 = vpop.f32.mrf.mxu1 }
 0xa73   : >> { %v5601_v47 = vld [vmem:[#allocation15 + $0x18] sm:$0xff]  }
 0xa74   : >> { %v3417_v48 = vpop.f32.mrf.mxu1 }
 0xa75   : >> { %v5602_v48 = vld [vmem:[#allocation15 + $0x10] sm:$0xff]  }
 0xa76   : >> { %v5037_v49 = vpop.f32.mrf.mxu1 }
 0xa78   : >> { %v3512_v50 = vpop.f32.mrf.mxu1 }
 0xa79   : >> { %v3715_v51 = vpack.c.bf16 %v3512_v50, %v3512_v50 }
 0xa7a   : >> { %v5048_v53 = vpop.f32.mrf.mxu1 }
 0xa7b   : >> { %4013 = vmatprep.mubr.bf16.mxu0 %v3715_v51 }
 0xa7c   : >> { %v3515_v3 = vpop.f32.mrf.mxu1  ;;  %4014 = vmatmul.mubr.bf16.vlgmr.msra.gmra.mxu0 %v3714_v52 }
 0xa7d   : >> { %5090 = vmatprep.mubr.msk.bf16.mxu0 %vm5937_vm0, %v5936_v13  ;;  %5075 = vmatpush3.bf16.msra.mxu0 %v5589_v1  ;;  %v4818_v1 = vld [vmem:[#allocation13] ss:$0 sm:$0xff] }
 0xa7e   : >> { %v5049_v0 = vpop.f32.mrf.mxu1  ;;  %5076 = vmatprep.subr.bf16.mxu0 %v5936_v13 }
 0xa80   : >> { %v3610_v54 = vpop.f32.mrf.mxu1 }
 0xa81   : >> { %v3716_v60 = vpack.c.bf16 %v3610_v54, %v3610_v54  ;;  %5077 = vmatpush3.bf16.msra.mxu0 %v5590_v38 }
 0xa82   : >> { %v5060_v55 = vpop.f32.mrf.mxu1  ;;  %5078 = vmatprep.subr.bf16.mxu0 %v5936_v13 }
 0xa84   : >> { %v3613_v56 = vpop.f32.mrf.mxu1 }
 0xa85   : >> { %5079 = vmatpush3.bf16.msra.mxu0 %v5591_v39  ;;  %v4816_v56 = vld [vmem:[%s6627_s15] ss:$0 sm:$0xff] }
 0xa86   : >> { %v5061_v57 = vpop.f32.mrf.mxu1  ;;  %5080 = vmatprep.subr.bf16.mxu0 %v5936_v13 }
 0xa88   : >> { %v3708_v58 = vpop.f32.mrf.mxu1 }
 0xa89   : >> { %v3717_v59 = vpack.c.bf16 %v3708_v58, %v3708_v58  ;;  %5081 = vmatpush3.bf16.msra.mxu0 %v5592_v40  ;;  %v4817_v58 = vld [vmem:[%s6628_s16] ss:$0 sm:$0xff] }
 0xa8a   : >> { %v5072_v61 = vpop.f32.mrf.mxu1  ;;  %5082 = vmatprep.subr.bf16.mxu0 %v5936_v13 }
 0xa8b   : >> { %4053 = vmatprep.mubr.bf16.mxu1 %v3717_v59 }
 0xa8c   : >> { %v3711_v62 = vpop.f32.mrf.mxu1  ;;  %4054 = vmatmul.mubr.bf16.vlgmr.msra.gmra.mxu1 %v3716_v60 }
 0xa8d   : >> { %5110 = vmatprep.mubr.msk.bf16.mxu1 %vm5937_vm0, %v5936_v13  ;;  %5095 = vmatpush3.bf16.msra.mxu1 %v5597_v27  ;;  %v5603_v62 = vld [vmem:[#allocation15 + $0x8] sm:$0xff]  }
 0xa8e   : >> { %v5073_v63 = vpop.f32.mrf.mxu1  ;;  %5096 = vmatprep.subr.bf16.mxu1 %v5936_v13 }
 0xa8f   : >> { %v5604_v63 = vld [vmem:[#allocation15] sm:$0xff]  }
 0xa91   : >> { %5097 = vmatpush3.bf16.msra.mxu1 %v5598_v44  ;;  %v4836_v44 = vld [vmem:[%s6629_s17] ss:$0 sm:$0xff] }
 0xa92   : >> { %5098 = vmatprep.subr.bf16.mxu1 %v5936_v13 }
 0xa95   : >> { %5099 = vmatpush3.bf16.msra.mxu1 %v5599_v45 }
 0xa96   : >> { %5100 = vmatprep.subr.bf16.mxu1 %v5936_v13 }
 0xa99   : >> { %5101 = vmatpush3.bf16.msra.mxu1 %v5600_v46  ;;  %v4837_v46 = vld [vmem:[%s6630_s18] ss:$0 sm:$0xff] }
 0xa9a   : >> { %5102 = vmatprep.subr.bf16.mxu1 %v5936_v13 }
 0xa9d   : >> { %5103 = vmatpush3.bf16.msra.mxu1 %v5601_v47 }
 0xa9e   : >> { %5104 = vmatprep.subr.bf16.mxu1 %v5936_v13 }
 0xaa1   : >> { %5105 = vmatpush3.bf16.msra.mxu1 %v5602_v48 }
 0xaa2   : >> { %5106 = vmatprep.subr.bf16.mxu1 %v5936_v13 }
 0xaa5   : >> { %5107 = vmatpush3.bf16.msra.mxu1 %v5603_v62 }
 0xaa6   : >> { %5108 = vmatprep.subr.bf16.mxu1 %v5936_v13 }
 0xaa9   : >> { %5109 = vmatpush3.bf16.msra.mxu1 %v5604_v63 }
 0xb3c   : >> { %v4932_v2 = vpop.f32.mrf.mxu0 }
 0xb3e   : >> { %v4933_v4 = vpop.f32.mrf.mxu0 }
 0xb3f   : >> { %v4934_v25 = vadd.f32 %v4933_v4, %v4932_v2 }
 0xb40   : >> { %v4935_v14 = vpop.f32.mrf.mxu0 }
 0xb41   : >> { %v4016_v15 = vadd.f32 %v4934_v25, %v4783_v26 }
 0xb42   : >> { %v4936_v16 = vpop.f32.mrf.mxu0 }
 0xb4c   : >> { %v4954_v33 = vpop.f32.mrf.mxu1 }
 0xb4e   : >> { %v4955_v29 = vpop.f32.mrf.mxu1 }
 0xb4f   : >> { %v4956_v31 = vadd.f32 %v4955_v29, %v4954_v33  ;;  %v4827_v29 = vld [vmem:[%s6634_s22] ss:$0 sm:$0xff] }
 0xb50   : >> { %v4957_v32 = vpop.f32.mrf.mxu1 }
 0xb51   : >> { %v4056_v34 = vadd.f32 %v4956_v31, %v4016_v15 }
 0xb52   : >> { %v4958_v35 = vpop.f32.mrf.mxu1 }
 0xb53   : >> { %v4061_v36 = vadd.f32 %v4056_v34, %v6474_v30  ;;  %v5593_v30 = vld [vmem:[%s6631_s19 + $0x18] sm:$0xff]  }
 0xb54   : >> { %5083 = vmatpush3.bf16.msra.mxu0 %v5593_v30 }
 0xb55   : >> { %4064 = vadd.xlane.f32.xlu0 %v4061_v36  ;;  %v4067_v37 = vmul.f32 %v4061_v36, %v4061_v36  ;;  %5084 = vmatprep.subr.bf16.mxu0 %v5936_v13 }
 0xb57   : >> { %4068 = vadd.xlane.f32.xlu1 %v4067_v37 }
 0xb58   : >> { %5085 = vmatpush3.bf16.msra.mxu0 %v5594_v41 }
 0xb59   : >> { %5086 = vmatprep.subr.bf16.mxu0 %v5936_v13 }
 0xb5c   : >> { %5087 = vmatpush3.bf16.msra.mxu0 %v5595_v42 }
 0xb5d   : >> { %5088 = vmatprep.subr.bf16.mxu0 %v5936_v13 }
 0xb60   : >> { %5089 = vmatpush3.bf16.msra.mxu0 %v5596_v43 }
 0xbde   : >> { %v4065_v49 = vpop.xlane.xlu0 %4064 }
 0xbdf   : >> { %v4066_v50 = vmul.f32 0.03125, %v4065_v49 }
 0xbe0   : >> { %v4069_v51 = vpop.xlane.xlu1 %4068 }
 0xbe1   : >> { %v4071_v52 = vmul.f32 %v4066_v50, %v4066_v50  ;;  %v4070_v53 = vmul.f32 0.03125, %v4069_v51  ;;  %v4073_v54 = vsub.f32 %v4061_v36, %v4066_v50 }
 0xbe3   : >> { %v4072_v3 = vsub.f32 %v4070_v53, %v4071_v52 }
 0xbe5   : >> { %v4074_v0 = vadd.f32 1e-05, %v4072_v3 }
 0xbe7   : >> { %5639 = vrsqrt.f32 %v4074_v0 }
 0xbf4   : >> { %v5640_v55 = vpop.eup %5639 }
 0xbf5   : >> { %v4076_v57 = vmul.f32 %v5640_v55, %v4073_v54 }
 0xbf7   : >> { %v4083_v59 = vmul.f32 %v4816_v56, %v4076_v57 }
 0xbf9   : >> { %v4090_v60 = vadd.f32 %v4817_v58, %v4083_v59 }
 0xbfb   : >> { %v4091_v61 = vpack.c.bf16 %v4090_v60, %v4090_v60 }
 0xbfd   : >> { %5091 = vmatmul.mubr.bf16.vlgmr.msra.gmra.mxu0 %v4091_v61 }
 0xcbd   : >> { %v4197_v2 = vpop.f32.mrf.mxu0 }
 0xcbe   : >> { %v4198_v4 = vadd.f32 %v4818_v1, %v4197_v2 }
 0xcbf   : >> { %v5092_v14 = vpop.f32.mrf.mxu0 }
 0xcc0   : >> { %v4203_v16 = vmax.f32 %v4198_v4, 0.0 }
 0xcc1   : >> { %v4200_v25 = vpop.f32.mrf.mxu0 }
 0xcc2   : >> { %v4204_v26 = vpack.c.bf16 %v4203_v16, %v4203_v16 }
 0xcc3   : >> { %v5093_v33 = vpop.f32.mrf.mxu0 }
 0xcc4   : >> { %5111 = vmatmul.mubr.bf16.vlgmr.msra.gmra.mxu1 %v4204_v26 }
 0xd84   : >> { %v4310_v15 = vpop.f32.mrf.mxu1 }
 0xd85   : >> { %v4311_v31 = vadd.f32 %v4827_v29, %v4310_v15 }
 0xd86   : >> { %v5112_v32 = vpop.f32.mrf.mxu1 }
 0xd87   : >> { %v4316_v34 = vadd.f32 %v4311_v31, %v4090_v60 }
 0xd88   : >> { %v4313_v13 = vpop.f32.mrf.mxu1 }
 0xd89   : >> { %4319 = vadd.xlane.f32.xlu0 %v4316_v34  ;;  %v4322_v35 = vmul.f32 %v4316_v34, %v4316_v34 }
 0xd8a   : >> { %v5113_v36 = vpop.f32.mrf.mxu1 }
 0xd8b   : >> { %4323 = vadd.xlane.f32.xlu1 %v4322_v35 }
 0xe12   : >> { %v4320_v37 = vpop.xlane.xlu0 %4319 }
 0xe13   : >> { %v4321_v38 = vmul.f32 0.03125, %v4320_v37 }
 0xe14   : >> { %v4324_v39 = vpop.xlane.xlu1 %4323 }
 0xe15   : >> { %v4326_v40 = vmul.f32 %v4321_v38, %v4321_v38  ;;  %v4325_v30 = vmul.f32 0.03125, %v4324_v39  ;;  %v4328_v43 = vsub.f32 %v4316_v34, %v4321_v38 }
 0xe17   : >> { %v4327_v41 = vsub.f32 %v4325_v30, %v4326_v40 }
 0xe19   : >> { %v4329_v42 = vadd.f32 1e-05, %v4327_v41 }
 0xe1b   : >> { %5641 = vrsqrt.f32 %v4329_v42 }
 0xe28   : >> { %v5642_v27 = vpop.eup %5641 }
 0xe29   : >> { %v4331_v45 = vmul.f32 %v5642_v27, %v4328_v43 }
 0xe2b   : >> { %v4338_v47 = vmul.f32 %v4836_v44, %v4331_v45  ;;  %1434 = sbr.rel (!%p1432_p2) target bundleno = 407 (0x197), region = 192 }
 0xe2d   : >> { %v4345_v48 = vadd.f32 %v4837_v46, %v4338_v47  }
 0xe2f   : >> { %v6667_v27 = vmov %v4345_v48  ;;  %v4346_v49 = vpack.c.bf16 (%p1432_p2), %v4345_v48, %v4345_v48 }
 0xe31   : > { %4347 = vst [vmem:[%s6223_s0] sm:$0xf] %v4346_v49 }
 0xe32 PF: > { %s6668_s29 = sld [smem:[#allocation21_spill]] }
 0xe38   : > { %s38_s4 = sadd.s32 1, %s6668_s29  }
 0xe39   : > { %p35_p5 = scmp.ge.s32.totalorder %s38_s4, 4  }
 0xe3b   :  { %37 = sbr.rel (!%p35_p5) target bundleno = 16 (0x10), region = 203 }
 0xe40   :  { %4367 = vsyncpa [#allocation3], 1 }
 0xe41   :  { %4369 = vsyncpa [#allocation3 + $0x1], 1 }
 0xe42   :  { %4370 = vsyncpa [#allocation5], 1 }
 0xe43   :  { %4371 = vsyncpa [#allocation8], 1 }
 0xe44   :  { %4372 = vsyncpa [#allocation11], 1 }
 0xe45   :  { %4373 = vsyncpa [#allocation14], 1 }

</bundles_post_ra>
